<compile_context>
chip_gen: v7x
topology: tpu7x:2x2x1
jax: 0.10.0
libtpu: 0.0.40
codegen_flags: <defaults>
</compile_context>

<pallas_src>
import functools

import jax
import jax.numpy as jnp
from jax import lax
from jax.experimental import pallas as pl
from jax.experimental.pallas import tpu as pltpu

D_MODEL = 512     # matches the module's hardcoded d_model
D_FF = 2048       # matches the module's hardcoded d_ff
LN_EPS = 1e-5     # PyTorch nn.LayerNorm default


def _round_up(n: int, m: int) -> int:
    return ((n + m - 1) // m) * m


# ---------------------------------------------------------------------------
# Pallas kernel: fused (x @ W1) -> relu -> (@ W2) -> +residual -> LayerNorm
# Weights are VMEM-resident (constant index_map); single full-K matmuls.
# ---------------------------------------------------------------------------
def _ffn_kernel(x_ref, w1_ref, w2_ref, g_ref, b_ref, o_ref, *, eps):
    x = x_ref[...]                                              # (TR, D) input dtype
    xb = x.astype(jnp.bfloat16)                                 # MXU-native input

    # h = relu(x @ W1), f32 accumulation in the MXU.
    h = jnp.dot(xb, w1_ref[...], preferred_element_type=jnp.float32)
    h = jnp.maximum(h, 0.0)                                     # (TR, D_FF) f32

    # y = h @ W2, again bf16 MXU inputs, f32 accumulation.
    y = jnp.dot(h.astype(jnp.bfloat16), w2_ref[...],
                preferred_element_type=jnp.float32)             # (TR, D) f32

    # Residual add (full-precision x) + LayerNorm in f32.
    z = y + x.astype(jnp.float32)
    mean = jnp.mean(z, axis=-1, keepdims=True)
    zc = z - mean
    var = jnp.mean(zc * zc, axis=-1, keepdims=True)             # biased, as torch
    inv = lax.rsqrt(var + jnp.float32(eps))
    out = zc * inv * g_ref[...].astype(jnp.float32) \
        + b_ref[...].astype(jnp.float32)
    o_ref[...] = out.astype(o_ref.dtype)


# ---------------------------------------------------------------------------
# Wrapper
# ---------------------------------------------------------------------------
def poswise_ffn(x, w1, w2, gamma, beta, *,
                eps: float = LN_EPS,
                tile_rows: int = 512):
    """x: (batch, seq, d_model); w1: (d_model, d_ff); w2: (d_ff, d_model);
    gamma/beta: (d_model,). Returns (batch, seq, d_model)."""
    b, s, d = x.shape
    d_ff = w1.shape[1]
    rows = b * s

    # Flatten (batch, seq) -> rows: lane-dense last dim (d_model = 4*128).
    x2 = x.reshape(rows, d)
    tile_r = min(tile_rows, _round_up(rows, 8))     # clamp to actual row count
    padded = _round_up(rows, tile_r)
    if padded != rows:
        x2 = jnp.pad(x2, ((0, padded - rows), (0, 0)))

    grid = (padded // tile_r,)

    # Cast weights to bf16 once (wrapper-side); halves HBM traffic & VMEM.
    w1_b = w1.astype(jnp.bfloat16)
    w2_b = w2.astype(jnp.bfloat16)
    gamma2 = gamma.reshape(1, d)
    beta2 = beta.reshape(1, d)

    flops = 4 * padded * d * d_ff                   # two matmuls, 2 flop/MAC
    bytes_accessed = (x2.size * x2.dtype.itemsize                 # x in
                      + padded * d * x.dtype.itemsize             # out
                      + w1_b.size * 2 + w2_b.size * 2             # weights once
                      + 2 * d * 4)                                # gamma/beta
    cost = pl.CostEstimate(flops=flops, transcendentals=0,
                           bytes_accessed=bytes_accessed)

    kernel = functools.partial(_ffn_kernel, eps=eps)
    out = pl.pallas_call(
        kernel,
        out_shape=jax.ShapeDtypeStruct((padded, d), x.dtype),
        grid_spec=pltpu.PrefetchScalarGridSpec(
            num_scalar_prefetch=0,
            grid=grid,
            in_specs=[
                pl.BlockSpec((tile_r, d), lambda i: (i, 0)),    # x row tile
                pl.BlockSpec((d, d_ff), lambda i: (0, 0)),      # W1 resident
                pl.BlockSpec((d_ff, d), lambda i: (0, 0)),      # W2 resident
                pl.BlockSpec((1, d), lambda i: (0, 0)),         # gamma
                pl.BlockSpec((1, d), lambda i: (0, 0)),         # beta
            ],
            out_specs=pl.BlockSpec((tile_r, d), lambda i: (i, 0)),
        ),
        compiler_params=pltpu.CompilerParams(
            dimension_semantics=("parallel",),
            vmem_limit_bytes=48 * 1024 * 1024,      # fits v5e/v6e/v7x budgets
        ),
        cost_estimate=cost,
    )(x2, w1_b, w2_b, gamma2, beta2)

    return out[:rows].reshape(b, s, d)


# ---------------------------------------------------------------------------
# Pure-JAX reference (mirrors the PyTorch forward, full f32)
# ---------------------------------------------------------------------------
def ffn_reference(x, w1, w2, gamma, beta, eps=LN_EPS):
    h = jnp.maximum(jnp.einsum("bsd,df->bsf", x, w1,
                               preferred_element_type=jnp.float32), 0.0)
    y = jnp.einsum("bsf,fd->bsd", h, w2, preferred_element_type=jnp.float32)
    z = y + x
    mean = jnp.mean(z, axis=-1, keepdims=True)
    zc = z - mean
    var = jnp.mean(zc * zc, axis=-1, keepdims=True)
    return (zc * lax.rsqrt(var + eps) * gamma + beta).astype(x.dtype)


# ---------------------------------------------------------------------------
# Demo / self-check
# ---------------------------------------------------------------------------
if __name__ == "__main__":
    key = jax.random.PRNGKey(0)
    k1, k2, k3, k4, k5 = jax.random.split(key, 5)

    batch, seq = 2, 8
    x = jax.random.normal(k1, (batch, seq, D_MODEL), dtype=jnp.float32)
    w1 = jax.random.normal(k2, (D_MODEL, D_FF), dtype=jnp.float32) / jnp.sqrt(
        jnp.float32(D_MODEL))
    w2 = jax.random.normal(k3, (D_FF, D_MODEL), dtype=jnp.float32) / jnp.sqrt(
        jnp.float32(D_FF))
    # LayerNorm params (PyTorch init is ones/zeros; perturb slightly so the
    # affine path is actually exercised by the check).
    gamma = 1.0 + 0.1 * jax.random.normal(k4, (D_MODEL,), dtype=jnp.float32)
    beta = 0.1 * jax.random.normal(k5, (D_MODEL,), dtype=jnp.float32)

    out = poswise_ffn(x, w1, w2, gamma, beta)
    out = jax.block_until_ready(out)

    ref = ffn_reference(x, w1, w2, gamma, beta)
    assert out.shape == x.shape and out.dtype == x.dtype
    # bf16 MXU inputs (f32 accumulation + f32 LayerNorm) -> ~1e-2 level error.
    assert bool(jnp.allclose(out, ref, atol=3e-2, rtol=3e-2)), float(
        jnp.max(jnp.abs(out - ref)))

    print("KERNEL_OK")
</pallas_src>

<mosaic_0001>
module attributes {stable_mosaic.version = 11 : i64} {
  func.func @_ffn_kernel(%arg0: i32, %arg1: memref<16x512xf32, #tpu.memory_space<vmem>>, %arg2: memref<512x2048xbf16, #tpu.memory_space<vmem>>, %arg3: memref<2048x512xbf16, #tpu.memory_space<vmem>>, %arg4: memref<1x512xf32, #tpu.memory_space<vmem>>, %arg5: memref<1x512xf32, #tpu.memory_space<vmem>>, %arg6: memref<16x512xf32, #tpu.memory_space<vmem>>) attributes {dimension_semantics = [#tpu.dimension_semantics<parallel>], iteration_bounds = array<i64: 1>, scalar_prefetch = 0 : i64, scratch_operands = 0 : i64, tpu.core_type = #tpu.core_type<tc>, window_params = [{transform_indices = @transform_0, window_bounds = array<i64: 16, 512>}, {pipeline_mode = #tpu.pipeline_mode<synchronous>, transform_indices = @transform_1, window_bounds = array<i64: 512, 2048>}, {pipeline_mode = #tpu.pipeline_mode<synchronous>, transform_indices = @transform_2, window_bounds = array<i64: 2048, 512>}, {pipeline_mode = #tpu.pipeline_mode<synchronous>, transform_indices = @transform_3, window_bounds = array<i64: 1, 512>}, {pipeline_mode = #tpu.pipeline_mode<synchronous>, transform_indices = @transform_4, window_bounds = array<i64: 1, 512>}, {transform_indices = @transform_5, window_bounds = array<i64: 16, 512>}]} {
    %c0 = arith.constant 0 : index
    %c0_0 = arith.constant 0 : index
    %0 = vector.load %arg1[%c0, %c0_0] : memref<16x512xf32, #tpu.memory_space<vmem>>, vector<16x512xf32>
    %1 = arith.truncf %0 : vector<16x512xf32> to vector<16x512xbf16>
    %c0_1 = arith.constant 0 : index
    %c0_2 = arith.constant 0 : index
    %2 = vector.load %arg2[%c0_1, %c0_2] : memref<512x2048xbf16, #tpu.memory_space<vmem>>, vector<512x2048xbf16>
    %cst = arith.constant dense<0.000000e+00> : vector<16x2048xf32>
    %3 = tpu.matmul %1, %2, %cst {dimension_numbers = #tpu.dot_dimension_numbers<[1], [0], [0], [1], [0, 0, 1, 1], [], []>} : vector<16x512xbf16>, vector<512x2048xbf16>, vector<16x2048xf32> -> vector<16x2048xf32>
    %cst_3 = arith.constant 0.000000e+00 : f32
    %4 = vector.broadcast %cst_3 : f32 to vector<16x2048xf32>
    %5 = arith.maximumf %3, %4 : vector<16x2048xf32>
    %6 = arith.truncf %5 : vector<16x2048xf32> to vector<16x2048xbf16>
    %c0_4 = arith.constant 0 : index
    %c0_5 = arith.constant 0 : index
    %7 = vector.load %arg3[%c0_4, %c0_5] : memref<2048x512xbf16, #tpu.memory_space<vmem>>, vector<2048x512xbf16>
    %cst_6 = arith.constant dense<0.000000e+00> : vector<16x512xf32>
    %8 = tpu.matmul %6, %7, %cst_6 {dimension_numbers = #tpu.dot_dimension_numbers<[1], [0], [0], [1], [0, 0, 1, 1], [], []>} : vector<16x2048xbf16>, vector<2048x512xbf16>, vector<16x512xf32> -> vector<16x512xf32>
    %9 = arith.addf %8, %0 : vector<16x512xf32>
    %cst_7 = arith.constant dense<0.000000e+00> : vector<16xf32>
    %10 = vector.multi_reduction <add>, %9, %cst_7 [1] : vector<16x512xf32> to vector<16xf32>
    %11 = vector.shape_cast %10 : vector<16xf32> to vector<16x1xf32>
    %cst_8 = arith.constant 5.120000e+02 : f32
    %12 = vector.broadcast %cst_8 : f32 to vector<16x1xf32>
    %13 = arith.divf %11, %12 : vector<16x1xf32>
    %14 = vector.broadcast %13 : vector<16x1xf32> to vector<16x512xf32>
    %15 = arith.subf %9, %14 : vector<16x512xf32>
    %16 = arith.mulf %15, %15 : vector<16x512xf32>
    %cst_9 = arith.constant dense<0.000000e+00> : vector<16xf32>
    %17 = vector.multi_reduction <add>, %16, %cst_9 [1] : vector<16x512xf32> to vector<16xf32>
    %18 = vector.shape_cast %17 : vector<16xf32> to vector<16x1xf32>
    %cst_10 = arith.constant 5.120000e+02 : f32
    %19 = vector.broadcast %cst_10 : f32 to vector<16x1xf32>
    %20 = arith.divf %18, %19 : vector<16x1xf32>
    %cst_11 = arith.constant 9.99999974E-6 : f32
    %21 = vector.broadcast %cst_11 : f32 to vector<16x1xf32>
    %22 = arith.addf %20, %21 : vector<16x1xf32>
    %23 = math.rsqrt %22 : vector<16x1xf32>
    %24 = vector.broadcast %23 : vector<16x1xf32> to vector<16x512xf32>
    %25 = arith.mulf %15, %24 : vector<16x512xf32>
    %c0_12 = arith.constant 0 : index
    %c0_13 = arith.constant 0 : index
    %26 = vector.load %arg4[%c0_12, %c0_13] : memref<1x512xf32, #tpu.memory_space<vmem>>, vector<1x512xf32>
    %27 = vector.broadcast %26 : vector<1x512xf32> to vector<16x512xf32>
    %28 = arith.mulf %25, %27 : vector<16x512xf32>
    %c0_14 = arith.constant 0 : index
    %c0_15 = arith.constant 0 : index
    %29 = vector.load %arg5[%c0_14, %c0_15] : memref<1x512xf32, #tpu.memory_space<vmem>>, vector<1x512xf32>
    %30 = vector.broadcast %29 : vector<1x512xf32> to vector<16x512xf32>
    %31 = arith.addf %28, %30 : vector<16x512xf32>
    %c0_16 = arith.constant 0 : index
    %c0_17 = arith.constant 0 : index
    %32 = vector.load %arg6[%c0_16, %c0_17] : memref<16x512xf32, #tpu.memory_space<vmem>>, vector<16x512xf32>
    tpu.vector_store %arg6[%c0_16, %c0_17], %31 {strides = array<i32>} : memref<16x512xf32, #tpu.memory_space<vmem>>, vector<16x512xf32>,
    return
  }
  func.func @transform_0(%arg0: i32) -> (i32, i32) {
    %c0_i32 = arith.constant 0 : i32
    %c0_i32_0 = arith.constant 0 : i32
    return %arg0, %c0_i32 : i32, i32
  }
  func.func @transform_1(%arg0: i32) -> (i32, i32) {
    %c0_i32 = arith.constant 0 : i32
    %c0_i32_0 = arith.constant 0 : i32
    %c0_i32_1 = arith.constant 0 : i32
    return %c0_i32, %c0_i32_0 : i32, i32
  }
  func.func @transform_2(%arg0: i32) -> (i32, i32) {
    %c0_i32 = arith.constant 0 : i32
    %c0_i32_0 = arith.constant 0 : i32
    %c0_i32_1 = arith.constant 0 : i32
    return %c0_i32, %c0_i32_0 : i32, i32
  }
  func.func @transform_3(%arg0: i32) -> (i32, i32) {
    %c0_i32 = arith.constant 0 : i32
    %c0_i32_0 = arith.constant 0 : i32
    %c0_i32_1 = arith.constant 0 : i32
    return %c0_i32, %c0_i32_0 : i32, i32
  }
  func.func @transform_4(%arg0: i32) -> (i32, i32) {
    %c0_i32 = arith.constant 0 : i32
    %c0_i32_0 = arith.constant 0 : i32
    %c0_i32_1 = arith.constant 0 : i32
    return %c0_i32, %c0_i32_0 : i32, i32
  }
  func.func @transform_5(%arg0: i32) -> (i32, i32) {
    %c0_i32 = arith.constant 0 : i32
    %c0_i32_0 = arith.constant 0 : i32
    return %arg0, %c0_i32 : i32, i32
  }
}

</mosaic_0001>

<bundles_post_ra>
// kernel: tpu_custom_call.1
= control target key start
LH: loop header
LB: loop body
LE: loop exit
PB: predicated region body
PF: predicated region fallthrough
CT: control target
= control target key end

     0   :  { %10 = vsyncpa [#allocation3], 0  ;;  %s10081_s0 = inlined_call_operand.hbm [shape: f32[16,512], index: 0, kind: input, shape index: {}]   ;;  %s10082_s1 = inlined_call_operand.hbm [shape: bf16[512,2048], index: 1, kind: input, shape index: {}]   ;;  %s10083_s2 = inlined_call_operand.hbm [shape: bf16[2048,512], index: 2, kind: input, shape index: {}]   ;;  %s10084_s3 = inlined_call_operand.hbm [shape: f32[1,512], index: 3, kind: input, shape index: {}]   ;;  %s10085_s4 = inlined_call_operand.hbm [shape: f32[1,512], index: 4, kind: input, shape index: {}]   ;;  %s10086_s5 = inlined_call_operand.hbm [shape: f32[16,512], index: 5, kind: output, shape index: {}]  }
   0x1   :  { %11 = vsyncpa [#allocation6], 0 }
   0x2   :  { %12 = vsyncpa [#allocation9], 0 }
   0x3   :  { %13 = vsyncpa [#allocation4], 0  ;;  %s9857_s18 = smov [#allocation5]   ;;  %s9717_s22 = scalar_lea.hbm %s10082_s1, 65536 }
   0x4   :  { %s31_s19 = sshll.u32 %s9857_s18, 4  ;;  %p9718_p0 = scmp.ne.s32.totalorder %s10082_s1, %s9717_s22  ;;  %s32_s19 = int_to_ptr.vmem [resolvable:$true] %s31_s19 }
   0x5   :  { %p9721_p1 = scmp.lt.u32.totalorder %s9717_s22, %s10082_s1 }
   0x7   :  { %p9723_p2 = pnand %p9721_p1, %p9718_p0 }
   0x9   :  { %9726 = shalt.err (!%p9723_p2)
}
   0xa   :  { %s9727_s27 = scalar_lea.vmem %s32_s19, 65536  ;;  %p9732_p4 = scmp.lt.s32.totalorder %s32_s19, %s32_s19 }
   0xb   :  { %p9728_p3 = scmp.ne.s32.totalorder %s32_s19, %s9727_s27  ;;  %p9733_p5 = scmp.lt.s32.totalorder %s9727_s27, %s9727_s27 }
   0xd   :  { %p9734_p6 = por %p9733_p5, %p9732_p4 }
   0xf   :  { %p9735_p7 = pnand %p9734_p6, %p9728_p3 }
  0x11   :  { %9738 = shalt.err (!%p9735_p7)
}
  0x12   :  { %s9858_s28 = smov 1024   ;;  %s9859_s29 = smov 64  }
  0x13   :  { %37 = dma.hbm_to_vmem [thread:$0]  %s10082_s1, 65536, %s32_s19, [#allocation6], %s9858_s28, %s9858_s28, %s9859_s29  }
  0x14   :  { %s9860_s7 = smov [#allocation8]   ;;  %s9861_s9 = smov [#allocation2]  }
  0x15   :  { %s56_s8 = sshll.u32 %s9860_s7, 4  ;;  %s19_s10 = sshll.u32 %s9861_s9, 4  ;;  %s57_s8 = int_to_ptr.vmem [resolvable:$true] %s56_s8  ;;  %s20_s10 = int_to_ptr.vmem [resolvable:$true] %s19_s10 }
  0x16   :  { %s9739_s13 = scalar_lea.hbm %s10084_s3, 64 }
  0x17   :  { %p9740_p8 = scmp.ne.s32.totalorder %s10084_s3, %s9739_s13  ;;  %p9743_p9 = scmp.lt.u32.totalorder %s9739_s13, %s10084_s3 }
  0x19   :  { %p9745_p10 = pnand %p9743_p9, %p9740_p8 }
  0x1b   :  { %9748 = shalt.err (!%p9745_p10)
}
  0x1c   :  { %s9749_s1 = scalar_lea.vmem %s57_s8, 64  ;;  %p9754_p12 = scmp.lt.s32.totalorder %s57_s8, %s57_s8 }
  0x1d   :  { %p9750_p11 = scmp.ne.s32.totalorder %s57_s8, %s9749_s1  ;;  %p9755_p13 = scmp.lt.s32.totalorder %s9749_s1, %s9749_s1 }
  0x1f   :  { %p9756_p0 = por %p9755_p13, %p9754_p12 }
  0x21   :  { %p9757_p1 = pnand %p9756_p0, %p9750_p11 }
  0x23   :  { %9760 = shalt.err (!%p9757_p1)
}
  0x24   :  { %59 = dma.hbm_to_vmem [thread:$0]  %s10084_s3, 64, %s57_s8, [#allocation9]  }
  0x25   :  { %s9761_s22 = scalar_lea.hbm %s10081_s0, 1024 }
  0x26   :  { %p9762_p2 = scmp.ne.s32.totalorder %s10081_s0, %s9761_s22  ;;  %p9765_p3 = scmp.lt.u32.totalorder %s9761_s22, %s10081_s0 }
  0x28   :  { %p9767_p4 = pnand %p9765_p3, %p9762_p2 }
  0x2a   :  { %9770 = shalt.err (!%p9767_p4)
}
  0x2b   :  { %s9771_s27 = scalar_lea.vmem %s20_s10, 1024  ;;  %p9776_p6 = scmp.lt.s32.totalorder %s20_s10, %s20_s10 }
  0x2c   :  { %p9772_p5 = scmp.ne.s32.totalorder %s20_s10, %s9771_s27  ;;  %p9777_p7 = scmp.lt.s32.totalorder %s9771_s27, %s9771_s27 }
  0x2e   :  { %p9778_p8 = por %p9777_p7, %p9776_p6 }
  0x30   :  { %p9779_p9 = pnand %p9778_p8, %p9772_p5 }
  0x32   :  { %9782 = shalt.err (!%p9779_p9)
}
  0x33   :  { %s9862_s3 = smov 512   ;;  %s9863_s28 = smov 32  }
  0x34   :  { %25 = dma.hbm_to_vmem [thread:$0]  %s10081_s0, 1024, %s20_s10, [#allocation3], %s9862_s3, %s9862_s3, %s9863_s28  }
  0x35   :  { %s9864_s6 = smov [#allocation7]   ;;  %s9783_s11 = scalar_lea.hbm %s10083_s2, 65536 }
  0x36   :  { %s43_s7 = sshll.u32 %s9864_s6, 4  ;;  %p9784_p10 = scmp.ne.s32.totalorder %s10083_s2, %s9783_s11  ;;  %s44_s7 = int_to_ptr.vmem [resolvable:$true] %s43_s7 }
  0x37   :  { %p9787_p11 = scmp.lt.u32.totalorder %s9783_s11, %s10083_s2 }
  0x39   :  { %p9789_p12 = pnand %p9787_p11, %p9784_p10 }
  0x3b   :  { %9792 = shalt.err (!%p9789_p12)
}
  0x3c   :  { %s9793_s16 = scalar_lea.vmem %s44_s7, 65536  ;;  %p9798_p0 = scmp.lt.s32.totalorder %s44_s7, %s44_s7 }
  0x3d   :  { %p9794_p13 = scmp.ne.s32.totalorder %s44_s7, %s9793_s16  ;;  %p9799_p1 = scmp.lt.s32.totalorder %s9793_s16, %s9793_s16 }
  0x3f   :  { %p9800_p2 = por %p9799_p1, %p9798_p0 }
  0x41   :  { %p9801_p3 = pnand %p9800_p2, %p9794_p13 }
  0x43   :  { %9804 = shalt.err (!%p9801_p3)
}
  0x44   :  { %s9865_s0 = smov 256   ;;  %s9866_s10 = smov 16  }
  0x45   :  { %49 = dma.hbm_to_vmem [thread:$0]  %s10083_s2, 65536, %s44_s7, [#allocation6], %s9865_s0, %s9865_s0, %s9866_s10  }
  0x46   :  { %s9867_s18 = smov [#allocation10]   ;;  %s9805_s22 = scalar_lea.hbm %s10085_s4, 64 }
  0x47   :  { %s66_s19 = sshll.u32 %s9867_s18, 4  ;;  %p9806_p4 = scmp.ne.s32.totalorder %s10085_s4, %s9805_s22  ;;  %s67_s19 = int_to_ptr.vmem [resolvable:$true] %s66_s19 }
  0x48   :  { %p9809_p5 = scmp.lt.u32.totalorder %s9805_s22, %s10085_s4 }
  0x4a   :  { %p9811_p6 = pnand %p9809_p5, %p9806_p4 }
  0x4c   :  { %9814 = shalt.err (!%p9811_p6)
}
  0x4d   :  { %s9815_s27 = scalar_lea.vmem %s67_s19, 64  ;;  %p9820_p8 = scmp.lt.s32.totalorder %s67_s19, %s67_s19 }
  0x4e   :  { %p9816_p7 = scmp.ne.s32.totalorder %s67_s19, %s9815_s27  ;;  %p9821_p9 = scmp.lt.s32.totalorder %s9815_s27, %s9815_s27 }
  0x50   :  { %p9822_p10 = por %p9821_p9, %p9820_p8 }
  0x52   :  { %p9823_p11 = pnand %p9822_p10, %p9816_p7 }
  0x54   :  { %9826 = shalt.err (!%p9823_p11)
}
  0x55   :  { %69 = dma.hbm_to_vmem [thread:$0]  %s10085_s4, 64, %s67_s19, [#allocation9]  }
  0x56   :  { %9849 = dma.done.wait [#allocation3], 1024  }
  0x57   :  { %9850 = vsyncadd [#allocation3], 4294966272 }
  0x58   :  { %9851 = dma.done.wait [#allocation6], 131072  }
  0x59   :  { %9852 = vsyncadd [#allocation6], 4294836224 }
  0x5a   :  { %9853 = dma.done.wait [#allocation9], 128  }
  0x5b   :  { %9854 = vsyncadd [#allocation9], 4294967168  ;;  %v97_v0 = vld [vmem:[#allocation5] sm:$0xff]  ;;  %v98_v2 = vld [vmem:[#allocation5 + $0x8] sm:$0xff]  ;;  %s9868_s4 = smov [#allocation11]  }
  0x5c   :  { %v105_v1 = vld [vmem:[#allocation5 + $0x40] sm:$0xff]  ;;  %v106_v4 = vld [vmem:[#allocation5 + $0x48] sm:$0xff]  ;;  %s7791_s30 = sshll.u32 %s9868_s4, 4  ;;  %s7792_s30 = int_to_ptr.vmem [resolvable:$true] %s7791_s30 }
  0x5d   :  { %v7806_v3 = vcombine.high %v97_v0, %v105_v1  ;;  %v7805_v5 = vcombine.low %v97_v0, %v105_v1  ;;  %v113_v6 = vld [vmem:[#allocation5 + $0x80] sm:$0xff]  ;;  %v7808_v8 = vcombine.high %v98_v2, %v106_v4  ;;  %v7807_v9 = vcombine.low %v98_v2, %v106_v4  ;;  %v114_v11 = vld [vmem:[#allocation5 + $0x88] sm:$0xff]  ;;  %s9827_s6 = scalar_lea.vmem %s7792_s30, 1024  ;;  %p9832_p13 = scmp.lt.s32.totalorder %s7792_s30, %s7792_s30 }
  0x5e   :  { %v121_v7 = vld [vmem:[#allocation5 + $0xc0] sm:$0xff]  ;;  %v122_v12 = vld [vmem:[#allocation5 + $0xc8] sm:$0xff]  ;;  %p9828_p12 = scmp.ne.s32.totalorder %s7792_s30, %s9827_s6  ;;  %p9833_p0 = scmp.lt.s32.totalorder %s9827_s6, %s9827_s6 }
  0x5f   :  { %v7822_v10 = vcombine.high %v113_v6, %v121_v7  ;;  %v129_v13 = vld [vmem:[#allocation5 + $0x100] sm:$0xff]  ;;  %3169 = vmatprep.subr.bf16.mxu0 %v7806_v3  ;;  %v7824_v14 = vcombine.high %v114_v11, %v122_v12  ;;  %v130_v16 = vld [vmem:[#allocation5 + $0x108] sm:$0xff]  ;;  %3255 = vmatprep.subr.bf16.mxu1 %v7808_v8  ;;  %v7821_v18 = vcombine.low %v113_v6, %v121_v7 }
  0x60   :  { %v137_v15 = vld [vmem:[#allocation5 + $0x140] sm:$0xff]  ;;  %v138_v17 = vld [vmem:[#allocation5 + $0x148] sm:$0xff]  ;;  %3170 = vmatpush1.bf16.msra.mxu0 %v7805_v5  ;;  %3256 = vmatpush1.bf16.msra.mxu1 %v7807_v9  ;;  %v7823_v19 = vcombine.low %v114_v11, %v122_v12  ;;  %p9834_p1 = por %p9833_p0, %p9832_p13 }
  0x61   :  { %3171 = vmatprep.subr.bf16.mxu0 %v7822_v10  ;;  %v7838_v20 = vcombine.high %v129_v13, %v137_v15  ;;  %3257 = vmatprep.subr.bf16.mxu1 %v7824_v14  ;;  %v7840_v21 = vcombine.high %v130_v16, %v138_v17  ;;  %v145_v22 = vld [vmem:[#allocation5 + $0x180] sm:$0xff]  ;;  %v146_v24 = vld [vmem:[#allocation5 + $0x188] sm:$0xff]  ;;  %v7837_v26 = vcombine.low %v129_v13, %v137_v15 }
  0x62   :  { %v153_v23 = vld [vmem:[#allocation5 + $0x1c0] sm:$0xff]  ;;  %v154_v25 = vld [vmem:[#allocation5 + $0x1c8] sm:$0xff]  ;;  %v7839_v27 = vcombine.low %v130_v16, %v138_v17  ;;  %p9835_p2 = pnand %p9834_p1, %p9828_p12 }
  0x63   :  { %v7854_v28 = vcombine.high %v145_v22, %v153_v23  ;;  %v7856_v29 = vcombine.high %v146_v24, %v154_v25  ;;  %v161_v30 = vld [vmem:[#allocation5 + $0x200] sm:$0xff]  ;;  %v162_v32 = vld [vmem:[#allocation5 + $0x208] sm:$0xff]  ;;  %v7853_v34 = vcombine.low %v145_v22, %v153_v23  ;;  %v7855_v35 = vcombine.low %v146_v24, %v154_v25 }
  0x64   :  { %3172 = vmatpush1.bf16.msra.mxu0 %v7821_v18  ;;  %3258 = vmatpush1.bf16.msra.mxu1 %v7823_v19  ;;  %v169_v31 = vld [vmem:[#allocation5 + $0x240] sm:$0xff]  ;;  %v170_v33 = vld [vmem:[#allocation5 + $0x248] sm:$0xff] }
  0x65   :  { %3173 = vmatprep.subr.bf16.mxu0 %v7838_v20  ;;  %3259 = vmatprep.subr.bf16.mxu1 %v7840_v21  ;;  %v7870_v36 = vcombine.high %v161_v30, %v169_v31  ;;  %v7872_v37 = vcombine.high %v162_v32, %v170_v33  ;;  %v177_v38 = vld [vmem:[#allocation5 + $0x280] sm:$0xff]  ;;  %v178_v40 = vld [vmem:[#allocation5 + $0x288] sm:$0xff]  ;;  %v7869_v42 = vcombine.low %v161_v30, %v169_v31 }
  0x66   :  { %v185_v39 = vld [vmem:[#allocation5 + $0x2c0] sm:$0xff]  ;;  %v186_v41 = vld [vmem:[#allocation5 + $0x2c8] sm:$0xff]  ;;  %v7871_v43 = vcombine.low %v162_v32, %v170_v33 }
  0x67   :  { %v7886_v44 = vcombine.high %v177_v38, %v185_v39  ;;  %v7888_v45 = vcombine.high %v178_v40, %v186_v41  ;;  %v193_v46 = vld [vmem:[#allocation5 + $0x300] sm:$0xff]  ;;  %v194_v48 = vld [vmem:[#allocation5 + $0x308] sm:$0xff]  ;;  %v7885_v50 = vcombine.low %v177_v38, %v185_v39  ;;  %v7887_v51 = vcombine.low %v178_v40, %v186_v41 }
  0x68   :  { %3174 = vmatpush1.bf16.msra.mxu0 %v7837_v26  ;;  %3260 = vmatpush1.bf16.msra.mxu1 %v7839_v27  ;;  %v201_v47 = vld [vmem:[#allocation5 + $0x340] sm:$0xff]  ;;  %v202_v49 = vld [vmem:[#allocation5 + $0x348] sm:$0xff] }
  0x69   :  { %3175 = vmatprep.subr.bf16.mxu0 %v7854_v28  ;;  %3261 = vmatprep.subr.bf16.mxu1 %v7856_v29  ;;  %v7902_v52 = vcombine.high %v193_v46, %v201_v47  ;;  %v86_v53 = vld [vmem:[#allocation2 + $0x8] sm:$0xff]  ;;  %v7904_v55 = vcombine.high %v194_v48, %v202_v49  ;;  %v209_v56 = vld [vmem:[#allocation5 + $0x380] sm:$0xff]  ;;  %v7901_v61 = vcombine.low %v193_v46, %v201_v47 }
  0x6a   :  { %v90_v54 = vld [vmem:[#allocation2 + $0x28] sm:$0xff]  ;;  %v217_v57 = vld [vmem:[#allocation5 + $0x3c0] sm:$0xff]  ;;  %v7903_v62 = vcombine.low %v194_v48, %v202_v49 }
  0x6b   :  { %v9962_v58 = vpack.c.bf16 %v90_v54, %v86_v53  ;;  %v210_v59 = vld [vmem:[#allocation5 + $0x388] sm:$0xff]  ;;  %v7918_v63 = vcombine.high %v209_v56, %v217_v57  ;;  %v225_v1 = vld [vmem:[#allocation5 + $0x400] sm:$0xff]  ;;  %v7917_v5 = vcombine.low %v209_v56, %v217_v57 }
  0x6c   :  { %3176 = vmatpush1.bf16.msra.mxu0 %v7853_v34  ;;  %3262 = vmatpush1.bf16.msra.mxu1 %v7855_v35  ;;  %v218_v60 = vld [vmem:[#allocation5 + $0x3c8] sm:$0xff]  ;;  %v233_v2 = vld [vmem:[#allocation5 + $0x440] sm:$0xff] }
  0x6d   :  { %3177 = vmatprep.subr.bf16.mxu0 %v7870_v36  ;;  %3263 = vmatprep.subr.bf16.mxu1 %v7872_v37  ;;  %v7920_v0 = vcombine.high %v210_v59, %v218_v60  ;;  %v226_v3 = vld [vmem:[#allocation5 + $0x408] sm:$0xff]  ;;  %v7919_v6 = vcombine.low %v210_v59, %v218_v60  ;;  %v7934_v7 = vcombine.high %v225_v1, %v233_v2  ;;  %v241_v9 = vld [vmem:[#allocation5 + $0x480] sm:$0xff] }
  0x6e   :  { %3201 = vmatprep.mubr.bf16.mxu0 %v9962_v58  ;;  %3287 = vmatprep.mubr.bf16.mxu1 %v9962_v58  ;;  %v234_v4 = vld [vmem:[#allocation5 + $0x448] sm:$0xff]  ;;  %v249_v10 = vld [vmem:[#allocation5 + $0x4c0] sm:$0xff]  ;;  %v7933_v13 = vcombine.low %v225_v1, %v233_v2 }
  0x6f   :  { %v7936_v8 = vcombine.high %v226_v3, %v234_v4  ;;  %v242_v11 = vld [vmem:[#allocation5 + $0x488] sm:$0xff]  ;;  %v7935_v14 = vcombine.low %v226_v3, %v234_v4  ;;  %v7950_v15 = vcombine.high %v241_v9, %v249_v10  ;;  %v257_v17 = vld [vmem:[#allocation5 + $0x500] sm:$0xff]  ;;  %v7949_v21 = vcombine.low %v241_v9, %v249_v10 }
  0x70   :  { %3178 = vmatpush1.bf16.msra.mxu0 %v7869_v42  ;;  %3264 = vmatpush1.bf16.msra.mxu1 %v7871_v43  ;;  %v250_v12 = vld [vmem:[#allocation5 + $0x4c8] sm:$0xff]  ;;  %v265_v18 = vld [vmem:[#allocation5 + $0x540] sm:$0xff] }
  0x71   :  { %3179 = vmatprep.subr.bf16.mxu0 %v7886_v44  ;;  %3265 = vmatprep.subr.bf16.mxu1 %v7888_v45  ;;  %v7952_v16 = vcombine.high %v242_v11, %v250_v12  ;;  %v258_v19 = vld [vmem:[#allocation5 + $0x508] sm:$0xff]  ;;  %v7951_v22 = vcombine.low %v242_v11, %v250_v12  ;;  %v7966_v23 = vcombine.high %v257_v17, %v265_v18  ;;  %v273_v25 = vld [vmem:[#allocation5 + $0x580] sm:$0xff] }
  0x72   :  { %v266_v20 = vld [vmem:[#allocation5 + $0x548] sm:$0xff]  ;;  %v281_v26 = vld [vmem:[#allocation5 + $0x5c0] sm:$0xff]  ;;  %v7965_v29 = vcombine.low %v257_v17, %v265_v18  ;;  %v88_v17 = vld [vmem:[#allocation2 + $0x18] sm:$0xff] }
  0x73   :  { %v7968_v24 = vcombine.high %v258_v19, %v266_v20  ;;  %v274_v27 = vld [vmem:[#allocation5 + $0x588] sm:$0xff]  ;;  %v7967_v30 = vcombine.low %v258_v19, %v266_v20  ;;  %v7982_v31 = vcombine.high %v273_v25, %v281_v26  ;;  %v289_v33 = vld [vmem:[#allocation5 + $0x600] sm:$0xff]  ;;  %v7981_v37 = vcombine.low %v273_v25, %v281_v26  ;;  %v92_v18 = vld [vmem:[#allocation2 + $0x38] sm:$0xff] }
  0x74   :  { %3180 = vmatpush1.bf16.msra.mxu0 %v7885_v50  ;;  %3266 = vmatpush1.bf16.msra.mxu1 %v7887_v51  ;;  %v282_v28 = vld [vmem:[#allocation5 + $0x5c8] sm:$0xff]  ;;  %v297_v34 = vld [vmem:[#allocation5 + $0x640] sm:$0xff]  ;;  %v9968_v25 = vpack.c.bf16 %v92_v18, %v88_v17 }
  0x75   :  { %3181 = vmatprep.subr.bf16.mxu0 %v7902_v52  ;;  %3267 = vmatprep.subr.bf16.mxu1 %v7904_v55  ;;  %v7984_v32 = vcombine.high %v274_v27, %v282_v28  ;;  %v290_v35 = vld [vmem:[#allocation5 + $0x608] sm:$0xff]  ;;  %v7983_v38 = vcombine.low %v274_v27, %v282_v28  ;;  %v7998_v39 = vcombine.high %v289_v33, %v297_v34  ;;  %v305_v41 = vld [vmem:[#allocation5 + $0x680] sm:$0xff] }
  0x76   :  { %v298_v36 = vld [vmem:[#allocation5 + $0x648] sm:$0xff]  ;;  %v313_v42 = vld [vmem:[#allocation5 + $0x6c0] sm:$0xff]  ;;  %v7997_v45 = vcombine.low %v289_v33, %v297_v34 }
  0x77   :  { %v8000_v40 = vcombine.high %v290_v35, %v298_v36  ;;  %v306_v43 = vld [vmem:[#allocation5 + $0x688] sm:$0xff]  ;;  %v7999_v46 = vcombine.low %v290_v35, %v298_v36  ;;  %v8014_v47 = vcombine.high %v305_v41, %v313_v42  ;;  %v321_v49 = vld [vmem:[#allocation5 + $0x700] sm:$0xff]  ;;  %v8013_v53 = vcombine.low %v305_v41, %v313_v42 }
  0x78   :  { %3182 = vmatpush1.bf16.msra.mxu0 %v7901_v61  ;;  %3268 = vmatpush1.bf16.msra.mxu1 %v7903_v62  ;;  %v314_v44 = vld [vmem:[#allocation5 + $0x6c8] sm:$0xff]  ;;  %v329_v50 = vld [vmem:[#allocation5 + $0x740] sm:$0xff] }
  0x79   :  { %3183 = vmatprep.subr.bf16.mxu0 %v7918_v63  ;;  %3269 = vmatprep.subr.bf16.mxu1 %v7920_v0  ;;  %v8016_v48 = vcombine.high %v306_v43, %v314_v44  ;;  %v322_v51 = vld [vmem:[#allocation5 + $0x708] sm:$0xff]  ;;  %v8015_v54 = vcombine.low %v306_v43, %v314_v44  ;;  %v8030_v55 = vcombine.high %v321_v49, %v329_v50  ;;  %v337_v57 = vld [vmem:[#allocation5 + $0x780] sm:$0xff] }
  0x7a   :  { %v330_v52 = vld [vmem:[#allocation5 + $0x748] sm:$0xff]  ;;  %v345_v59 = vld [vmem:[#allocation5 + $0x7c0] sm:$0xff]  ;;  %v8029_v62 = vcombine.low %v321_v49, %v329_v50 }
  0x7b   :  { %v8032_v56 = vcombine.high %v322_v51, %v330_v52  ;;  %v338_v60 = vld [vmem:[#allocation5 + $0x788] sm:$0xff]  ;;  %v8031_v63 = vcombine.low %v322_v51, %v330_v52  ;;  %v8046_v0 = vcombine.high %v337_v57, %v345_v59  ;;  %v353_v2 = vld [vmem:[#allocation5 + $0x800] sm:$0xff] }
  0x7c   :  { %3184 = vmatpush1.bf16.msra.mxu0 %v7917_v5  ;;  %3270 = vmatpush1.bf16.msra.mxu1 %v7919_v6  ;;  %v346_v61 = vld [vmem:[#allocation5 + $0x7c8] sm:$0xff]  ;;  %v361_v3 = vld [vmem:[#allocation5 + $0x840] sm:$0xff]  ;;  %v8045_v6 = vcombine.low %v337_v57, %v345_v59 }
  0x7d   :  { %3185 = vmatprep.subr.bf16.mxu0 %v7934_v7  ;;  %3271 = vmatprep.subr.bf16.mxu1 %v7936_v8  ;;  %v8048_v1 = vcombine.high %v338_v60, %v346_v61  ;;  %v354_v4 = vld [vmem:[#allocation5 + $0x808] sm:$0xff]  ;;  %v85_v7 = vld [vmem:[#allocation2] sm:$0xff]  ;;  %v8047_v9 = vcombine.low %v338_v60, %v346_v61  ;;  %v8062_v10 = vcombine.high %v353_v2, %v361_v3 }
  0x7e   :  { %v362_v5 = vld [vmem:[#allocation5 + $0x848] sm:$0xff]  ;;  %v89_v8 = vld [vmem:[#allocation2 + $0x20] sm:$0xff]  ;;  %v8061_v19 = vcombine.low %v353_v2, %v361_v3 }
  0x7f   :  { %v8064_v11 = vcombine.high %v354_v4, %v362_v5  ;;  %v369_v12 = vld [vmem:[#allocation5 + $0x880] sm:$0xff]  ;;  %v8063_v20 = vcombine.low %v354_v4, %v362_v5  ;;  %v386_v26 = vld [vmem:[#allocation5 + $0x908] sm:$0xff] }
  0x80   :  { %3186 = vmatpush1.bf16.msra.mxu0 %v7933_v13  ;;  %3272 = vmatpush1.bf16.msra.mxu1 %v7935_v14  ;;  %v377_v13 = vld [vmem:[#allocation5 + $0x8c0] sm:$0xff]  ;;  %v370_v14 = vld [vmem:[#allocation5 + $0x888] sm:$0xff] }
  0x81   :  { %3187 = vmatprep.subr.bf16.mxu0 %v7950_v15  ;;  %3273 = vmatprep.subr.bf16.mxu1 %v7952_v16  ;;  %v9966_v15 = vpack.c.bf16 %v89_v8, %v85_v7  ;;  %v378_v16 = vld [vmem:[#allocation5 + $0x8c8] sm:$0xff]  ;;  %v8077_v28 = vcombine.low %v369_v12, %v377_v13  ;;  %v481_v8 = vld [vmem:[#allocation5 + $0xc00] sm:$0xff] }
  0x82   :  { %v394_v27 = vld [vmem:[#allocation5 + $0x948] sm:$0xff]  ;;  %v497_v17 = vld [vmem:[#allocation5 + $0xc80] sm:$0xff] }
  0x83   :  { %v402_v33 = vld [vmem:[#allocation5 + $0x988] sm:$0xff]  ;;  %v8096_v34 = vcombine.high %v386_v26, %v394_v27  ;;  %v505_v18 = vld [vmem:[#allocation5 + $0xcc0] sm:$0xff] }
  0x84   :  { %3188 = vmatpush1.bf16.msra.mxu0 %v7949_v21  ;;  %3274 = vmatpush1.bf16.msra.mxu1 %v7951_v22  ;;  %v8078_v21 = vcombine.high %v369_v12, %v377_v13  ;;  %v8080_v22 = vcombine.high %v370_v14, %v378_v16  ;;  %v410_v35 = vld [vmem:[#allocation5 + $0x9c8] sm:$0xff] }
  0x85   :  { %3189 = vmatprep.subr.bf16.mxu0 %v7966_v23  ;;  %3275 = vmatprep.subr.bf16.mxu1 %v7968_v24  ;;  %v385_v23 = vld [vmem:[#allocation5 + $0x900] sm:$0xff]  ;;  %v418_v41 = vld [vmem:[#allocation5 + $0xa08] sm:$0xff]  ;;  %v8112_v42 = vcombine.high %v402_v33, %v410_v35 }
  0x86   :  { %v393_v24 = vld [vmem:[#allocation5 + $0x940] sm:$0xff]  ;;  %v426_v43 = vld [vmem:[#allocation5 + $0xa48] sm:$0xff] }
  0x87   :  { %v8093_v36 = vcombine.low %v385_v23, %v393_v24  ;;  %v434_v49 = vld [vmem:[#allocation5 + $0xa88] sm:$0xff]  ;;  %v8128_v50 = vcombine.high %v418_v41, %v426_v43 }
  0x88   :  { %3190 = vmatpush1.bf16.msra.mxu0 %v7965_v29  ;;  %3276 = vmatpush1.bf16.msra.mxu1 %v7967_v30  ;;  %v8079_v29 = vcombine.low %v370_v14, %v378_v16  ;;  %v8094_v30 = vcombine.high %v385_v23, %v393_v24  ;;  %v442_v51 = vld [vmem:[#allocation5 + $0xac8] sm:$0xff]  ;;  %v8206_v24 = vcombine.high %v497_v17, %v505_v18 }
  0x89   :  { %3191 = vmatprep.subr.bf16.mxu0 %v7982_v31  ;;  %3277 = vmatprep.subr.bf16.mxu1 %v7984_v32  ;;  %v401_v31 = vld [vmem:[#allocation5 + $0x980] sm:$0xff]  ;;  %v450_v57 = vld [vmem:[#allocation5 + $0xb08] sm:$0xff]  ;;  %v8144_v59 = vcombine.high %v434_v49, %v442_v51 }
  0x8a   :  { %v409_v32 = vld [vmem:[#allocation5 + $0x9c0] sm:$0xff]  ;;  %v458_v60 = vld [vmem:[#allocation5 + $0xb48] sm:$0xff] }
  0x8b   :  { %v8109_v44 = vcombine.low %v401_v31, %v409_v32  ;;  %v466_v2 = vld [vmem:[#allocation5 + $0xb88] sm:$0xff]  ;;  %v8160_v3 = vcombine.high %v450_v57, %v458_v60 }
  0x8c   :  { %3192 = vmatpush1.bf16.msra.mxu0 %v7981_v37  ;;  %3278 = vmatpush1.bf16.msra.mxu1 %v7983_v38  ;;  %v8095_v37 = vcombine.low %v386_v26, %v394_v27  ;;  %v8110_v38 = vcombine.high %v401_v31, %v409_v32  ;;  %v474_v4 = vld [vmem:[#allocation5 + $0xbc8] sm:$0xff]  ;;  %v513_v26 = vld [vmem:[#allocation5 + $0xd00] sm:$0xff]  ;;  %v8205_v31 = vcombine.low %v497_v17, %v505_v18  ;;  %v91_v17 = vld [vmem:[#allocation2 + $0x30] sm:$0xff] }
  0x8d   :  { %3193 = vmatprep.subr.bf16.mxu0 %v7998_v39  ;;  %3279 = vmatprep.subr.bf16.mxu1 %v8000_v40  ;;  %v417_v39 = vld [vmem:[#allocation5 + $0xa00] sm:$0xff]  ;;  %v490_v12 = vld [vmem:[#allocation5 + $0xc48] sm:$0xff]  ;;  %v8175_v14 = vcombine.low %v466_v2, %v474_v4  ;;  %v108_v18 = vld [vmem:[#allocation5 + $0x58] sm:$0xff] }
  0x8e   :  { %v425_v40 = vld [vmem:[#allocation5 + $0xa40] sm:$0xff] }
  0x8f   :  { %v8125_v52 = vcombine.low %v417_v39, %v425_v40  ;;  %v521_v27 = vld [vmem:[#allocation5 + $0xd40] sm:$0xff] }
  0x90   :  { %3194 = vmatpush1.bf16.msra.mxu0 %v7997_v45  ;;  %3280 = vmatpush1.bf16.msra.mxu1 %v7999_v46  ;;  %v8111_v45 = vcombine.low %v402_v33, %v410_v35  ;;  %v8126_v46 = vcombine.high %v417_v39, %v425_v40  ;;  %v8222_v33 = vcombine.high %v513_v26, %v521_v27  ;;  %v537_v35 = vld [vmem:[#allocation5 + $0xdc0] sm:$0xff] }
  0x91   :  { %3195 = vmatprep.subr.bf16.mxu0 %v8014_v47  ;;  %3281 = vmatprep.subr.bf16.mxu1 %v8016_v48  ;;  %v433_v47 = vld [vmem:[#allocation5 + $0xa80] sm:$0xff]  ;;  %v8221_v39 = vcombine.low %v513_v26, %v521_v27  ;;  %v124_v27 = vld [vmem:[#allocation5 + $0xd8] sm:$0xff] }
  0x92   :  { %v441_v48 = vld [vmem:[#allocation5 + $0xac0] sm:$0xff] }
  0x93   :  { %v8141_v61 = vcombine.low %v433_v47, %v441_v48 }
  0x94   :  { %3196 = vmatpush1.bf16.msra.mxu0 %v8013_v53  ;;  %3282 = vmatpush1.bf16.msra.mxu1 %v8015_v54  ;;  %v8127_v53 = vcombine.low %v418_v41, %v426_v43  ;;  %v8142_v54 = vcombine.high %v433_v47, %v441_v48  ;;  %v553_v43 = vld [vmem:[#allocation5 + $0xe40] sm:$0xff] }
  0x95   :  { %3197 = vmatprep.subr.bf16.mxu0 %v8030_v55  ;;  %3283 = vmatprep.subr.bf16.mxu1 %v8032_v56  ;;  %v449_v55 = vld [vmem:[#allocation5 + $0xb00] sm:$0xff] }
  0x96   :  { %v457_v56 = vld [vmem:[#allocation5 + $0xb40] sm:$0xff] }
  0x97   :  { %v8157_v5 = vcombine.low %v449_v55, %v457_v56 }
  0x98   :  { %3198 = vmatpush1.bf16.msra.mxu0 %v8029_v62  ;;  %3284 = vmatpush1.bf16.msra.mxu1 %v8031_v63  ;;  %v8143_v62 = vcombine.low %v434_v49, %v442_v51  ;;  %v8158_v63 = vcombine.high %v449_v55, %v457_v56  ;;  %v569_v51 = vld [vmem:[#allocation5 + $0xec0] sm:$0xff] }
  0x99   :  { %3199 = vmatprep.subr.bf16.mxu0 %v8046_v0  ;;  %3285 = vmatprep.subr.bf16.mxu1 %v8048_v1  ;;  %v465_v0 = vld [vmem:[#allocation5 + $0xb80] sm:$0xff] }
  0x9a   :  { %v473_v1 = vld [vmem:[#allocation5 + $0xbc0] sm:$0xff] }
  0x9b   :  { %v8174_v7 = vcombine.high %v465_v0, %v473_v1  ;;  %v8173_v13 = vcombine.low %v465_v0, %v473_v1 }
  0x9c   :  { %3200 = vmatpush1.bf16.msra.mxu0 %v8045_v6  ;;  %3286 = vmatpush1.bf16.msra.mxu1 %v8047_v9  ;;  %v8159_v6 = vcombine.low %v450_v57, %v458_v60  ;;  %v489_v9 = vld [vmem:[#allocation5 + $0xc40] sm:$0xff] }
  0x9d   :  { %3212 = vmatprep.subr.bf16.mxu0 %v8062_v10  ;;  %3298 = vmatprep.subr.bf16.mxu1 %v8064_v11  ;;  %v482_v10 = vld [vmem:[#allocation5 + $0xc08] sm:$0xff]  ;;  %v8176_v11 = vcombine.high %v466_v2, %v474_v4  ;;  %v8190_v16 = vcombine.high %v481_v8, %v489_v9  ;;  %v585_v60 = vld [vmem:[#allocation5 + $0xf40] sm:$0xff] }
  0x9e   :  { %v8191_v23 = vcombine.low %v482_v10, %v490_v12  ;;  %v601_v4 = vld [vmem:[#allocation5 + $0xfc0] sm:$0xff] }
  0x9f   :  { %3202 = vmatmul.mubr.bf16.vlgmr.msra.gmra.mrb[0].mxu0 %v9966_v15  ;;  %3288 = vmatmul.mubr.bf16.vlgmr.msra.gmra.mrb[0].mxu1 %v9966_v15 }
  0xa0   :  { %3213 = vmatpush1.bf16.msra.mxu0 %v8061_v19  ;;  %3299 = vmatpush1.bf16.msra.mxu1 %v8063_v20  ;;  %v498_v19 = vld [vmem:[#allocation5 + $0xc88] sm:$0xff]  ;;  %v8192_v20 = vcombine.high %v482_v10, %v490_v12  ;;  %v107_v12 = vld [vmem:[#allocation5 + $0x50] sm:$0xff] }
  0xa1   :  { %3214 = vmatprep.subr.bf16.mxu0 %v8078_v21  ;;  %3300 = vmatprep.subr.bf16.mxu1 %v8080_v22  ;;  %v506_v21 = vld [vmem:[#allocation5 + $0xcc8] sm:$0xff]  ;;  %v8189_v22 = vcombine.low %v481_v8, %v489_v9 }
  0xa2   :  { %3244 = vmatprep.mubr.bf16.mxu0 %v9968_v25  ;;  %3330 = vmatprep.mubr.bf16.mxu1 %v9968_v25  ;;  %v8207_v32 = vcombine.low %v498_v19, %v506_v21 }
  0xa4   :  { %3215 = vmatpush1.bf16.msra.mxu0 %v8077_v28  ;;  %3301 = vmatpush1.bf16.msra.mxu1 %v8079_v29  ;;  %v514_v28 = vld [vmem:[#allocation5 + $0xd08] sm:$0xff]  ;;  %v8208_v29 = vcombine.high %v498_v19, %v506_v21 }
  0xa5   :  { %3216 = vmatprep.subr.bf16.mxu0 %v8094_v30  ;;  %3302 = vmatprep.subr.bf16.mxu1 %v8096_v34  ;;  %v522_v30 = vld [vmem:[#allocation5 + $0xd48] sm:$0xff]  ;;  %v529_v34 = vld [vmem:[#allocation5 + $0xd80] sm:$0xff] }
  0xa6   :  { %v8223_v40 = vcombine.low %v514_v28, %v522_v30  ;;  %v8238_v41 = vcombine.high %v529_v34, %v537_v35  ;;  %v8237_v47 = vcombine.low %v529_v34, %v537_v35  ;;  %v132_v34 = vld [vmem:[#allocation5 + $0x118] sm:$0xff] }
  0xa8   :  { %3217 = vmatpush1.bf16.msra.mxu0 %v8093_v36  ;;  %3303 = vmatpush1.bf16.msra.mxu1 %v8095_v37  ;;  %v530_v36 = vld [vmem:[#allocation5 + $0xd88] sm:$0xff]  ;;  %v8224_v37 = vcombine.high %v514_v28, %v522_v30 }
  0xa9   :  { %3218 = vmatprep.subr.bf16.mxu0 %v8110_v38  ;;  %3304 = vmatprep.subr.bf16.mxu1 %v8112_v42  ;;  %v538_v38 = vld [vmem:[#allocation5 + $0xdc8] sm:$0xff]  ;;  %v545_v42 = vld [vmem:[#allocation5 + $0xe00] sm:$0xff] }
  0xaa   :  { %v8239_v48 = vcombine.low %v530_v36, %v538_v38  ;;  %v8254_v49 = vcombine.high %v545_v42, %v553_v43  ;;  %v8253_v55 = vcombine.low %v545_v42, %v553_v43  ;;  %v148_v42 = vld [vmem:[#allocation5 + $0x198] sm:$0xff] }
  0xac   :  { %3219 = vmatpush1.bf16.msra.mxu0 %v8109_v44  ;;  %3305 = vmatpush1.bf16.msra.mxu1 %v8111_v45  ;;  %v546_v44 = vld [vmem:[#allocation5 + $0xe08] sm:$0xff]  ;;  %v8240_v45 = vcombine.high %v530_v36, %v538_v38  ;;  %v140_v36 = vld [vmem:[#allocation5 + $0x158] sm:$0xff] }
  0xad   :  { %3220 = vmatprep.subr.bf16.mxu0 %v8126_v46  ;;  %3306 = vmatprep.subr.bf16.mxu1 %v8128_v50  ;;  %v554_v46 = vld [vmem:[#allocation5 + $0xe48] sm:$0xff]  ;;  %v561_v50 = vld [vmem:[#allocation5 + $0xe80] sm:$0xff]  ;;  %v7844_v43 = vcombine.high %v132_v34, %v140_v36 }
  0xae   :  { %v8255_v56 = vcombine.low %v546_v44, %v554_v46  ;;  %v8270_v57 = vcombine.high %v561_v50, %v569_v51  ;;  %v8269_v0 = vcombine.low %v561_v50, %v569_v51  ;;  %v164_v50 = vld [vmem:[#allocation5 + $0x218] sm:$0xff] }
  0xb0   :  { %3221 = vmatpush1.bf16.msra.mxu0 %v8125_v52  ;;  %3307 = vmatpush1.bf16.msra.mxu1 %v8127_v53  ;;  %v562_v52 = vld [vmem:[#allocation5 + $0xe88] sm:$0xff]  ;;  %v8256_v53 = vcombine.high %v546_v44, %v554_v46  ;;  %v156_v44 = vld [vmem:[#allocation5 + $0x1d8] sm:$0xff]  ;;  %v7843_v46 = vcombine.low %v132_v34, %v140_v36  ;;  %v259_v36 = vld [vmem:[#allocation5 + $0x510] sm:$0xff] }
  0xb1   :  { %3222 = vmatprep.subr.bf16.mxu0 %v8142_v54  ;;  %3308 = vmatprep.subr.bf16.mxu1 %v8144_v59  ;;  %v570_v54 = vld [vmem:[#allocation5 + $0xec8] sm:$0xff]  ;;  %v577_v59 = vld [vmem:[#allocation5 + $0xf00] sm:$0xff]  ;;  %v7860_v51 = vcombine.high %v148_v42, %v156_v44 }
  0xb2   :  { %v8271_v1 = vcombine.low %v562_v52, %v570_v54  ;;  %v8286_v2 = vcombine.high %v577_v59, %v585_v60  ;;  %v8285_v8 = vcombine.low %v577_v59, %v585_v60  ;;  %v180_v59 = vld [vmem:[#allocation5 + $0x298] sm:$0xff] }
  0xb4   :  { %3223 = vmatpush1.bf16.msra.mxu0 %v8141_v61  ;;  %3309 = vmatpush1.bf16.msra.mxu1 %v8143_v62  ;;  %v578_v61 = vld [vmem:[#allocation5 + $0xf08] sm:$0xff]  ;;  %v8272_v62 = vcombine.high %v562_v52, %v570_v54  ;;  %v172_v52 = vld [vmem:[#allocation5 + $0x258] sm:$0xff]  ;;  %v7859_v54 = vcombine.low %v148_v42, %v156_v44  ;;  %v275_v44 = vld [vmem:[#allocation5 + $0x590] sm:$0xff] }
  0xb5   :  { %3224 = vmatprep.subr.bf16.mxu0 %v8158_v63  ;;  %3310 = vmatprep.subr.bf16.mxu1 %v8160_v3  ;;  %v586_v63 = vld [vmem:[#allocation5 + $0xf48] sm:$0xff]  ;;  %v593_v3 = vld [vmem:[#allocation5 + $0xf80] sm:$0xff]  ;;  %v7876_v60 = vcombine.high %v164_v50, %v172_v52 }
  0xb6   :  { %v8287_v9 = vcombine.low %v578_v61, %v586_v63  ;;  %v8302_v10 = vcombine.high %v593_v3, %v601_v4  ;;  %v8301_v19 = vcombine.low %v593_v3, %v601_v4  ;;  %v196_v3 = vld [vmem:[#allocation5 + $0x318] sm:$0xff] }
  0xb8   :  { %3225 = vmatpush1.bf16.msra.mxu0 %v8157_v5  ;;  %3311 = vmatpush1.bf16.msra.mxu1 %v8159_v6  ;;  %v594_v5 = vld [vmem:[#allocation5 + $0xf88] sm:$0xff]  ;;  %v8288_v6 = vcombine.high %v578_v61, %v586_v63  ;;  %v188_v61 = vld [vmem:[#allocation5 + $0x2d8] sm:$0xff]  ;;  %v7875_v63 = vcombine.low %v164_v50, %v172_v52  ;;  %v291_v52 = vld [vmem:[#allocation5 + $0x610] sm:$0xff] }
  0xb9   :  { %3226 = vmatprep.subr.bf16.mxu0 %v8174_v7  ;;  %3312 = vmatprep.subr.bf16.mxu1 %v8176_v11  ;;  %v602_v7 = vld [vmem:[#allocation5 + $0xfc8] sm:$0xff]  ;;  %v99_v11 = vld [vmem:[#allocation5 + $0x10] sm:$0xff]  ;;  %v7892_v4 = vcombine.high %v180_v59, %v188_v61 }
  0xba   :  { %v7810_v21 = vcombine.high %v99_v11, %v107_v12 }
  0xbc   :  { %3227 = vmatpush1.bf16.msra.mxu0 %v8173_v13  ;;  %3313 = vmatpush1.bf16.msra.mxu1 %v8175_v14  ;;  %v100_v13 = vld [vmem:[#allocation5 + $0x18] sm:$0xff]  ;;  %v8304_v14 = vcombine.high %v594_v5, %v602_v7 }
  0xbd   :  { %3228 = vmatprep.subr.bf16.mxu0 %v8190_v16  ;;  %3314 = vmatprep.subr.bf16.mxu1 %v8192_v20  ;;  %v87_v16 = vld [vmem:[#allocation2 + $0x10] sm:$0xff]  ;;  %v8303_v20 = vcombine.low %v594_v5, %v602_v7  ;;  %v7812_v26 = vcombine.high %v100_v13, %v108_v18  ;;  %v7811_v30 = vcombine.low %v100_v13, %v108_v18  ;;  %v204_v5 = vld [vmem:[#allocation5 + $0x358] sm:$0xff] }
  0xbe   :  { %v9974_v28 = vpack.c.bf16 %v91_v17, %v87_v16  ;;  %v7891_v7 = vcombine.low %v180_v59, %v188_v61  ;;  %v220_v13 = vld [vmem:[#allocation5 + $0x3d8] sm:$0xff]  ;;  %v7907_v16 = vcombine.low %v196_v3, %v204_v5  ;;  %v227_v18 = vld [vmem:[#allocation5 + $0x410] sm:$0xff] }
  0xbf   :  { %v307_v61 = vld [vmem:[#allocation5 + $0x690] sm:$0xff] }
  0xc0   :  { %3229 = vmatpush1.bf16.msra.mxu0 %v8189_v22  ;;  %3315 = vmatpush1.bf16.msra.mxu1 %v8191_v23  ;;  %v115_v22 = vld [vmem:[#allocation5 + $0x90] sm:$0xff] }
  0xc1   :  { %3230 = vmatprep.subr.bf16.mxu0 %v8206_v24  ;;  %3316 = vmatprep.subr.bf16.mxu1 %v8208_v29  ;;  %v123_v23 = vld [vmem:[#allocation5 + $0xd0] sm:$0xff]  ;;  %v116_v24 = vld [vmem:[#allocation5 + $0x98] sm:$0xff]  ;;  %v7809_v29 = vcombine.low %v99_v11, %v107_v12  ;;  %v7908_v12 = vcombine.high %v196_v3, %v204_v5 }
  0xc2   :  { %v7828_v35 = vcombine.high %v116_v24, %v124_v27  ;;  %v7827_v38 = vcombine.low %v116_v24, %v124_v27  ;;  %v212_v11 = vld [vmem:[#allocation5 + $0x398] sm:$0xff]  ;;  %v243_v27 = vld [vmem:[#allocation5 + $0x490] sm:$0xff] }
  0xc3   :  { %v7923_v24 = vcombine.low %v212_v11, %v220_v13  ;;  %v323_v5 = vld [vmem:[#allocation5 + $0x710] sm:$0xff] }
  0xc4   :  { %3231 = vmatpush1.bf16.msra.mxu0 %v8205_v31  ;;  %3317 = vmatpush1.bf16.msra.mxu1 %v8207_v32  ;;  %v7826_v31 = vcombine.high %v115_v22, %v123_v23  ;;  %v131_v32 = vld [vmem:[#allocation5 + $0x110] sm:$0xff] }
  0xc5   :  { %3232 = vmatprep.subr.bf16.mxu0 %v8222_v33  ;;  %3318 = vmatprep.subr.bf16.mxu1 %v8224_v37  ;;  %v139_v33 = vld [vmem:[#allocation5 + $0x150] sm:$0xff]  ;;  %v7825_v37 = vcombine.low %v115_v22, %v123_v23  ;;  %v236_v22 = vld [vmem:[#allocation5 + $0x458] sm:$0xff] }
  0xc8   :  { %3233 = vmatpush1.bf16.msra.mxu0 %v8221_v39  ;;  %3319 = vmatpush1.bf16.msra.mxu1 %v8223_v40  ;;  %v7842_v39 = vcombine.high %v131_v32, %v139_v33  ;;  %v147_v40 = vld [vmem:[#allocation5 + $0x190] sm:$0xff] }
  0xc9   :  { %3234 = vmatprep.subr.bf16.mxu0 %v8238_v41  ;;  %3320 = vmatprep.subr.bf16.mxu1 %v8240_v45  ;;  %v155_v41 = vld [vmem:[#allocation5 + $0x1d0] sm:$0xff]  ;;  %v7841_v45 = vcombine.low %v131_v32, %v139_v33  ;;  %v252_v32 = vld [vmem:[#allocation5 + $0x4d8] sm:$0xff] }
  0xcc   :  { %3235 = vmatpush1.bf16.msra.mxu0 %v8237_v47  ;;  %3321 = vmatpush1.bf16.msra.mxu1 %v8239_v48  ;;  %v7858_v47 = vcombine.high %v147_v40, %v155_v41  ;;  %v163_v48 = vld [vmem:[#allocation5 + $0x210] sm:$0xff] }
  0xcd   :  { %3236 = vmatprep.subr.bf16.mxu0 %v8254_v49  ;;  %3322 = vmatprep.subr.bf16.mxu1 %v8256_v53  ;;  %v171_v49 = vld [vmem:[#allocation5 + $0x250] sm:$0xff]  ;;  %v7857_v53 = vcombine.low %v147_v40, %v155_v41  ;;  %v268_v40 = vld [vmem:[#allocation5 + $0x558] sm:$0xff] }
  0xd0   :  { %3237 = vmatpush1.bf16.msra.mxu0 %v8253_v55  ;;  %3323 = vmatpush1.bf16.msra.mxu1 %v8255_v56  ;;  %v7874_v55 = vcombine.high %v163_v48, %v171_v49  ;;  %v179_v56 = vld [vmem:[#allocation5 + $0x290] sm:$0xff] }
  0xd1   :  { %3238 = vmatprep.subr.bf16.mxu0 %v8270_v57  ;;  %3324 = vmatprep.subr.bf16.mxu1 %v8272_v62  ;;  %v187_v57 = vld [vmem:[#allocation5 + $0x2d0] sm:$0xff]  ;;  %v7873_v62 = vcombine.low %v163_v48, %v171_v49  ;;  %v284_v48 = vld [vmem:[#allocation5 + $0x5d8] sm:$0xff] }
  0xd4   :  { %3239 = vmatpush1.bf16.msra.mxu0 %v8269_v0  ;;  %3325 = vmatpush1.bf16.msra.mxu1 %v8271_v1  ;;  %v7890_v0 = vcombine.high %v179_v56, %v187_v57  ;;  %v195_v1 = vld [vmem:[#allocation5 + $0x310] sm:$0xff] }
  0xd5   :  { %3240 = vmatprep.subr.bf16.mxu0 %v8286_v2  ;;  %3326 = vmatprep.subr.bf16.mxu1 %v8288_v6  ;;  %v203_v2 = vld [vmem:[#allocation5 + $0x350] sm:$0xff]  ;;  %v7889_v6 = vcombine.low %v179_v56, %v187_v57  ;;  %v300_v56 = vld [vmem:[#allocation5 + $0x658] sm:$0xff] }
  0xd8   :  { %3241 = vmatpush1.bf16.msra.mxu0 %v8285_v8  ;;  %3327 = vmatpush1.bf16.msra.mxu1 %v8287_v9  ;;  %v7906_v8 = vcombine.high %v195_v1, %v203_v2  ;;  %v211_v9 = vld [vmem:[#allocation5 + $0x390] sm:$0xff] }
  0xd9   :  { %3242 = vmatprep.subr.bf16.mxu0 %v8302_v10  ;;  %3328 = vmatprep.subr.bf16.mxu1 %v8304_v14  ;;  %v219_v10 = vld [vmem:[#allocation5 + $0x3d0] sm:$0xff]  ;;  %v7905_v14 = vcombine.low %v195_v1, %v203_v2  ;;  %v316_v1 = vld [vmem:[#allocation5 + $0x6d8] sm:$0xff] }
  0xda   :  { %v7922_v17 = vcombine.high %v211_v9, %v219_v10  ;;  %v7921_v23 = vcombine.low %v211_v9, %v219_v10  ;;  %v332_v9 = vld [vmem:[#allocation5 + $0x758] sm:$0xff] }
  0xdc   :  { %3243 = vmatpush1.bf16.msra.mxu0 %v8301_v19  ;;  %3329 = vmatpush1.bf16.msra.mxu1 %v8303_v20  ;;  %v235_v19 = vld [vmem:[#allocation5 + $0x450] sm:$0xff]  ;;  %v228_v20 = vld [vmem:[#allocation5 + $0x418] sm:$0xff] }
  0xdd   :  { %3341 = vmatprep.subr.bf16.mxu0 %v7810_v21  ;;  %3427 = vmatprep.subr.bf16.mxu1 %v7812_v26  ;;  %v7924_v21 = vcombine.high %v212_v11, %v220_v13  ;;  %v7938_v26 = vcombine.high %v227_v18, %v235_v19  ;;  %v7937_v33 = vcombine.low %v227_v18, %v235_v19  ;;  %v339_v13 = vld [vmem:[#allocation5 + $0x790] sm:$0xff]  ;;  %v348_v18 = vld [vmem:[#allocation5 + $0x7d8] sm:$0xff] }
  0xde   :  { %v7939_v34 = vcombine.low %v228_v20, %v236_v22 }
  0xdf   :  { %3245 = vmatmul.mubr.bf16.vlgmr.msra.gmra.mrb[0].mxu0 %v9974_v28  ;;  %3331 = vmatmul.mubr.bf16.vlgmr.msra.gmra.mrb[0].mxu1 %v9974_v28 }
  0xe0   :  { %3342 = vmatpush1.bf16.msra.mxu0 %v7809_v29  ;;  %3428 = vmatpush1.bf16.msra.mxu1 %v7811_v30  ;;  %v251_v29 = vld [vmem:[#allocation5 + $0x4d0] sm:$0xff]  ;;  %v244_v30 = vld [vmem:[#allocation5 + $0x498] sm:$0xff] }
  0xe1   :  { %3343 = vmatprep.subr.bf16.mxu0 %v7826_v31  ;;  %3429 = vmatprep.subr.bf16.mxu1 %v7828_v35  ;;  %v7940_v31 = vcombine.high %v228_v20, %v236_v22  ;;  %v7954_v35 = vcombine.high %v243_v27, %v251_v29  ;;  %v7953_v41 = vcombine.low %v243_v27, %v251_v29  ;;  %v355_v22 = vld [vmem:[#allocation5 + $0x810] sm:$0xff]  ;;  %v364_v27 = vld [vmem:[#allocation5 + $0x858] sm:$0xff] }
  0xe2   :  { %3373 = vmatprep.mubr.bf16.mxu0 %v9962_v58  ;;  %3459 = vmatprep.mubr.bf16.mxu1 %v9962_v58  ;;  %v7955_v42 = vcombine.low %v244_v30, %v252_v32 }
  0xe4   :  { %3344 = vmatpush1.bf16.msra.mxu0 %v7825_v37  ;;  %3430 = vmatpush1.bf16.msra.mxu1 %v7827_v38  ;;  %v267_v37 = vld [vmem:[#allocation5 + $0x550] sm:$0xff]  ;;  %v260_v38 = vld [vmem:[#allocation5 + $0x518] sm:$0xff] }
  0xe5   :  { %3345 = vmatprep.subr.bf16.mxu0 %v7842_v39  ;;  %3431 = vmatprep.subr.bf16.mxu1 %v7844_v43  ;;  %v7956_v39 = vcombine.high %v244_v30, %v252_v32  ;;  %v7970_v43 = vcombine.high %v259_v36, %v267_v37  ;;  %v7969_v49 = vcombine.low %v259_v36, %v267_v37  ;;  %v371_v32 = vld [vmem:[#allocation5 + $0x890] sm:$0xff]  ;;  %v380_v36 = vld [vmem:[#allocation5 + $0x8d8] sm:$0xff] }
  0xe6   :  { %v7971_v50 = vcombine.low %v260_v38, %v268_v40 }
  0xe8   :  { %3346 = vmatpush1.bf16.msra.mxu0 %v7841_v45  ;;  %3432 = vmatpush1.bf16.msra.mxu1 %v7843_v46  ;;  %v283_v45 = vld [vmem:[#allocation5 + $0x5d0] sm:$0xff]  ;;  %v276_v46 = vld [vmem:[#allocation5 + $0x598] sm:$0xff] }
  0xe9   :  { %3347 = vmatprep.subr.bf16.mxu0 %v7858_v47  ;;  %3433 = vmatprep.subr.bf16.mxu1 %v7860_v51  ;;  %v7972_v47 = vcombine.high %v260_v38, %v268_v40  ;;  %v7986_v51 = vcombine.high %v275_v44, %v283_v45  ;;  %v7985_v57 = vcombine.low %v275_v44, %v283_v45  ;;  %v387_v40 = vld [vmem:[#allocation5 + $0x910] sm:$0xff]  ;;  %v396_v44 = vld [vmem:[#allocation5 + $0x958] sm:$0xff] }
  0xea   :  { %v7987_v59 = vcombine.low %v276_v46, %v284_v48 }
  0xec   :  { %3348 = vmatpush1.bf16.msra.mxu0 %v7857_v53  ;;  %3434 = vmatpush1.bf16.msra.mxu1 %v7859_v54  ;;  %v299_v53 = vld [vmem:[#allocation5 + $0x650] sm:$0xff]  ;;  %v292_v54 = vld [vmem:[#allocation5 + $0x618] sm:$0xff] }
  0xed   :  { %3349 = vmatprep.subr.bf16.mxu0 %v7874_v55  ;;  %3435 = vmatprep.subr.bf16.mxu1 %v7876_v60  ;;  %v7988_v55 = vcombine.high %v276_v46, %v284_v48  ;;  %v8002_v60 = vcombine.high %v291_v52, %v299_v53  ;;  %v8001_v2 = vcombine.low %v291_v52, %v299_v53  ;;  %v403_v48 = vld [vmem:[#allocation5 + $0x990] sm:$0xff]  ;;  %v412_v52 = vld [vmem:[#allocation5 + $0x9d8] sm:$0xff] }
  0xee   :  { %v8003_v3 = vcombine.low %v292_v54, %v300_v56 }
  0xf0   :  { %3350 = vmatpush1.bf16.msra.mxu0 %v7873_v62  ;;  %3436 = vmatpush1.bf16.msra.mxu1 %v7875_v63  ;;  %v315_v62 = vld [vmem:[#allocation5 + $0x6d0] sm:$0xff]  ;;  %v308_v63 = vld [vmem:[#allocation5 + $0x698] sm:$0xff] }
  0xf1   :  { %3351 = vmatprep.subr.bf16.mxu0 %v7890_v0  ;;  %3437 = vmatprep.subr.bf16.mxu1 %v7892_v4  ;;  %v8004_v0 = vcombine.high %v292_v54, %v300_v56  ;;  %v8018_v4 = vcombine.high %v307_v61, %v315_v62  ;;  %v8017_v10 = vcombine.low %v307_v61, %v315_v62  ;;  %v419_v56 = vld [vmem:[#allocation5 + $0xa10] sm:$0xff]  ;;  %v428_v61 = vld [vmem:[#allocation5 + $0xa58] sm:$0xff] }
  0xf2   :  { %v8019_v11 = vcombine.low %v308_v63, %v316_v1 }
  0xf4   :  { %3352 = vmatpush1.bf16.msra.mxu0 %v7889_v6  ;;  %3438 = vmatpush1.bf16.msra.mxu1 %v7891_v7  ;;  %v331_v6 = vld [vmem:[#allocation5 + $0x750] sm:$0xff]  ;;  %v324_v7 = vld [vmem:[#allocation5 + $0x718] sm:$0xff] }
  0xf5   :  { %3353 = vmatprep.subr.bf16.mxu0 %v7906_v8  ;;  %3439 = vmatprep.subr.bf16.mxu1 %v7908_v12  ;;  %v8020_v8 = vcombine.high %v308_v63, %v316_v1  ;;  %v8034_v12 = vcombine.high %v323_v5, %v331_v6  ;;  %v8033_v19 = vcombine.low %v323_v5, %v331_v6  ;;  %v435_v1 = vld [vmem:[#allocation5 + $0xa90] sm:$0xff]  ;;  %v444_v5 = vld [vmem:[#allocation5 + $0xad8] sm:$0xff] }
  0xf6   :  { %v8035_v20 = vcombine.low %v324_v7, %v332_v9 }
  0xf8   :  { %3354 = vmatpush1.bf16.msra.mxu0 %v7905_v14  ;;  %3440 = vmatpush1.bf16.msra.mxu1 %v7907_v16  ;;  %v347_v14 = vld [vmem:[#allocation5 + $0x7d0] sm:$0xff]  ;;  %v340_v16 = vld [vmem:[#allocation5 + $0x798] sm:$0xff] }
  0xf9   :  { %3355 = vmatprep.subr.bf16.mxu0 %v7922_v17  ;;  %3441 = vmatprep.subr.bf16.mxu1 %v7924_v21  ;;  %v8036_v17 = vcombine.high %v324_v7, %v332_v9  ;;  %v8050_v21 = vcombine.high %v339_v13, %v347_v14  ;;  %v8049_v29 = vcombine.low %v339_v13, %v347_v14  ;;  %v451_v9 = vld [vmem:[#allocation5 + $0xb10] sm:$0xff]  ;;  %v460_v13 = vld [vmem:[#allocation5 + $0xb58] sm:$0xff] }
  0xfa   :  { %v8051_v30 = vcombine.low %v340_v16, %v348_v18 }
  0xfc   :  { %3356 = vmatpush1.bf16.msra.mxu0 %v7921_v23  ;;  %3442 = vmatpush1.bf16.msra.mxu1 %v7923_v24  ;;  %v363_v23 = vld [vmem:[#allocation5 + $0x850] sm:$0xff]  ;;  %v356_v24 = vld [vmem:[#allocation5 + $0x818] sm:$0xff] }
  0xfd   :  { %3357 = vmatprep.subr.bf16.mxu0 %v7938_v26  ;;  %3443 = vmatprep.subr.bf16.mxu1 %v7940_v31  ;;  %v8052_v26 = vcombine.high %v340_v16, %v348_v18  ;;  %v8066_v31 = vcombine.high %v355_v22, %v363_v23  ;;  %v8065_v37 = vcombine.low %v355_v22, %v363_v23  ;;  %v467_v18 = vld [vmem:[#allocation5 + $0xb90] sm:$0xff]  ;;  %v476_v22 = vld [vmem:[#allocation5 + $0xbd8] sm:$0xff] }
  0xfe   :  { %v8067_v38 = vcombine.low %v356_v24, %v364_v27 }
 0x100   :  { %3358 = vmatpush1.bf16.msra.mxu0 %v7937_v33  ;;  %3444 = vmatpush1.bf16.msra.mxu1 %v7939_v34  ;;  %v379_v33 = vld [vmem:[#allocation5 + $0x8d0] sm:$0xff]  ;;  %v372_v34 = vld [vmem:[#allocation5 + $0x898] sm:$0xff] }
 0x101   :  { %3359 = vmatprep.subr.bf16.mxu0 %v7954_v35  ;;  %3445 = vmatprep.subr.bf16.mxu1 %v7956_v39  ;;  %v8068_v35 = vcombine.high %v356_v24, %v364_v27  ;;  %v8082_v39 = vcombine.high %v371_v32, %v379_v33  ;;  %v8081_v45 = vcombine.low %v371_v32, %v379_v33  ;;  %v483_v27 = vld [vmem:[#allocation5 + $0xc10] sm:$0xff]  ;;  %v492_v32 = vld [vmem:[#allocation5 + $0xc58] sm:$0xff] }
 0x102   :  { %v8083_v46 = vcombine.low %v372_v34, %v380_v36 }
 0x104   :  { %3360 = vmatpush1.bf16.msra.mxu0 %v7953_v41  ;;  %3446 = vmatpush1.bf16.msra.mxu1 %v7955_v42  ;;  %v395_v41 = vld [vmem:[#allocation5 + $0x950] sm:$0xff]  ;;  %v388_v42 = vld [vmem:[#allocation5 + $0x918] sm:$0xff] }
 0x105   :  { %3361 = vmatprep.subr.bf16.mxu0 %v7970_v43  ;;  %3447 = vmatprep.subr.bf16.mxu1 %v7972_v47  ;;  %v8084_v43 = vcombine.high %v372_v34, %v380_v36  ;;  %v8098_v47 = vcombine.high %v387_v40, %v395_v41  ;;  %v8097_v53 = vcombine.low %v387_v40, %v395_v41  ;;  %v499_v36 = vld [vmem:[#allocation5 + $0xc90] sm:$0xff]  ;;  %v508_v40 = vld [vmem:[#allocation5 + $0xcd8] sm:$0xff] }
 0x106   :  { %v8099_v54 = vcombine.low %v388_v42, %v396_v44 }
 0x108   :  { %3362 = vmatpush1.bf16.msra.mxu0 %v7969_v49  ;;  %3448 = vmatpush1.bf16.msra.mxu1 %v7971_v50  ;;  %v411_v49 = vld [vmem:[#allocation5 + $0x9d0] sm:$0xff]  ;;  %v404_v50 = vld [vmem:[#allocation5 + $0x998] sm:$0xff] }
 0x109   :  { %3363 = vmatprep.subr.bf16.mxu0 %v7986_v51  ;;  %3449 = vmatprep.subr.bf16.mxu1 %v7988_v55  ;;  %v8100_v51 = vcombine.high %v388_v42, %v396_v44  ;;  %v8114_v55 = vcombine.high %v403_v48, %v411_v49  ;;  %v8113_v62 = vcombine.low %v403_v48, %v411_v49  ;;  %v515_v44 = vld [vmem:[#allocation5 + $0xd10] sm:$0xff]  ;;  %v524_v48 = vld [vmem:[#allocation5 + $0xd58] sm:$0xff] }
 0x10a   :  { %v8115_v63 = vcombine.low %v404_v50, %v412_v52 }
 0x10c   :  { %3364 = vmatpush1.bf16.msra.mxu0 %v7985_v57  ;;  %3450 = vmatpush1.bf16.msra.mxu1 %v7987_v59  ;;  %v427_v57 = vld [vmem:[#allocation5 + $0xa50] sm:$0xff]  ;;  %v420_v59 = vld [vmem:[#allocation5 + $0xa18] sm:$0xff] }
 0x10d   :  { %3365 = vmatprep.subr.bf16.mxu0 %v8002_v60  ;;  %3451 = vmatprep.subr.bf16.mxu1 %v8004_v0  ;;  %v8116_v60 = vcombine.high %v404_v50, %v412_v52  ;;  %v8130_v0 = vcombine.high %v419_v56, %v427_v57  ;;  %v8129_v6 = vcombine.low %v419_v56, %v427_v57  ;;  %v531_v52 = vld [vmem:[#allocation5 + $0xd90] sm:$0xff]  ;;  %v540_v56 = vld [vmem:[#allocation5 + $0xdd8] sm:$0xff] }
 0x10e   :  { %v8131_v7 = vcombine.low %v420_v59, %v428_v61 }
 0x110   :  { %3366 = vmatpush1.bf16.msra.mxu0 %v8001_v2  ;;  %3452 = vmatpush1.bf16.msra.mxu1 %v8003_v3  ;;  %v443_v2 = vld [vmem:[#allocation5 + $0xad0] sm:$0xff]  ;;  %v436_v3 = vld [vmem:[#allocation5 + $0xa98] sm:$0xff] }
 0x111   :  { %3367 = vmatprep.subr.bf16.mxu0 %v8018_v4  ;;  %3453 = vmatprep.subr.bf16.mxu1 %v8020_v8  ;;  %v8132_v4 = vcombine.high %v420_v59, %v428_v61  ;;  %v8146_v8 = vcombine.high %v435_v1, %v443_v2  ;;  %v8145_v14 = vcombine.low %v435_v1, %v443_v2  ;;  %v547_v61 = vld [vmem:[#allocation5 + $0xe10] sm:$0xff]  ;;  %v556_v1 = vld [vmem:[#allocation5 + $0xe58] sm:$0xff] }
 0x112   :  { %v8147_v16 = vcombine.low %v436_v3, %v444_v5 }
 0x114   :  { %3368 = vmatpush1.bf16.msra.mxu0 %v8017_v10  ;;  %3454 = vmatpush1.bf16.msra.mxu1 %v8019_v11  ;;  %v459_v10 = vld [vmem:[#allocation5 + $0xb50] sm:$0xff]  ;;  %v452_v11 = vld [vmem:[#allocation5 + $0xb18] sm:$0xff] }
 0x115   :  { %3369 = vmatprep.subr.bf16.mxu0 %v8034_v12  ;;  %3455 = vmatprep.subr.bf16.mxu1 %v8036_v17  ;;  %v8148_v12 = vcombine.high %v436_v3, %v444_v5  ;;  %v8162_v17 = vcombine.high %v451_v9, %v459_v10  ;;  %v8161_v23 = vcombine.low %v451_v9, %v459_v10  ;;  %v563_v5 = vld [vmem:[#allocation5 + $0xe90] sm:$0xff]  ;;  %v572_v9 = vld [vmem:[#allocation5 + $0xed8] sm:$0xff] }
 0x116   :  { %v8163_v24 = vcombine.low %v452_v11, %v460_v13 }
 0x118   :  { %3370 = vmatpush1.bf16.msra.mxu0 %v8033_v19  ;;  %3456 = vmatpush1.bf16.msra.mxu1 %v8035_v20  ;;  %v475_v19 = vld [vmem:[#allocation5 + $0xbd0] sm:$0xff]  ;;  %v468_v20 = vld [vmem:[#allocation5 + $0xb98] sm:$0xff] }
 0x119   :  { %3371 = vmatprep.subr.bf16.mxu0 %v8050_v21  ;;  %3457 = vmatprep.subr.bf16.mxu1 %v8052_v26  ;;  %v8164_v21 = vcombine.high %v452_v11, %v460_v13  ;;  %v8178_v26 = vcombine.high %v467_v18, %v475_v19  ;;  %v8177_v33 = vcombine.low %v467_v18, %v475_v19  ;;  %v579_v13 = vld [vmem:[#allocation5 + $0xf10] sm:$0xff]  ;;  %v588_v18 = vld [vmem:[#allocation5 + $0xf58] sm:$0xff] }
 0x11a   :  { %v8179_v34 = vcombine.low %v468_v20, %v476_v22 }
 0x11c   :  { %3372 = vmatpush1.bf16.msra.mxu0 %v8049_v29  ;;  %3458 = vmatpush1.bf16.msra.mxu1 %v8051_v30  ;;  %v491_v29 = vld [vmem:[#allocation5 + $0xc50] sm:$0xff]  ;;  %v484_v30 = vld [vmem:[#allocation5 + $0xc18] sm:$0xff] }
 0x11d   :  { %3384 = vmatprep.subr.bf16.mxu0 %v8066_v31  ;;  %3470 = vmatprep.subr.bf16.mxu1 %v8068_v35  ;;  %v8180_v31 = vcombine.high %v468_v20, %v476_v22  ;;  %v8194_v35 = vcombine.high %v483_v27, %v491_v29  ;;  %v8193_v41 = vcombine.low %v483_v27, %v491_v29  ;;  %v595_v22 = vld [vmem:[#allocation5 + $0xf90] sm:$0xff]  ;;  %v604_v27 = vld [vmem:[#allocation5 + $0xfd8] sm:$0xff] }
 0x11e   :  { %v8195_v42 = vcombine.low %v484_v30, %v492_v32 }
 0x11f   :  { %3374 = vmatmul.mubr.bf16.vlgmr.msra.gmra.mrb[4].mxu0 %v9966_v15  ;;  %3460 = vmatmul.mubr.bf16.vlgmr.msra.gmra.mrb[4].mxu1 %v9966_v15 }
 0x120   :  { %3385 = vmatpush1.bf16.msra.mxu0 %v8065_v37  ;;  %3471 = vmatpush1.bf16.msra.mxu1 %v8067_v38  ;;  %v507_v37 = vld [vmem:[#allocation5 + $0xcd0] sm:$0xff]  ;;  %v500_v38 = vld [vmem:[#allocation5 + $0xc98] sm:$0xff] }
 0x121   :  { %3386 = vmatprep.subr.bf16.mxu0 %v8082_v39  ;;  %3472 = vmatprep.subr.bf16.mxu1 %v8084_v43  ;;  %v8196_v39 = vcombine.high %v484_v30, %v492_v32  ;;  %v8210_v43 = vcombine.high %v499_v36, %v507_v37  ;;  %v8209_v49 = vcombine.low %v499_v36, %v507_v37  ;;  %v101_v32 = vld [vmem:[#allocation5 + $0x20] sm:$0xff]  ;;  %v110_v36 = vld [vmem:[#allocation5 + $0x68] sm:$0xff] }
 0x122   :  { %3416 = vmatprep.mubr.bf16.mxu0 %v9968_v25  ;;  %3502 = vmatprep.mubr.bf16.mxu1 %v9968_v25  ;;  %v8211_v50 = vcombine.low %v500_v38, %v508_v40 }
 0x124   :  { %3387 = vmatpush1.bf16.msra.mxu0 %v8081_v45  ;;  %3473 = vmatpush1.bf16.msra.mxu1 %v8083_v46  ;;  %v523_v45 = vld [vmem:[#allocation5 + $0xd50] sm:$0xff]  ;;  %v516_v46 = vld [vmem:[#allocation5 + $0xd18] sm:$0xff] }
 0x125   :  { %3388 = vmatprep.subr.bf16.mxu0 %v8098_v47  ;;  %3474 = vmatprep.subr.bf16.mxu1 %v8100_v51  ;;  %v8212_v47 = vcombine.high %v500_v38, %v508_v40  ;;  %v8226_v51 = vcombine.high %v515_v44, %v523_v45  ;;  %v8225_v57 = vcombine.low %v515_v44, %v523_v45  ;;  %v117_v40 = vld [vmem:[#allocation5 + $0xa0] sm:$0xff]  ;;  %v126_v44 = vld [vmem:[#allocation5 + $0xe8] sm:$0xff] }
 0x126   :  { %v8227_v59 = vcombine.low %v516_v46, %v524_v48 }
 0x128   :  { %3389 = vmatpush1.bf16.msra.mxu0 %v8097_v53  ;;  %3475 = vmatpush1.bf16.msra.mxu1 %v8099_v54  ;;  %v539_v53 = vld [vmem:[#allocation5 + $0xdd0] sm:$0xff]  ;;  %v532_v54 = vld [vmem:[#allocation5 + $0xd98] sm:$0xff] }
 0x129   :  { %3390 = vmatprep.subr.bf16.mxu0 %v8114_v55  ;;  %3476 = vmatprep.subr.bf16.mxu1 %v8116_v60  ;;  %v8228_v55 = vcombine.high %v516_v46, %v524_v48  ;;  %v8242_v60 = vcombine.high %v531_v52, %v539_v53  ;;  %v8241_v2 = vcombine.low %v531_v52, %v539_v53  ;;  %v133_v48 = vld [vmem:[#allocation5 + $0x120] sm:$0xff]  ;;  %v142_v52 = vld [vmem:[#allocation5 + $0x168] sm:$0xff] }
 0x12a   :  { %v8243_v3 = vcombine.low %v532_v54, %v540_v56 }
 0x12c   :  { %3391 = vmatpush1.bf16.msra.mxu0 %v8113_v62  ;;  %3477 = vmatpush1.bf16.msra.mxu1 %v8115_v63  ;;  %v555_v62 = vld [vmem:[#allocation5 + $0xe50] sm:$0xff]  ;;  %v548_v63 = vld [vmem:[#allocation5 + $0xe18] sm:$0xff] }
 0x12d   :  { %3392 = vmatprep.subr.bf16.mxu0 %v8130_v0  ;;  %3478 = vmatprep.subr.bf16.mxu1 %v8132_v4  ;;  %v8244_v0 = vcombine.high %v532_v54, %v540_v56  ;;  %v8258_v4 = vcombine.high %v547_v61, %v555_v62  ;;  %v8257_v10 = vcombine.low %v547_v61, %v555_v62  ;;  %v149_v56 = vld [vmem:[#allocation5 + $0x1a0] sm:$0xff]  ;;  %v158_v61 = vld [vmem:[#allocation5 + $0x1e8] sm:$0xff] }
 0x12e   :  { %v8259_v11 = vcombine.low %v548_v63, %v556_v1 }
 0x130   :  { %3393 = vmatpush1.bf16.msra.mxu0 %v8129_v6  ;;  %3479 = vmatpush1.bf16.msra.mxu1 %v8131_v7  ;;  %v571_v6 = vld [vmem:[#allocation5 + $0xed0] sm:$0xff]  ;;  %v564_v7 = vld [vmem:[#allocation5 + $0xe98] sm:$0xff] }
 0x131   :  { %3394 = vmatprep.subr.bf16.mxu0 %v8146_v8  ;;  %3480 = vmatprep.subr.bf16.mxu1 %v8148_v12  ;;  %v8260_v8 = vcombine.high %v548_v63, %v556_v1  ;;  %v8274_v12 = vcombine.high %v563_v5, %v571_v6  ;;  %v8273_v19 = vcombine.low %v563_v5, %v571_v6  ;;  %v165_v1 = vld [vmem:[#allocation5 + $0x220] sm:$0xff]  ;;  %v174_v5 = vld [vmem:[#allocation5 + $0x268] sm:$0xff] }
 0x132   :  { %v8275_v20 = vcombine.low %v564_v7, %v572_v9 }
 0x134   :  { %3395 = vmatpush1.bf16.msra.mxu0 %v8145_v14  ;;  %3481 = vmatpush1.bf16.msra.mxu1 %v8147_v16  ;;  %v587_v14 = vld [vmem:[#allocation5 + $0xf50] sm:$0xff]  ;;  %v580_v16 = vld [vmem:[#allocation5 + $0xf18] sm:$0xff] }
 0x135   :  { %3396 = vmatprep.subr.bf16.mxu0 %v8162_v17  ;;  %3482 = vmatprep.subr.bf16.mxu1 %v8164_v21  ;;  %v8276_v17 = vcombine.high %v564_v7, %v572_v9  ;;  %v8290_v21 = vcombine.high %v579_v13, %v587_v14  ;;  %v8289_v29 = vcombine.low %v579_v13, %v587_v14  ;;  %v181_v9 = vld [vmem:[#allocation5 + $0x2a0] sm:$0xff]  ;;  %v190_v13 = vld [vmem:[#allocation5 + $0x2e8] sm:$0xff] }
 0x136   :  { %v8291_v30 = vcombine.low %v580_v16, %v588_v18 }
 0x138   :  { %3397 = vmatpush1.bf16.msra.mxu0 %v8161_v23  ;;  %3483 = vmatpush1.bf16.msra.mxu1 %v8163_v24  ;;  %v603_v23 = vld [vmem:[#allocation5 + $0xfd0] sm:$0xff]  ;;  %v596_v24 = vld [vmem:[#allocation5 + $0xf98] sm:$0xff] }
 0x139   :  { %3398 = vmatprep.subr.bf16.mxu0 %v8178_v26  ;;  %3484 = vmatprep.subr.bf16.mxu1 %v8180_v31  ;;  %v8292_v26 = vcombine.high %v580_v16, %v588_v18  ;;  %v8306_v31 = vcombine.high %v595_v22, %v603_v23  ;;  %v8305_v37 = vcombine.low %v595_v22, %v603_v23  ;;  %v197_v18 = vld [vmem:[#allocation5 + $0x320] sm:$0xff]  ;;  %v206_v22 = vld [vmem:[#allocation5 + $0x368] sm:$0xff] }
 0x13a   :  { %v8307_v38 = vcombine.low %v596_v24, %v604_v27 }
 0x13c   :  { %3399 = vmatpush1.bf16.msra.mxu0 %v8177_v33  ;;  %3485 = vmatpush1.bf16.msra.mxu1 %v8179_v34  ;;  %v109_v33 = vld [vmem:[#allocation5 + $0x60] sm:$0xff]  ;;  %v102_v34 = vld [vmem:[#allocation5 + $0x28] sm:$0xff] }
 0x13d   :  { %3400 = vmatprep.subr.bf16.mxu0 %v8194_v35  ;;  %3486 = vmatprep.subr.bf16.mxu1 %v8196_v39  ;;  %v8308_v35 = vcombine.high %v596_v24, %v604_v27  ;;  %v7814_v39 = vcombine.high %v101_v32, %v109_v33  ;;  %v7813_v45 = vcombine.low %v101_v32, %v109_v33  ;;  %v213_v27 = vld [vmem:[#allocation5 + $0x3a0] sm:$0xff]  ;;  %v222_v32 = vld [vmem:[#allocation5 + $0x3e8] sm:$0xff] }
 0x13e   :  { %v7815_v46 = vcombine.low %v102_v34, %v110_v36 }
 0x140   :  { %3401 = vmatpush1.bf16.msra.mxu0 %v8193_v41  ;;  %3487 = vmatpush1.bf16.msra.mxu1 %v8195_v42  ;;  %v125_v41 = vld [vmem:[#allocation5 + $0xe0] sm:$0xff]  ;;  %v118_v42 = vld [vmem:[#allocation5 + $0xa8] sm:$0xff] }
 0x141   :  { %3402 = vmatprep.subr.bf16.mxu0 %v8210_v43  ;;  %3488 = vmatprep.subr.bf16.mxu1 %v8212_v47  ;;  %v7816_v43 = vcombine.high %v102_v34, %v110_v36  ;;  %v7830_v47 = vcombine.high %v117_v40, %v125_v41  ;;  %v7829_v53 = vcombine.low %v117_v40, %v125_v41  ;;  %v229_v36 = vld [vmem:[#allocation5 + $0x420] sm:$0xff]  ;;  %v238_v40 = vld [vmem:[#allocation5 + $0x468] sm:$0xff] }
 0x142   :  { %v7831_v54 = vcombine.low %v118_v42, %v126_v44 }
 0x144   :  { %3403 = vmatpush1.bf16.msra.mxu0 %v8209_v49  ;;  %3489 = vmatpush1.bf16.msra.mxu1 %v8211_v50  ;;  %v141_v49 = vld [vmem:[#allocation5 + $0x160] sm:$0xff]  ;;  %v134_v50 = vld [vmem:[#allocation5 + $0x128] sm:$0xff] }
 0x145   :  { %3404 = vmatprep.subr.bf16.mxu0 %v8226_v51  ;;  %3490 = vmatprep.subr.bf16.mxu1 %v8228_v55  ;;  %v7832_v51 = vcombine.high %v118_v42, %v126_v44  ;;  %v7846_v55 = vcombine.high %v133_v48, %v141_v49  ;;  %v7845_v62 = vcombine.low %v133_v48, %v141_v49  ;;  %v245_v44 = vld [vmem:[#allocation5 + $0x4a0] sm:$0xff]  ;;  %v254_v48 = vld [vmem:[#allocation5 + $0x4e8] sm:$0xff] }
 0x146   :  { %v7847_v63 = vcombine.low %v134_v50, %v142_v52 }
 0x148   :  { %3405 = vmatpush1.bf16.msra.mxu0 %v8225_v57  ;;  %3491 = vmatpush1.bf16.msra.mxu1 %v8227_v59  ;;  %v157_v57 = vld [vmem:[#allocation5 + $0x1e0] sm:$0xff]  ;;  %v150_v59 = vld [vmem:[#allocation5 + $0x1a8] sm:$0xff] }
 0x149   :  { %3406 = vmatprep.subr.bf16.mxu0 %v8242_v60  ;;  %3492 = vmatprep.subr.bf16.mxu1 %v8244_v0  ;;  %v7848_v60 = vcombine.high %v134_v50, %v142_v52  ;;  %v7862_v0 = vcombine.high %v149_v56, %v157_v57  ;;  %v7861_v6 = vcombine.low %v149_v56, %v157_v57  ;;  %v261_v52 = vld [vmem:[#allocation5 + $0x520] sm:$0xff]  ;;  %v270_v56 = vld [vmem:[#allocation5 + $0x568] sm:$0xff] }
 0x14a   :  { %v7863_v7 = vcombine.low %v150_v59, %v158_v61 }
 0x14c   :  { %3407 = vmatpush1.bf16.msra.mxu0 %v8241_v2  ;;  %3493 = vmatpush1.bf16.msra.mxu1 %v8243_v3  ;;  %v173_v2 = vld [vmem:[#allocation5 + $0x260] sm:$0xff]  ;;  %v166_v3 = vld [vmem:[#allocation5 + $0x228] sm:$0xff] }
 0x14d   :  { %3408 = vmatprep.subr.bf16.mxu0 %v8258_v4  ;;  %3494 = vmatprep.subr.bf16.mxu1 %v8260_v8  ;;  %v7864_v4 = vcombine.high %v150_v59, %v158_v61  ;;  %v7878_v8 = vcombine.high %v165_v1, %v173_v2  ;;  %v7877_v14 = vcombine.low %v165_v1, %v173_v2  ;;  %v277_v61 = vld [vmem:[#allocation5 + $0x5a0] sm:$0xff]  ;;  %v286_v1 = vld [vmem:[#allocation5 + $0x5e8] sm:$0xff] }
 0x14e   :  { %v7879_v16 = vcombine.low %v166_v3, %v174_v5 }
 0x150   :  { %3409 = vmatpush1.bf16.msra.mxu0 %v8257_v10  ;;  %3495 = vmatpush1.bf16.msra.mxu1 %v8259_v11  ;;  %v189_v10 = vld [vmem:[#allocation5 + $0x2e0] sm:$0xff]  ;;  %v182_v11 = vld [vmem:[#allocation5 + $0x2a8] sm:$0xff] }
 0x151   :  { %3410 = vmatprep.subr.bf16.mxu0 %v8274_v12  ;;  %3496 = vmatprep.subr.bf16.mxu1 %v8276_v17  ;;  %v7880_v12 = vcombine.high %v166_v3, %v174_v5  ;;  %v7894_v17 = vcombine.high %v181_v9, %v189_v10  ;;  %v7893_v23 = vcombine.low %v181_v9, %v189_v10  ;;  %v293_v5 = vld [vmem:[#allocation5 + $0x620] sm:$0xff]  ;;  %v302_v9 = vld [vmem:[#allocation5 + $0x668] sm:$0xff] }
 0x152   :  { %v7895_v24 = vcombine.low %v182_v11, %v190_v13 }
 0x154   :  { %3411 = vmatpush1.bf16.msra.mxu0 %v8273_v19  ;;  %3497 = vmatpush1.bf16.msra.mxu1 %v8275_v20  ;;  %v205_v19 = vld [vmem:[#allocation5 + $0x360] sm:$0xff]  ;;  %v198_v20 = vld [vmem:[#allocation5 + $0x328] sm:$0xff] }
 0x155   :  { %3412 = vmatprep.subr.bf16.mxu0 %v8290_v21  ;;  %3498 = vmatprep.subr.bf16.mxu1 %v8292_v26  ;;  %v7896_v21 = vcombine.high %v182_v11, %v190_v13  ;;  %v7910_v26 = vcombine.high %v197_v18, %v205_v19  ;;  %v7909_v33 = vcombine.low %v197_v18, %v205_v19  ;;  %v309_v13 = vld [vmem:[#allocation5 + $0x6a0] sm:$0xff]  ;;  %v318_v18 = vld [vmem:[#allocation5 + $0x6e8] sm:$0xff] }
 0x156   :  { %v7911_v34 = vcombine.low %v198_v20, %v206_v22 }
 0x158   :  { %3413 = vmatpush1.bf16.msra.mxu0 %v8289_v29  ;;  %3499 = vmatpush1.bf16.msra.mxu1 %v8291_v30  ;;  %v221_v29 = vld [vmem:[#allocation5 + $0x3e0] sm:$0xff]  ;;  %v214_v30 = vld [vmem:[#allocation5 + $0x3a8] sm:$0xff] }
 0x159   :  { %3414 = vmatprep.subr.bf16.mxu0 %v8306_v31  ;;  %3500 = vmatprep.subr.bf16.mxu1 %v8308_v35  ;;  %v7912_v31 = vcombine.high %v198_v20, %v206_v22  ;;  %v7926_v35 = vcombine.high %v213_v27, %v221_v29  ;;  %v7925_v41 = vcombine.low %v213_v27, %v221_v29  ;;  %v325_v22 = vld [vmem:[#allocation5 + $0x720] sm:$0xff]  ;;  %v334_v27 = vld [vmem:[#allocation5 + $0x768] sm:$0xff] }
 0x15a   :  { %v7927_v42 = vcombine.low %v214_v30, %v222_v32 }
 0x15c   :  { %3415 = vmatpush1.bf16.msra.mxu0 %v8305_v37  ;;  %3501 = vmatpush1.bf16.msra.mxu1 %v8307_v38  ;;  %v237_v37 = vld [vmem:[#allocation5 + $0x460] sm:$0xff]  ;;  %v230_v38 = vld [vmem:[#allocation5 + $0x428] sm:$0xff] }
 0x15d   :  { %3513 = vmatprep.subr.bf16.mxu0 %v7814_v39  ;;  %3599 = vmatprep.subr.bf16.mxu1 %v7816_v43  ;;  %v7928_v39 = vcombine.high %v214_v30, %v222_v32  ;;  %v7942_v43 = vcombine.high %v229_v36, %v237_v37  ;;  %v7941_v49 = vcombine.low %v229_v36, %v237_v37  ;;  %v341_v32 = vld [vmem:[#allocation5 + $0x7a0] sm:$0xff]  ;;  %v350_v36 = vld [vmem:[#allocation5 + $0x7e8] sm:$0xff] }
 0x15e   :  { %v7943_v50 = vcombine.low %v230_v38, %v238_v40 }
 0x15f   :  { %3417 = vmatmul.mubr.bf16.vlgmr.msra.gmra.mrb[4].mxu0 %v9974_v28  ;;  %3503 = vmatmul.mubr.bf16.vlgmr.msra.gmra.mrb[4].mxu1 %v9974_v28 }
 0x160   :  { %3514 = vmatpush1.bf16.msra.mxu0 %v7813_v45  ;;  %3600 = vmatpush1.bf16.msra.mxu1 %v7815_v46  ;;  %v253_v45 = vld [vmem:[#allocation5 + $0x4e0] sm:$0xff]  ;;  %v246_v46 = vld [vmem:[#allocation5 + $0x4a8] sm:$0xff] }
 0x161   :  { %3515 = vmatprep.subr.bf16.mxu0 %v7830_v47  ;;  %3601 = vmatprep.subr.bf16.mxu1 %v7832_v51  ;;  %v7944_v47 = vcombine.high %v230_v38, %v238_v40  ;;  %v7958_v51 = vcombine.high %v245_v44, %v253_v45  ;;  %v7957_v57 = vcombine.low %v245_v44, %v253_v45  ;;  %v357_v40 = vld [vmem:[#allocation5 + $0x820] sm:$0xff]  ;;  %v366_v44 = vld [vmem:[#allocation5 + $0x868] sm:$0xff] }
 0x162   :  { %3545 = vmatprep.mubr.bf16.mxu0 %v9962_v58  ;;  %3631 = vmatprep.mubr.bf16.mxu1 %v9962_v58  ;;  %v7959_v59 = vcombine.low %v246_v46, %v254_v48 }
 0x164   :  { %3516 = vmatpush1.bf16.msra.mxu0 %v7829_v53  ;;  %3602 = vmatpush1.bf16.msra.mxu1 %v7831_v54  ;;  %v269_v53 = vld [vmem:[#allocation5 + $0x560] sm:$0xff]  ;;  %v262_v54 = vld [vmem:[#allocation5 + $0x528] sm:$0xff] }
 0x165   :  { %3517 = vmatprep.subr.bf16.mxu0 %v7846_v55  ;;  %3603 = vmatprep.subr.bf16.mxu1 %v7848_v60  ;;  %v7960_v55 = vcombine.high %v246_v46, %v254_v48  ;;  %v7974_v60 = vcombine.high %v261_v52, %v269_v53  ;;  %v7973_v2 = vcombine.low %v261_v52, %v269_v53  ;;  %v373_v48 = vld [vmem:[#allocation5 + $0x8a0] sm:$0xff]  ;;  %v382_v52 = vld [vmem:[#allocation5 + $0x8e8] sm:$0xff] }
 0x166   :  { %v7975_v3 = vcombine.low %v262_v54, %v270_v56 }
 0x168   :  { %3518 = vmatpush1.bf16.msra.mxu0 %v7845_v62  ;;  %3604 = vmatpush1.bf16.msra.mxu1 %v7847_v63  ;;  %v285_v62 = vld [vmem:[#allocation5 + $0x5e0] sm:$0xff]  ;;  %v278_v63 = vld [vmem:[#allocation5 + $0x5a8] sm:$0xff] }
 0x169   :  { %3519 = vmatprep.subr.bf16.mxu0 %v7862_v0  ;;  %3605 = vmatprep.subr.bf16.mxu1 %v7864_v4  ;;  %v7976_v0 = vcombine.high %v262_v54, %v270_v56  ;;  %v7990_v4 = vcombine.high %v277_v61, %v285_v62  ;;  %v7989_v10 = vcombine.low %v277_v61, %v285_v62  ;;  %v389_v56 = vld [vmem:[#allocation5 + $0x920] sm:$0xff]  ;;  %v398_v61 = vld [vmem:[#allocation5 + $0x968] sm:$0xff] }
 0x16a   :  { %v7991_v11 = vcombine.low %v278_v63, %v286_v1 }
 0x16c   :  { %3520 = vmatpush1.bf16.msra.mxu0 %v7861_v6  ;;  %3606 = vmatpush1.bf16.msra.mxu1 %v7863_v7  ;;  %v301_v6 = vld [vmem:[#allocation5 + $0x660] sm:$0xff]  ;;  %v294_v7 = vld [vmem:[#allocation5 + $0x628] sm:$0xff] }
 0x16d   :  { %3521 = vmatprep.subr.bf16.mxu0 %v7878_v8  ;;  %3607 = vmatprep.subr.bf16.mxu1 %v7880_v12  ;;  %v7992_v8 = vcombine.high %v278_v63, %v286_v1  ;;  %v8006_v12 = vcombine.high %v293_v5, %v301_v6  ;;  %v8005_v19 = vcombine.low %v293_v5, %v301_v6  ;;  %v414_v5 = vld [vmem:[#allocation5 + $0x9e8] sm:$0xff] }
 0x16e   :  { %v8007_v20 = vcombine.low %v294_v7, %v302_v9 }
 0x170   :  { %3522 = vmatpush1.bf16.msra.mxu0 %v7877_v14  ;;  %3608 = vmatpush1.bf16.msra.mxu1 %v7879_v16  ;;  %v317_v14 = vld [vmem:[#allocation5 + $0x6e0] sm:$0xff]  ;;  %v310_v16 = vld [vmem:[#allocation5 + $0x6a8] sm:$0xff] }
 0x171   :  { %3523 = vmatprep.subr.bf16.mxu0 %v7894_v17  ;;  %3609 = vmatprep.subr.bf16.mxu1 %v7896_v21  ;;  %v8008_v17 = vcombine.high %v294_v7, %v302_v9  ;;  %v8022_v21 = vcombine.high %v309_v13, %v317_v14  ;;  %v8021_v29 = vcombine.low %v309_v13, %v317_v14  ;;  %v430_v13 = vld [vmem:[#allocation5 + $0xa68] sm:$0xff] }
 0x172   :  { %v8023_v30 = vcombine.low %v310_v16, %v318_v18 }
 0x174   :  { %3524 = vmatpush1.bf16.msra.mxu0 %v7893_v23  ;;  %3610 = vmatpush1.bf16.msra.mxu1 %v7895_v24  ;;  %v333_v23 = vld [vmem:[#allocation5 + $0x760] sm:$0xff]  ;;  %v326_v24 = vld [vmem:[#allocation5 + $0x728] sm:$0xff] }
 0x175   :  { %3525 = vmatprep.subr.bf16.mxu0 %v7910_v26  ;;  %3611 = vmatprep.subr.bf16.mxu1 %v7912_v31  ;;  %v8024_v26 = vcombine.high %v310_v16, %v318_v18  ;;  %v8038_v31 = vcombine.high %v325_v22, %v333_v23  ;;  %v8037_v37 = vcombine.low %v325_v22, %v333_v23  ;;  %v446_v22 = vld [vmem:[#allocation5 + $0xae8] sm:$0xff] }
 0x176   :  { %v8039_v38 = vcombine.low %v326_v24, %v334_v27 }
 0x178   :  { %3526 = vmatpush1.bf16.msra.mxu0 %v7909_v33  ;;  %3612 = vmatpush1.bf16.msra.mxu1 %v7911_v34  ;;  %v349_v33 = vld [vmem:[#allocation5 + $0x7e0] sm:$0xff]  ;;  %v342_v34 = vld [vmem:[#allocation5 + $0x7a8] sm:$0xff] }
 0x179   :  { %3527 = vmatprep.subr.bf16.mxu0 %v7926_v35  ;;  %3613 = vmatprep.subr.bf16.mxu1 %v7928_v39  ;;  %v8040_v35 = vcombine.high %v326_v24, %v334_v27  ;;  %v8054_v39 = vcombine.high %v341_v32, %v349_v33  ;;  %v8053_v45 = vcombine.low %v341_v32, %v349_v33  ;;  %v462_v32 = vld [vmem:[#allocation5 + $0xb68] sm:$0xff] }
 0x17a   :  { %v8055_v46 = vcombine.low %v342_v34, %v350_v36 }
 0x17c   :  { %3528 = vmatpush1.bf16.msra.mxu0 %v7925_v41  ;;  %3614 = vmatpush1.bf16.msra.mxu1 %v7927_v42  ;;  %v365_v41 = vld [vmem:[#allocation5 + $0x860] sm:$0xff]  ;;  %v358_v42 = vld [vmem:[#allocation5 + $0x828] sm:$0xff] }
 0x17d   :  { %3529 = vmatprep.subr.bf16.mxu0 %v7942_v43  ;;  %3615 = vmatprep.subr.bf16.mxu1 %v7944_v47  ;;  %v8056_v43 = vcombine.high %v342_v34, %v350_v36  ;;  %v8070_v47 = vcombine.high %v357_v40, %v365_v41  ;;  %v8069_v53 = vcombine.low %v357_v40, %v365_v41  ;;  %v469_v36 = vld [vmem:[#allocation5 + $0xba0] sm:$0xff]  ;;  %v470_v40 = vld [vmem:[#allocation5 + $0xba8] sm:$0xff] }
 0x17e   :  { %v8071_v54 = vcombine.low %v358_v42, %v366_v44  ;;  %v478_v41 = vld [vmem:[#allocation5 + $0xbe8] sm:$0xff] }
 0x180   :  { %3530 = vmatpush1.bf16.msra.mxu0 %v7941_v49  ;;  %3616 = vmatpush1.bf16.msra.mxu1 %v7943_v50  ;;  %v381_v49 = vld [vmem:[#allocation5 + $0x8e0] sm:$0xff]  ;;  %v374_v50 = vld [vmem:[#allocation5 + $0x8a8] sm:$0xff] }
 0x181   :  { %3531 = vmatprep.subr.bf16.mxu0 %v7958_v51  ;;  %3617 = vmatprep.subr.bf16.mxu1 %v7960_v55  ;;  %v8072_v51 = vcombine.high %v358_v42, %v366_v44  ;;  %v8086_v55 = vcombine.high %v373_v48, %v381_v49  ;;  %v8085_v62 = vcombine.low %v373_v48, %v381_v49 }
 0x182   :  { %v8087_v63 = vcombine.low %v374_v50, %v382_v52 }
 0x184   :  { %3532 = vmatpush1.bf16.msra.mxu0 %v7957_v57  ;;  %3618 = vmatpush1.bf16.msra.mxu1 %v7959_v59  ;;  %v397_v57 = vld [vmem:[#allocation5 + $0x960] sm:$0xff]  ;;  %v390_v59 = vld [vmem:[#allocation5 + $0x928] sm:$0xff] }
 0x185   :  { %3533 = vmatprep.subr.bf16.mxu0 %v7974_v60  ;;  %3619 = vmatprep.subr.bf16.mxu1 %v7976_v0  ;;  %v8088_v60 = vcombine.high %v374_v50, %v382_v52  ;;  %v8102_v0 = vcombine.high %v389_v56, %v397_v57  ;;  %v8104_v1 = vcombine.high %v390_v59, %v398_v61 }
 0x186   :  { %v8101_v6 = vcombine.low %v389_v56, %v397_v57  ;;  %v8103_v7 = vcombine.low %v390_v59, %v398_v61  ;;  %v493_v61 = vld [vmem:[#allocation5 + $0xc60] sm:$0xff] }
 0x188   :  { %3534 = vmatpush1.bf16.msra.mxu0 %v7973_v2  ;;  %3620 = vmatpush1.bf16.msra.mxu1 %v7975_v3  ;;  %v405_v2 = vld [vmem:[#allocation5 + $0x9a0] sm:$0xff] }
 0x189   :  { %3535 = vmatprep.subr.bf16.mxu0 %v7990_v4  ;;  %3621 = vmatprep.subr.bf16.mxu1 %v7992_v8  ;;  %v413_v3 = vld [vmem:[#allocation5 + $0x9e0] sm:$0xff]  ;;  %v406_v4 = vld [vmem:[#allocation5 + $0x9a8] sm:$0xff] }
 0x18a   :  { %v8118_v8 = vcombine.high %v405_v2, %v413_v3  ;;  %v8120_v9 = vcombine.high %v406_v4, %v414_v5  ;;  %v8117_v14 = vcombine.low %v405_v2, %v413_v3  ;;  %v8119_v16 = vcombine.low %v406_v4, %v414_v5  ;;  %v494_v2 = vld [vmem:[#allocation5 + $0xc68] sm:$0xff] }
 0x18c   :  { %3536 = vmatpush1.bf16.msra.mxu0 %v7989_v10  ;;  %3622 = vmatpush1.bf16.msra.mxu1 %v7991_v11  ;;  %v421_v10 = vld [vmem:[#allocation5 + $0xa20] sm:$0xff] }
 0x18d   :  { %3537 = vmatprep.subr.bf16.mxu0 %v8006_v12  ;;  %3623 = vmatprep.subr.bf16.mxu1 %v8008_v17  ;;  %v429_v11 = vld [vmem:[#allocation5 + $0xa60] sm:$0xff]  ;;  %v422_v12 = vld [vmem:[#allocation5 + $0xa28] sm:$0xff] }
 0x18e   :  { %v8134_v17 = vcombine.high %v421_v10, %v429_v11  ;;  %v8136_v18 = vcombine.high %v422_v12, %v430_v13  ;;  %v8133_v23 = vcombine.low %v421_v10, %v429_v11  ;;  %v8135_v24 = vcombine.low %v422_v12, %v430_v13  ;;  %v501_v10 = vld [vmem:[#allocation5 + $0xca0] sm:$0xff]  ;;  %v502_v12 = vld [vmem:[#allocation5 + $0xca8] sm:$0xff] }
 0x18f   :  { %v509_v11 = vld [vmem:[#allocation5 + $0xce0] sm:$0xff]  ;;  %v510_v13 = vld [vmem:[#allocation5 + $0xce8] sm:$0xff] }
 0x190   :  { %3538 = vmatpush1.bf16.msra.mxu0 %v8005_v19  ;;  %3624 = vmatpush1.bf16.msra.mxu1 %v8007_v20  ;;  %v437_v19 = vld [vmem:[#allocation5 + $0xaa0] sm:$0xff] }
 0x191   :  { %3539 = vmatprep.subr.bf16.mxu0 %v8022_v21  ;;  %3625 = vmatprep.subr.bf16.mxu1 %v8024_v26  ;;  %v445_v20 = vld [vmem:[#allocation5 + $0xae0] sm:$0xff]  ;;  %v438_v21 = vld [vmem:[#allocation5 + $0xaa8] sm:$0xff] }
 0x192   :  { %v8150_v26 = vcombine.high %v437_v19, %v445_v20  ;;  %v8152_v27 = vcombine.high %v438_v21, %v446_v22  ;;  %v8149_v33 = vcombine.low %v437_v19, %v445_v20  ;;  %v8151_v34 = vcombine.low %v438_v21, %v446_v22  ;;  %v517_v19 = vld [vmem:[#allocation5 + $0xd20] sm:$0xff]  ;;  %v518_v21 = vld [vmem:[#allocation5 + $0xd28] sm:$0xff] }
 0x193   :  { %v525_v20 = vld [vmem:[#allocation5 + $0xd60] sm:$0xff]  ;;  %v526_v22 = vld [vmem:[#allocation5 + $0xd68] sm:$0xff] }
 0x194   :  { %3540 = vmatpush1.bf16.msra.mxu0 %v8021_v29  ;;  %3626 = vmatpush1.bf16.msra.mxu1 %v8023_v30  ;;  %v453_v29 = vld [vmem:[#allocation5 + $0xb20] sm:$0xff] }
 0x195   :  { %3541 = vmatprep.subr.bf16.mxu0 %v8038_v31  ;;  %3627 = vmatprep.subr.bf16.mxu1 %v8040_v35  ;;  %v461_v30 = vld [vmem:[#allocation5 + $0xb60] sm:$0xff]  ;;  %v454_v31 = vld [vmem:[#allocation5 + $0xb28] sm:$0xff] }
 0x196   :  { %v8166_v35 = vcombine.high %v453_v29, %v461_v30 }
 0x198   :  { %3542 = vmatpush1.bf16.msra.mxu0 %v8037_v37  ;;  %3628 = vmatpush1.bf16.msra.mxu1 %v8039_v38  ;;  %v8168_v38 = vcombine.high %v454_v31, %v462_v32 }
 0x199   :  { %3543 = vmatprep.subr.bf16.mxu0 %v8054_v39  ;;  %3629 = vmatprep.subr.bf16.mxu1 %v8056_v43  ;;  %v477_v39 = vld [vmem:[#allocation5 + $0xbe0] sm:$0xff] }
 0x19a   :  { %v8182_v52 = vcombine.high %v469_v36, %v477_v39  ;;  %v8181_v5 = vcombine.low %v469_v36, %v477_v39  ;;  %v550_v39 = vld [vmem:[#allocation5 + $0xe28] sm:$0xff] }
 0x19c   :  { %3544 = vmatpush1.bf16.msra.mxu0 %v8053_v45  ;;  %3630 = vmatpush1.bf16.msra.mxu1 %v8055_v46  ;;  %v8165_v46 = vcombine.low %v453_v29, %v461_v30  ;;  %v533_v29 = vld [vmem:[#allocation5 + $0xda0] sm:$0xff] }
 0x19d   :  { %3556 = vmatprep.subr.bf16.mxu0 %v8070_v47  ;;  %3642 = vmatprep.subr.bf16.mxu1 %v8072_v51  ;;  %v8167_v47 = vcombine.low %v454_v31, %v462_v32  ;;  %v541_v30 = vld [vmem:[#allocation5 + $0xde0] sm:$0xff]  ;;  %v534_v31 = vld [vmem:[#allocation5 + $0xda8] sm:$0xff] }
 0x19e   :  { %v542_v32 = vld [vmem:[#allocation5 + $0xde8] sm:$0xff] }
 0x19f   :  { %3546 = vmatmul.mubr.bf16.vlgmr.msra.gmra.mrb[8].mxu0 %v9966_v15  ;;  %3632 = vmatmul.mubr.bf16.vlgmr.msra.gmra.mrb[8].mxu1 %v9966_v15  ;;  %v8248_v36 = vcombine.high %v534_v31, %v542_v32 }
 0x1a0   :  { %3557 = vmatpush1.bf16.msra.mxu0 %v8069_v53  ;;  %3643 = vmatpush1.bf16.msra.mxu1 %v8071_v54  ;;  %v8184_v53 = vcombine.high %v470_v40, %v478_v41  ;;  %v485_v54 = vld [vmem:[#allocation5 + $0xc20] sm:$0xff] }
 0x1a1   :  { %3558 = vmatprep.subr.bf16.mxu0 %v8086_v55  ;;  %3644 = vmatprep.subr.bf16.mxu1 %v8088_v60 }
 0x1a2   :  { %3588 = vmatprep.mubr.bf16.mxu0 %v9968_v25  ;;  %3674 = vmatprep.mubr.bf16.mxu1 %v9968_v25 }
 0x1a4   :  { %3559 = vmatpush1.bf16.msra.mxu0 %v8085_v62  ;;  %3645 = vmatpush1.bf16.msra.mxu1 %v8087_v63 }
 0x1a5   :  { %3560 = vmatprep.subr.bf16.mxu0 %v8102_v0  ;;  %3646 = vmatprep.subr.bf16.mxu1 %v8104_v1  ;;  %v486_v1 = vld [vmem:[#allocation5 + $0xc28] sm:$0xff] }
 0x1a8   :  { %3561 = vmatpush1.bf16.msra.mxu0 %v8101_v6  ;;  %3647 = vmatpush1.bf16.msra.mxu1 %v8103_v7  ;;  %v8183_v7 = vcombine.low %v470_v40, %v478_v41  ;;  %v558_v40 = vld [vmem:[#allocation5 + $0xe68] sm:$0xff]  ;;  %v8245_v41 = vcombine.low %v533_v29, %v541_v30 }
 0x1a9   :  { %3562 = vmatprep.subr.bf16.mxu0 %v8118_v8  ;;  %3648 = vmatprep.subr.bf16.mxu1 %v8120_v9  ;;  %v8198_v8 = vcombine.high %v485_v54, %v493_v61  ;;  %v8200_v9 = vcombine.high %v486_v1, %v494_v2 }
 0x1ac   :  { %3563 = vmatpush1.bf16.msra.mxu0 %v8117_v14  ;;  %3649 = vmatpush1.bf16.msra.mxu1 %v8119_v16  ;;  %v8197_v14 = vcombine.low %v485_v54, %v493_v61  ;;  %v8199_v16 = vcombine.low %v486_v1, %v494_v2  ;;  %v589_v54 = vld [vmem:[#allocation5 + $0xf60] sm:$0xff]  ;;  %v598_v1 = vld [vmem:[#allocation5 + $0xfa8] sm:$0xff] }
 0x1ad   :  { %3564 = vmatprep.subr.bf16.mxu0 %v8134_v17  ;;  %3650 = vmatprep.subr.bf16.mxu1 %v8136_v18  ;;  %v8214_v17 = vcombine.high %v501_v10, %v509_v11  ;;  %v8216_v18 = vcombine.high %v502_v12, %v510_v13  ;;  %v606_v2 = vld [vmem:[#allocation5 + $0xfe8] sm:$0xff] }
 0x1b0   :  { %3565 = vmatpush1.bf16.msra.mxu0 %v8133_v23  ;;  %3651 = vmatpush1.bf16.msra.mxu1 %v8135_v24  ;;  %v8213_v23 = vcombine.low %v501_v10, %v509_v11  ;;  %v8215_v24 = vcombine.low %v502_v12, %v510_v13  ;;  %v103_v10 = vld [vmem:[#allocation5 + $0x30] sm:$0xff]  ;;  %v104_v12 = vld [vmem:[#allocation5 + $0x38] sm:$0xff] }
 0x1b1   :  { %3566 = vmatprep.subr.bf16.mxu0 %v8150_v26  ;;  %3652 = vmatprep.subr.bf16.mxu1 %v8152_v27  ;;  %v8230_v26 = vcombine.high %v517_v19, %v525_v20  ;;  %v8232_v27 = vcombine.high %v518_v21, %v526_v22  ;;  %v111_v11 = vld [vmem:[#allocation5 + $0x70] sm:$0xff]  ;;  %v112_v13 = vld [vmem:[#allocation5 + $0x78] sm:$0xff] }
 0x1b2   :  { %v3246_v37 = vpop.f32.mrb[0].mxu0  ;;  %v3332_v42 = vpop.f32.mrb[0].mxu1 }
 0x1b3   :  { %v3248_v43 = vpop.f32.mrb[1].mxu0  ;;  %v3334_v44 = vpop.f32.mrb[1].mxu1  ;;  %v3857_v48 = vmax.f32 %v3246_v37, 0.0  ;;  %v3859_v55 = vmax.f32 %v3332_v42, 0.0  ;;  %v549_v37 = vld [vmem:[#allocation5 + $0xe20] sm:$0xff]  ;;  %v8247_v42 = vcombine.low %v534_v31, %v542_v32  ;;  %v136_v31 = vld [vmem:[#allocation5 + $0x138] sm:$0xff] }
 0x1b4   :  { %v3250_v45 = vpop.f32.mrb[2].mxu0  ;;  %3567 = vmatpush1.bf16.msra.mxu0 %v8149_v33  ;;  %v3336_v50 = vpop.f32.mrb[2].mxu1  ;;  %3653 = vmatpush1.bf16.msra.mxu1 %v8151_v34  ;;  %v3858_v56 = vmax.f32 %v3248_v43, 0.0  ;;  %v3860_v62 = vmax.f32 %v3334_v44, 0.0  ;;  %v8229_v33 = vcombine.low %v517_v19, %v525_v20  ;;  %v8231_v34 = vcombine.low %v518_v21, %v526_v22  ;;  %v119_v19 = vld [vmem:[#allocation5 + $0xb0] sm:$0xff]  ;;  %v120_v21 = vld [vmem:[#allocation5 + $0xb8] sm:$0xff] }
 0x1b5   :  { %v3873_v49 = vmax.f32 %v3250_v45, 0.0  ;;  %v3252_v51 = vpop.f32.mrb[3].mxu0  ;;  %3568 = vmatprep.subr.bf16.mxu0 %v8166_v35  ;;  %v3875_v57 = vmax.f32 %v3336_v50, 0.0  ;;  %v3338_v60 = vpop.f32.mrb[3].mxu1  ;;  %3654 = vmatprep.subr.bf16.mxu1 %v8168_v38  ;;  %v8246_v35 = vcombine.high %v533_v29, %v541_v30  ;;  %v557_v38 = vld [vmem:[#allocation5 + $0xe60] sm:$0xff]  ;;  %v8264_v44 = vcombine.high %v550_v39, %v558_v40  ;;  %v127_v20 = vld [vmem:[#allocation5 + $0xf0] sm:$0xff] }
 0x1b6   :  { %v3874_v59 = vmax.f32 %v3252_v51, 0.0  ;;  %v3876_v0 = vmax.f32 %v3338_v60, 0.0  ;;  %v8262_v43 = vcombine.high %v549_v37, %v557_v38  ;;  %v565_v45 = vld [vmem:[#allocation5 + $0xea0] sm:$0xff]  ;;  %v8263_v50 = vcombine.low %v550_v39, %v558_v40  ;;  %v128_v22 = vld [vmem:[#allocation5 + $0xf8] sm:$0xff]  ;;  %v135_v29 = vld [vmem:[#allocation5 + $0x130] sm:$0xff] }
 0x1b7   :  { %v9992_v63 = vpack.c.bf16 %v3873_v49, %v3857_v48  ;;  %v9994_v3 = vpack.c.bf16 %v3875_v57, %v3859_v55  ;;  %v574_v48 = vld [vmem:[#allocation5 + $0xee8] sm:$0xff]  ;;  %v8261_v49 = vcombine.low %v549_v37, %v557_v38  ;;  %v143_v30 = vld [vmem:[#allocation5 + $0x170] sm:$0xff]  ;;  %v144_v32 = vld [vmem:[#allocation5 + $0x178] sm:$0xff] }
 0x1b8   :  { %v9996_v4 = vpack.c.bf16 %v3874_v59, %v3858_v56  ;;  %3569 = vmatpush1.bf16.msra.mxu0 %v8165_v46  ;;  %v9998_v6 = vpack.c.bf16 %v3876_v0, %v3860_v62  ;;  %3655 = vmatpush1.bf16.msra.mxu1 %v8167_v47  ;;  %v573_v46 = vld [vmem:[#allocation5 + $0xee0] sm:$0xff]  ;;  %v566_v47 = vld [vmem:[#allocation5 + $0xea8] sm:$0xff]  ;;  %v151_v37 = vld [vmem:[#allocation5 + $0x1b0] sm:$0xff] }
 0x1b9   :  { %3570 = vmatprep.subr.bf16.mxu0 %v8182_v52  ;;  %3656 = vmatprep.subr.bf16.mxu1 %v8184_v53  ;;  %v8278_v51 = vcombine.high %v565_v45, %v573_v46  ;;  %v8280_v52 = vcombine.high %v566_v47, %v574_v48  ;;  %v581_v53 = vld [vmem:[#allocation5 + $0xf20] sm:$0xff]  ;;  %v582_v55 = vld [vmem:[#allocation5 + $0xf28] sm:$0xff]  ;;  %v8277_v57 = vcombine.low %v565_v45, %v573_v46  ;;  %v159_v38 = vld [vmem:[#allocation5 + $0x1f0] sm:$0xff] }
 0x1ba   :  { %v590_v56 = vld [vmem:[#allocation5 + $0xf68] sm:$0xff]  ;;  %v8279_v59 = vcombine.low %v566_v47, %v574_v48  ;;  %v8294_v60 = vcombine.high %v581_v53, %v589_v54  ;;  %v597_v62 = vld [vmem:[#allocation5 + $0xfa0] sm:$0xff]  ;;  %v152_v39 = vld [vmem:[#allocation5 + $0x1b8] sm:$0xff] }
 0x1bb   :  { %v8296_v61 = vcombine.high %v582_v55, %v590_v56  ;;  %v605_v0 = vld [vmem:[#allocation5 + $0xfe0] sm:$0xff]  ;;  %v160_v40 = vld [vmem:[#allocation5 + $0x1f8] sm:$0xff]  ;;  %v167_v45 = vld [vmem:[#allocation5 + $0x230] sm:$0xff] }
 0x1bc   :  { %3571 = vmatpush1.bf16.msra.mxu0 %v8181_v5  ;;  %3657 = vmatpush1.bf16.msra.mxu1 %v8183_v7  ;;  %v8293_v5 = vcombine.low %v581_v53, %v589_v54  ;;  %v8295_v7 = vcombine.low %v582_v55, %v590_v56  ;;  %v175_v46 = vld [vmem:[#allocation5 + $0x270] sm:$0xff]  ;;  %v168_v47 = vld [vmem:[#allocation5 + $0x238] sm:$0xff] }
 0x1bd   :  { %3572 = vmatprep.subr.bf16.mxu0 %v8198_v8  ;;  %3658 = vmatprep.subr.bf16.mxu1 %v8200_v9  ;;  %v8310_v8 = vcombine.high %v597_v62, %v605_v0  ;;  %v8312_v9 = vcombine.high %v598_v1, %v606_v2  ;;  %v176_v48 = vld [vmem:[#allocation5 + $0x278] sm:$0xff]  ;;  %v191_v53 = vld [vmem:[#allocation5 + $0x2f0] sm:$0xff]  ;;  %v7881_v56 = vcombine.low %v167_v45, %v175_v46 }
 0x1be   :  { %v184_v54 = vld [vmem:[#allocation5 + $0x2b8] sm:$0xff] }
 0x1bf   :  { %v192_v55 = vld [vmem:[#allocation5 + $0x2f8] sm:$0xff] }
 0x1c0   :  { %3573 = vmatpush1.bf16.msra.mxu0 %v8197_v14  ;;  %3659 = vmatpush1.bf16.msra.mxu1 %v8199_v16  ;;  %v8309_v14 = vcombine.low %v597_v62, %v605_v0  ;;  %v8311_v16 = vcombine.low %v598_v1, %v606_v2  ;;  %v207_v62 = vld [vmem:[#allocation5 + $0x370] sm:$0xff]  ;;  %v200_v0 = vld [vmem:[#allocation5 + $0x338] sm:$0xff] }
 0x1c1   :  { %3574 = vmatprep.subr.bf16.mxu0 %v8214_v17  ;;  %3660 = vmatprep.subr.bf16.mxu1 %v8216_v18  ;;  %v7818_v17 = vcombine.high %v103_v10, %v111_v11  ;;  %v7820_v18 = vcombine.high %v104_v12, %v112_v13  ;;  %v208_v1 = vld [vmem:[#allocation5 + $0x378] sm:$0xff] }
 0x1c4   :  { %3575 = vmatpush1.bf16.msra.mxu0 %v8213_v23  ;;  %3661 = vmatpush1.bf16.msra.mxu1 %v8215_v24  ;;  %v7817_v23 = vcombine.low %v103_v10, %v111_v11  ;;  %v7819_v24 = vcombine.low %v104_v12, %v112_v13  ;;  %v223_v10 = vld [vmem:[#allocation5 + $0x3f0] sm:$0xff]  ;;  %v216_v11 = vld [vmem:[#allocation5 + $0x3b8] sm:$0xff] }
 0x1c5   :  { %3576 = vmatprep.subr.bf16.mxu0 %v8230_v26  ;;  %3662 = vmatprep.subr.bf16.mxu1 %v8232_v27  ;;  %v7834_v26 = vcombine.high %v119_v19, %v127_v20  ;;  %v7836_v27 = vcombine.high %v120_v21, %v128_v22  ;;  %v224_v12 = vld [vmem:[#allocation5 + $0x3f8] sm:$0xff] }
 0x1c8   :  { %3577 = vmatpush1.bf16.msra.mxu0 %v8229_v33  ;;  %3663 = vmatpush1.bf16.msra.mxu1 %v8231_v34  ;;  %v7833_v33 = vcombine.low %v119_v19, %v127_v20  ;;  %v7835_v34 = vcombine.low %v120_v21, %v128_v22  ;;  %v239_v19 = vld [vmem:[#allocation5 + $0x470] sm:$0xff]  ;;  %v232_v20 = vld [vmem:[#allocation5 + $0x438] sm:$0xff] }
 0x1c9   :  { %3578 = vmatprep.subr.bf16.mxu0 %v8246_v35  ;;  %3664 = vmatprep.subr.bf16.mxu1 %v8248_v36  ;;  %v7850_v35 = vcombine.high %v135_v29, %v143_v30  ;;  %v7852_v36 = vcombine.high %v136_v31, %v144_v32  ;;  %v240_v21 = vld [vmem:[#allocation5 + $0x478] sm:$0xff] }
 0x1cc   :  { %3579 = vmatpush1.bf16.msra.mxu0 %v8245_v41  ;;  %3665 = vmatpush1.bf16.msra.mxu1 %v8247_v42  ;;  %v7849_v41 = vcombine.low %v135_v29, %v143_v30  ;;  %v7851_v42 = vcombine.low %v136_v31, %v144_v32  ;;  %v255_v29 = vld [vmem:[#allocation5 + $0x4f0] sm:$0xff]  ;;  %v248_v30 = vld [vmem:[#allocation5 + $0x4b8] sm:$0xff] }
 0x1cd   :  { %3580 = vmatprep.subr.bf16.mxu0 %v8262_v43  ;;  %3666 = vmatprep.subr.bf16.mxu1 %v8264_v44  ;;  %v7866_v43 = vcombine.high %v151_v37, %v159_v38  ;;  %v7868_v44 = vcombine.high %v152_v39, %v160_v40  ;;  %v256_v31 = vld [vmem:[#allocation5 + $0x4f8] sm:$0xff] }
 0x1d0   :  { %3581 = vmatpush1.bf16.msra.mxu0 %v8261_v49  ;;  %3667 = vmatpush1.bf16.msra.mxu1 %v8263_v50  ;;  %v7865_v49 = vcombine.low %v151_v37, %v159_v38  ;;  %v7867_v50 = vcombine.low %v152_v39, %v160_v40  ;;  %v271_v37 = vld [vmem:[#allocation5 + $0x570] sm:$0xff]  ;;  %v264_v38 = vld [vmem:[#allocation5 + $0x538] sm:$0xff] }
 0x1d1   :  { %3582 = vmatprep.subr.bf16.mxu0 %v8278_v51  ;;  %3668 = vmatprep.subr.bf16.mxu1 %v8280_v52  ;;  %v7882_v51 = vcombine.high %v167_v45, %v175_v46  ;;  %v183_v52 = vld [vmem:[#allocation5 + $0x2b0] sm:$0xff]  ;;  %v272_v39 = vld [vmem:[#allocation5 + $0x578] sm:$0xff] }
 0x1d2   :  { %v7897_v2 = vcombine.low %v183_v52, %v191_v53  ;;  %v287_v45 = vld [vmem:[#allocation5 + $0x5f0] sm:$0xff]  ;;  %v280_v46 = vld [vmem:[#allocation5 + $0x5b8] sm:$0xff] }
 0x1d4   :  { %3583 = vmatpush1.bf16.msra.mxu0 %v8277_v57  ;;  %3669 = vmatpush1.bf16.msra.mxu1 %v8279_v59  ;;  %v7883_v57 = vcombine.low %v168_v47, %v176_v48  ;;  %v7898_v59 = vcombine.high %v183_v52, %v191_v53  ;;  %v303_v52 = vld [vmem:[#allocation5 + $0x670] sm:$0xff]  ;;  %v296_v53 = vld [vmem:[#allocation5 + $0x638] sm:$0xff] }
 0x1d5   :  { %3584 = vmatprep.subr.bf16.mxu0 %v8294_v60  ;;  %3670 = vmatprep.subr.bf16.mxu1 %v8296_v61  ;;  %v7900_v60 = vcombine.high %v184_v54, %v192_v55  ;;  %v199_v61 = vld [vmem:[#allocation5 + $0x330] sm:$0xff] }
 0x1d6   :  { %v7913_v13 = vcombine.low %v199_v61, %v207_v62 }
 0x1d8   :  { %3585 = vmatpush1.bf16.msra.mxu0 %v8293_v5  ;;  %3671 = vmatpush1.bf16.msra.mxu1 %v8295_v7  ;;  %v7899_v5 = vcombine.low %v184_v54, %v192_v55  ;;  %v7914_v7 = vcombine.high %v199_v61, %v207_v62  ;;  %v304_v54 = vld [vmem:[#allocation5 + $0x678] sm:$0xff]  ;;  %v319_v61 = vld [vmem:[#allocation5 + $0x6f0] sm:$0xff] }
 0x1d9   :  { %3586 = vmatprep.subr.bf16.mxu0 %v8310_v8  ;;  %3672 = vmatprep.subr.bf16.mxu1 %v8312_v9  ;;  %v7916_v8 = vcombine.high %v200_v0, %v208_v1  ;;  %v215_v9 = vld [vmem:[#allocation5 + $0x3b0] sm:$0xff]  ;;  %v312_v62 = vld [vmem:[#allocation5 + $0x6b8] sm:$0xff] }
 0x1da   :  { %v7929_v22 = vcombine.low %v215_v9, %v223_v10 }
 0x1dc   :  { %3587 = vmatpush1.bf16.msra.mxu0 %v8309_v14  ;;  %3673 = vmatpush1.bf16.msra.mxu1 %v8311_v16  ;;  %v7915_v14 = vcombine.low %v200_v0, %v208_v1  ;;  %v7930_v16 = vcombine.high %v215_v9, %v223_v10  ;;  %v320_v0 = vld [vmem:[#allocation5 + $0x6f8] sm:$0xff]  ;;  %v335_v9 = vld [vmem:[#allocation5 + $0x770] sm:$0xff] }
 0x1dd   :  { %3685 = vmatprep.subr.bf16.mxu0 %v7818_v17  ;;  %3771 = vmatprep.subr.bf16.mxu1 %v7820_v18  ;;  %v7932_v17 = vcombine.high %v216_v11, %v224_v12  ;;  %v231_v18 = vld [vmem:[#allocation5 + $0x430] sm:$0xff]  ;;  %v328_v10 = vld [vmem:[#allocation5 + $0x738] sm:$0xff] }
 0x1de   :  { %v7945_v32 = vcombine.low %v231_v18, %v239_v19 }
 0x1df   :  { %3589 = vmatmul.mubr.bf16.vlgmr.msra.gmra.mrb[8].mxu0 %v9974_v28  ;;  %3675 = vmatmul.mubr.bf16.vlgmr.msra.gmra.mrb[8].mxu1 %v9974_v28 }
 0x1e0   :  { %3686 = vmatpush1.bf16.msra.mxu0 %v7817_v23  ;;  %3772 = vmatpush1.bf16.msra.mxu1 %v7819_v24  ;;  %v7931_v23 = vcombine.low %v216_v11, %v224_v12  ;;  %v7946_v24 = vcombine.high %v231_v18, %v239_v19  ;;  %v336_v11 = vld [vmem:[#allocation5 + $0x778] sm:$0xff]  ;;  %v351_v18 = vld [vmem:[#allocation5 + $0x7f0] sm:$0xff] }
 0x1e1   :  { %3687 = vmatprep.subr.bf16.mxu0 %v7834_v26  ;;  %3773 = vmatprep.subr.bf16.mxu1 %v7836_v27  ;;  %v7948_v26 = vcombine.high %v232_v20, %v240_v21  ;;  %v247_v27 = vld [vmem:[#allocation5 + $0x4b0] sm:$0xff]  ;;  %v344_v19 = vld [vmem:[#allocation5 + $0x7b8] sm:$0xff] }
 0x1e2   :  { %3717 = vmatprep.mubr.bf16.mxu0 %v9962_v58  ;;  %3803 = vmatprep.mubr.bf16.mxu1 %v9962_v58  ;;  %v7884_v58 = vcombine.high %v168_v47, %v176_v48  ;;  %v7961_v40 = vcombine.low %v247_v27, %v255_v29  ;;  %v288_v47 = vld [vmem:[#allocation5 + $0x5f8] sm:$0xff] }
 0x1e4   :  { %3688 = vmatpush1.bf16.msra.mxu0 %v7833_v33  ;;  %3774 = vmatpush1.bf16.msra.mxu1 %v7835_v34  ;;  %v7947_v33 = vcombine.low %v232_v20, %v240_v21  ;;  %v7962_v34 = vcombine.high %v247_v27, %v255_v29  ;;  %v352_v20 = vld [vmem:[#allocation5 + $0x7f8] sm:$0xff]  ;;  %v367_v27 = vld [vmem:[#allocation5 + $0x870] sm:$0xff] }
 0x1e5   :  { %3689 = vmatprep.subr.bf16.mxu0 %v7850_v35  ;;  %3775 = vmatprep.subr.bf16.mxu1 %v7852_v36  ;;  %v7964_v35 = vcombine.high %v248_v30, %v256_v31  ;;  %v263_v36 = vld [vmem:[#allocation5 + $0x530] sm:$0xff]  ;;  %v360_v29 = vld [vmem:[#allocation5 + $0x838] sm:$0xff] }
 0x1e6   :  { %v7977_v48 = vcombine.low %v263_v36, %v271_v37 }
 0x1e8   :  { %3690 = vmatpush1.bf16.msra.mxu0 %v7849_v41  ;;  %3776 = vmatpush1.bf16.msra.mxu1 %v7851_v42  ;;  %v7963_v41 = vcombine.low %v248_v30, %v256_v31  ;;  %v7978_v42 = vcombine.high %v263_v36, %v271_v37  ;;  %v368_v30 = vld [vmem:[#allocation5 + $0x878] sm:$0xff]  ;;  %v383_v36 = vld [vmem:[#allocation5 + $0x8f0] sm:$0xff] }
 0x1e9   :  { %3691 = vmatprep.subr.bf16.mxu0 %v7866_v43  ;;  %3777 = vmatprep.subr.bf16.mxu1 %v7868_v44  ;;  %v7980_v43 = vcombine.high %v264_v38, %v272_v39  ;;  %v279_v44 = vld [vmem:[#allocation5 + $0x5b0] sm:$0xff]  ;;  %v376_v37 = vld [vmem:[#allocation5 + $0x8b8] sm:$0xff] }
 0x1ea   :  { %v7993_v55 = vcombine.low %v279_v44, %v287_v45 }
 0x1ec   :  { %3692 = vmatpush1.bf16.msra.mxu0 %v7865_v49  ;;  %3778 = vmatpush1.bf16.msra.mxu1 %v7867_v50  ;;  %v7979_v49 = vcombine.low %v264_v38, %v272_v39  ;;  %v7994_v50 = vcombine.high %v279_v44, %v287_v45  ;;  %v384_v38 = vld [vmem:[#allocation5 + $0x8f8] sm:$0xff]  ;;  %v399_v44 = vld [vmem:[#allocation5 + $0x970] sm:$0xff] }
 0x1ed   :  { %3693 = vmatprep.subr.bf16.mxu0 %v7882_v51  ;;  %3779 = vmatprep.subr.bf16.mxu1 %v7884_v58  ;;  %v7996_v51 = vcombine.high %v280_v46, %v288_v47  ;;  %v295_v58 = vld [vmem:[#allocation5 + $0x630] sm:$0xff]  ;;  %v392_v45 = vld [vmem:[#allocation5 + $0x938] sm:$0xff] }
 0x1ee   :  { %v8009_v1 = vcombine.low %v295_v58, %v303_v52 }
 0x1f0   :  { %3694 = vmatpush1.bf16.msra.mxu0 %v7881_v56  ;;  %3780 = vmatpush1.bf16.msra.mxu1 %v7883_v57  ;;  %v7995_v56 = vcombine.low %v280_v46, %v288_v47  ;;  %v8010_v57 = vcombine.high %v295_v58, %v303_v52  ;;  %v400_v46 = vld [vmem:[#allocation5 + $0x978] sm:$0xff]  ;;  %v415_v58 = vld [vmem:[#allocation5 + $0x9f0] sm:$0xff] }
 0x1f1   :  { %3695 = vmatprep.subr.bf16.mxu0 %v7898_v59  ;;  %3781 = vmatprep.subr.bf16.mxu1 %v7900_v60  ;;  %v8012_v59 = vcombine.high %v296_v53, %v304_v54  ;;  %v311_v60 = vld [vmem:[#allocation5 + $0x6b0] sm:$0xff]  ;;  %v408_v52 = vld [vmem:[#allocation5 + $0x9b8] sm:$0xff] }
 0x1f2   :  { %v8025_v12 = vcombine.low %v311_v60, %v319_v61 }
 0x1f4   :  { %3696 = vmatpush1.bf16.msra.mxu0 %v7897_v2  ;;  %3782 = vmatpush1.bf16.msra.mxu1 %v7899_v5  ;;  %v8011_v2 = vcombine.low %v296_v53, %v304_v54  ;;  %v8026_v5 = vcombine.high %v311_v60, %v319_v61  ;;  %v416_v53 = vld [vmem:[#allocation5 + $0x9f8] sm:$0xff] }
 0x1f5   :  { %3697 = vmatprep.subr.bf16.mxu0 %v7914_v7  ;;  %3783 = vmatprep.subr.bf16.mxu1 %v7916_v8  ;;  %v8028_v7 = vcombine.high %v312_v62, %v320_v0  ;;  %v327_v8 = vld [vmem:[#allocation5 + $0x730] sm:$0xff]  ;;  %v424_v60 = vld [vmem:[#allocation5 + $0xa38] sm:$0xff] }
 0x1f6   :  { %v8041_v21 = vcombine.low %v327_v8, %v335_v9  ;;  %v432_v61 = vld [vmem:[#allocation5 + $0xa78] sm:$0xff] }
 0x1f8   :  { %3698 = vmatpush1.bf16.msra.mxu0 %v7913_v13  ;;  %3784 = vmatpush1.bf16.msra.mxu1 %v7915_v14  ;;  %v8027_v13 = vcombine.low %v312_v62, %v320_v0  ;;  %v8042_v14 = vcombine.high %v327_v8, %v335_v9  ;;  %v8123_v0 = vcombine.low %v408_v52, %v416_v53  ;;  %v448_v8 = vld [vmem:[#allocation5 + $0xaf8] sm:$0xff] }
 0x1f9   :  { %3699 = vmatprep.subr.bf16.mxu0 %v7930_v16  ;;  %3785 = vmatprep.subr.bf16.mxu1 %v7932_v17  ;;  %v8044_v16 = vcombine.high %v328_v10, %v336_v11  ;;  %v343_v17 = vld [vmem:[#allocation5 + $0x7b0] sm:$0xff] }
 0x1fa   :  { %v8057_v31 = vcombine.low %v343_v17, %v351_v18 }
 0x1fc   :  { %3700 = vmatpush1.bf16.msra.mxu0 %v7929_v22  ;;  %3786 = vmatpush1.bf16.msra.mxu1 %v7931_v23  ;;  %v8043_v22 = vcombine.low %v328_v10, %v336_v11  ;;  %v8058_v23 = vcombine.high %v343_v17, %v351_v18  ;;  %v8139_v10 = vcombine.low %v424_v60, %v432_v61  ;;  %v464_v17 = vld [vmem:[#allocation5 + $0xb78] sm:$0xff] }
 0x1fd   :  { %3701 = vmatprep.subr.bf16.mxu0 %v7946_v24  ;;  %3787 = vmatprep.subr.bf16.mxu1 %v7948_v26  ;;  %v8060_v24 = vcombine.high %v344_v19, %v352_v20  ;;  %v359_v26 = vld [vmem:[#allocation5 + $0x830] sm:$0xff] }
 0x1fe   :  { %v8073_v39 = vcombine.low %v359_v26, %v367_v27 }
 0x200   :  { %3702 = vmatpush1.bf16.msra.mxu0 %v7945_v32  ;;  %3788 = vmatpush1.bf16.msra.mxu1 %v7947_v33  ;;  %v8059_v32 = vcombine.low %v344_v19, %v352_v20  ;;  %v8074_v33 = vcombine.high %v359_v26, %v367_v27  ;;  %v472_v26 = vld [vmem:[#allocation5 + $0xbb8] sm:$0xff] }
 0x201   :  { %3703 = vmatprep.subr.bf16.mxu0 %v7962_v34  ;;  %3789 = vmatprep.subr.bf16.mxu1 %v7964_v35  ;;  %v8076_v34 = vcombine.high %v360_v29, %v368_v30  ;;  %v375_v35 = vld [vmem:[#allocation5 + $0x8b0] sm:$0xff]  ;;  %v480_v27 = vld [vmem:[#allocation5 + $0xbf8] sm:$0xff] }
 0x202   :  { %v8089_v47 = vcombine.low %v375_v35, %v383_v36 }
 0x204   :  { %3704 = vmatpush1.bf16.msra.mxu0 %v7961_v40  ;;  %3790 = vmatpush1.bf16.msra.mxu1 %v7963_v41  ;;  %v8075_v40 = vcombine.low %v360_v29, %v368_v30  ;;  %v8090_v41 = vcombine.high %v375_v35, %v383_v36 }
 0x205   :  { %3705 = vmatprep.subr.bf16.mxu0 %v7978_v42  ;;  %3791 = vmatprep.subr.bf16.mxu1 %v7980_v43  ;;  %v8092_v42 = vcombine.high %v376_v37, %v384_v38  ;;  %v391_v43 = vld [vmem:[#allocation5 + $0x930] sm:$0xff] }
 0x206   :  { %v8105_v54 = vcombine.low %v391_v43, %v399_v44 }
 0x208   :  { %3706 = vmatpush1.bf16.msra.mxu0 %v7977_v48  ;;  %3792 = vmatpush1.bf16.msra.mxu1 %v7979_v49  ;;  %v8091_v48 = vcombine.low %v376_v37, %v384_v38  ;;  %v8106_v49 = vcombine.high %v391_v43, %v399_v44 }
 0x209   :  { %3707 = vmatprep.subr.bf16.mxu0 %v7994_v50  ;;  %3793 = vmatprep.subr.bf16.mxu1 %v7996_v51  ;;  %v8108_v50 = vcombine.high %v392_v45, %v400_v46  ;;  %v407_v51 = vld [vmem:[#allocation5 + $0x9b0] sm:$0xff] }
 0x20a   :  { %v8121_v62 = vcombine.low %v407_v51, %v415_v58 }
 0x20c   :  { %3708 = vmatpush1.bf16.msra.mxu0 %v7993_v55  ;;  %3794 = vmatpush1.bf16.msra.mxu1 %v7995_v56  ;;  %v8122_v55 = vcombine.high %v407_v51, %v415_v58  ;;  %v8124_v56 = vcombine.high %v408_v52, %v416_v53  ;;  %v488_v51 = vld [vmem:[#allocation5 + $0xc38] sm:$0xff] }
 0x20d   :  { %3709 = vmatprep.subr.bf16.mxu0 %v8010_v57  ;;  %3795 = vmatprep.subr.bf16.mxu1 %v8012_v59  ;;  %v423_v57 = vld [vmem:[#allocation5 + $0xa30] sm:$0xff]  ;;  %v496_v58 = vld [vmem:[#allocation5 + $0xc78] sm:$0xff] }
 0x20e   :  { %v431_v59 = vld [vmem:[#allocation5 + $0xa70] sm:$0xff] }
 0x20f   :  { %v8137_v9 = vcombine.low %v423_v57, %v431_v59 }
 0x210   :  { %3710 = vmatpush1.bf16.msra.mxu0 %v8009_v1  ;;  %3796 = vmatpush1.bf16.msra.mxu1 %v8011_v2  ;;  %v8138_v1 = vcombine.high %v423_v57, %v431_v59  ;;  %v439_v2 = vld [vmem:[#allocation5 + $0xab0] sm:$0xff]  ;;  %v8204_v57 = vcombine.high %v488_v51, %v496_v58 }
 0x211   :  { %3711 = vmatprep.subr.bf16.mxu0 %v8026_v5  ;;  %3797 = vmatprep.subr.bf16.mxu1 %v8028_v7  ;;  %v447_v5 = vld [vmem:[#allocation5 + $0xaf0] sm:$0xff]  ;;  %v440_v7 = vld [vmem:[#allocation5 + $0xab8] sm:$0xff] }
 0x212   :  { %v8154_v11 = vcombine.high %v439_v2, %v447_v5  ;;  %v8153_v18 = vcombine.low %v439_v2, %v447_v5  ;;  %v8155_v19 = vcombine.low %v440_v7, %v448_v8  ;;  %v503_v59 = vld [vmem:[#allocation5 + $0xcb0] sm:$0xff] }
 0x213   :  { %v519_v5 = vld [vmem:[#allocation5 + $0xd30] sm:$0xff] }
 0x214   :  { %3712 = vmatpush1.bf16.msra.mxu0 %v8025_v12  ;;  %3798 = vmatpush1.bf16.msra.mxu1 %v8027_v13  ;;  %v8156_v12 = vcombine.high %v440_v7, %v448_v8  ;;  %v455_v13 = vld [vmem:[#allocation5 + $0xb30] sm:$0xff]  ;;  %v520_v8 = vld [vmem:[#allocation5 + $0xd38] sm:$0xff] }
 0x215   :  { %3713 = vmatprep.subr.bf16.mxu0 %v8042_v14  ;;  %3799 = vmatprep.subr.bf16.mxu1 %v8044_v16  ;;  %v463_v14 = vld [vmem:[#allocation5 + $0xb70] sm:$0xff]  ;;  %v456_v16 = vld [vmem:[#allocation5 + $0xb38] sm:$0xff] }
 0x216   :  { %v8170_v20 = vcombine.high %v455_v13, %v463_v14  ;;  %v527_v7 = vld [vmem:[#allocation5 + $0xd70] sm:$0xff] }
 0x218   :  { %3714 = vmatpush1.bf16.msra.mxu0 %v8041_v21  ;;  %3800 = vmatpush1.bf16.msra.mxu1 %v8043_v22  ;;  %v471_v21 = vld [vmem:[#allocation5 + $0xbb0] sm:$0xff] }
 0x219   :  { %3715 = vmatprep.subr.bf16.mxu0 %v8058_v23  ;;  %3801 = vmatprep.subr.bf16.mxu1 %v8060_v24  ;;  %v8172_v23 = vcombine.high %v456_v16, %v464_v17  ;;  %v479_v24 = vld [vmem:[#allocation5 + $0xbf0] sm:$0xff] }
 0x21c   :  { %3716 = vmatpush1.bf16.msra.mxu0 %v8057_v31  ;;  %3802 = vmatpush1.bf16.msra.mxu1 %v8059_v32 }
 0x21d   :  { %3728 = vmatprep.subr.bf16.mxu0 %v8074_v33  ;;  %3814 = vmatprep.subr.bf16.mxu1 %v8076_v34  ;;  %v8169_v33 = vcombine.low %v455_v13, %v463_v14  ;;  %v8171_v34 = vcombine.low %v456_v16, %v464_v17  ;;  %v535_v14 = vld [vmem:[#allocation5 + $0xdb0] sm:$0xff]  ;;  %v536_v17 = vld [vmem:[#allocation5 + $0xdb8] sm:$0xff] }
 0x21e   :  { %v543_v16 = vld [vmem:[#allocation5 + $0xdf0] sm:$0xff] }
 0x21f   :  { %3718 = vmatmul.mubr.bf16.vlgmr.msra.gmra.mrb[12].mxu0 %v9966_v15  ;;  %3804 = vmatmul.mubr.bf16.vlgmr.msra.gmra.mrb[12].mxu1 %v9966_v15  ;;  %v8107_v15 = vcombine.low %v392_v45, %v400_v46 }
 0x220   :  { %3729 = vmatpush1.bf16.msra.mxu0 %v8073_v39  ;;  %3815 = vmatpush1.bf16.msra.mxu1 %v8075_v40  ;;  %v8186_v39 = vcombine.high %v471_v21, %v479_v24  ;;  %v8188_v40 = vcombine.high %v472_v26, %v480_v27 }
 0x221   :  { %3730 = vmatprep.subr.bf16.mxu0 %v8090_v41  ;;  %3816 = vmatprep.subr.bf16.mxu1 %v8092_v42  ;;  %v487_v41 = vld [vmem:[#allocation5 + $0xc30] sm:$0xff] }
 0x222   :  { %3760 = vmatprep.mubr.bf16.mxu0 %v9968_v25  ;;  %3846 = vmatprep.mubr.bf16.mxu1 %v9968_v25  ;;  %v8140_v25 = vcombine.high %v424_v60, %v432_v61  ;;  %v511_v60 = vld [vmem:[#allocation5 + $0xcf0] sm:$0xff]  ;;  %v504_v61 = vld [vmem:[#allocation5 + $0xcb8] sm:$0xff] }
 0x224   :  { %3731 = vmatpush1.bf16.msra.mxu0 %v8089_v47  ;;  %3817 = vmatpush1.bf16.msra.mxu1 %v8091_v48  ;;  %v495_v47 = vld [vmem:[#allocation5 + $0xc70] sm:$0xff] }
 0x225   :  { %3732 = vmatprep.subr.bf16.mxu0 %v8106_v49  ;;  %3818 = vmatprep.subr.bf16.mxu1 %v8108_v50 }
 0x228   :  { %3733 = vmatpush1.bf16.msra.mxu0 %v8105_v54  ;;  %3819 = vmatpush1.bf16.msra.mxu1 %v8107_v15  ;;  %v8185_v54 = vcombine.low %v471_v21, %v479_v24  ;;  %v8250_v21 = vcombine.high %v535_v14, %v543_v16  ;;  %v559_v24 = vld [vmem:[#allocation5 + $0xe70] sm:$0xff] }
 0x229   :  { %3734 = vmatprep.subr.bf16.mxu0 %v8122_v55  ;;  %3820 = vmatprep.subr.bf16.mxu1 %v8124_v56  ;;  %v8187_v55 = vcombine.low %v472_v26, %v480_v27  ;;  %v8202_v56 = vcombine.high %v487_v41, %v495_v47  ;;  %v552_v26 = vld [vmem:[#allocation5 + $0xe38] sm:$0xff] }
 0x22a   :  { %v560_v27 = vld [vmem:[#allocation5 + $0xe78] sm:$0xff] }
 0x22c   :  { %3735 = vmatpush1.bf16.msra.mxu0 %v8121_v62  ;;  %3821 = vmatpush1.bf16.msra.mxu1 %v8123_v0  ;;  %v512_v62 = vld [vmem:[#allocation5 + $0xcf8] sm:$0xff]  ;;  %v8201_v0 = vcombine.low %v487_v41, %v495_v47  ;;  %v583_v41 = vld [vmem:[#allocation5 + $0xf30] sm:$0xff] }
 0x22d   :  { %3736 = vmatprep.subr.bf16.mxu0 %v8138_v1  ;;  %3822 = vmatprep.subr.bf16.mxu1 %v8140_v25  ;;  %v8203_v1 = vcombine.low %v488_v51, %v496_v58  ;;  %v8218_v25 = vcombine.high %v503_v59, %v511_v60  ;;  %v8220_v2 = vcombine.high %v504_v61, %v512_v62  ;;  %v607_v51 = vld [vmem:[#allocation5 + $0xff0] sm:$0xff]  ;;  %v600_v58 = vld [vmem:[#allocation5 + $0xfb8] sm:$0xff] }
 0x230   :  { %3737 = vmatpush1.bf16.msra.mxu0 %v8137_v9  ;;  %3823 = vmatpush1.bf16.msra.mxu1 %v8139_v10  ;;  %v528_v9 = vld [vmem:[#allocation5 + $0xd78] sm:$0xff]  ;;  %v8217_v10 = vcombine.low %v503_v59, %v511_v60 }
 0x231   :  { %3738 = vmatprep.subr.bf16.mxu0 %v8154_v11  ;;  %3824 = vmatprep.subr.bf16.mxu1 %v8156_v12  ;;  %v8219_v11 = vcombine.low %v504_v61, %v512_v62  ;;  %v8234_v12 = vcombine.high %v519_v5, %v527_v7  ;;  %v8236_v13 = vcombine.high %v520_v8, %v528_v9  ;;  %v8939_v62 = vld [vmem:[#allocation7 + $0x4] ss:$16 sps:$4 sm:$0xff]  }
 0x232   :  { %v3418_v22 = vpop.f32.mrb[4].mxu0  ;;  %v3504_v29 = vpop.f32.mrb[4].mxu1 }
 0x233   :  { %v3420_v30 = vpop.f32.mrb[5].mxu0  ;;  %v3506_v31 = vpop.f32.mrb[5].mxu1  ;;  %v3861_v35 = vmax.f32 %v3418_v22, 0.0  ;;  %v3863_v42 = vmax.f32 %v3504_v29, 0.0  ;;  %v8249_v29 = vcombine.low %v535_v14, %v543_v16  ;;  %v8955_v14 = vld [vmem:[#allocation7 + $0x60] ss:$16 sps:$4 sm:$0xff]  }
 0x234   :  { %v3422_v32 = vpop.f32.mrb[6].mxu0  ;;  %3739 = vmatpush1.bf16.msra.mxu0 %v8153_v18  ;;  %v3508_v37 = vpop.f32.mrb[6].mxu1  ;;  %3825 = vmatpush1.bf16.msra.mxu1 %v8155_v19  ;;  %v3862_v43 = vmax.f32 %v3420_v30, 0.0  ;;  %v3864_v48 = vmax.f32 %v3506_v31, 0.0  ;;  %v544_v18 = vld [vmem:[#allocation5 + $0xdf8] sm:$0xff]  ;;  %v8233_v19 = vcombine.low %v519_v5, %v527_v7 }
 0x235   :  { %v3877_v36 = vmax.f32 %v3422_v32, 0.0  ;;  %v3424_v38 = vpop.f32.mrb[7].mxu0  ;;  %3740 = vmatprep.subr.bf16.mxu0 %v8170_v20  ;;  %v3879_v44 = vmax.f32 %v3508_v37, 0.0  ;;  %v3510_v46 = vpop.f32.mrb[7].mxu1  ;;  %3826 = vmatprep.subr.bf16.mxu1 %v8172_v23  ;;  %v8235_v20 = vcombine.low %v520_v8, %v528_v9  ;;  %v8252_v22 = vcombine.high %v536_v17, %v544_v18  ;;  %v551_v23 = vld [vmem:[#allocation5 + $0xe30] sm:$0xff] }
 0x236   :  { %v3878_v45 = vmax.f32 %v3424_v38, 0.0  ;;  %v3880_v50 = vmax.f32 %v3510_v46, 0.0  ;;  %v8251_v30 = vcombine.low %v536_v17, %v544_v18  ;;  %v8266_v31 = vcombine.high %v551_v23, %v559_v24  ;;  %v8948_v5 = vld [vmem:[#allocation7 + $0x2c] ss:$16 sps:$4 sm:$0xff]   ;;  %v8943_v7 = vld [vmem:[#allocation7 + $0x20] ss:$16 sps:$4 sm:$0xff]  }
 0x237   :  { %v10008_v49 = vpack.c.bf16 %v3877_v36, %v3861_v35  ;;  %v10010_v52 = vpack.c.bf16 %v3879_v44, %v3863_v42  ;;  %v8268_v32 = vcombine.high %v552_v26, %v560_v27  ;;  %v568_v35 = vld [vmem:[#allocation5 + $0xeb8] sm:$0xff]  ;;  %v8265_v37 = vcombine.low %v551_v23, %v559_v24  ;;  %v591_v42 = vld [vmem:[#allocation5 + $0xf70] sm:$0xff] }
 0x238   :  { %v10012_v53 = vpack.c.bf16 %v3878_v45, %v3862_v43  ;;  %3741 = vmatpush1.bf16.msra.mxu0 %v8169_v33  ;;  %v10014_v15 = vpack.c.bf16 %v3880_v50, %v3864_v48  ;;  %3827 = vmatpush1.bf16.msra.mxu1 %v8171_v34  ;;  %v567_v33 = vld [vmem:[#allocation5 + $0xeb0] sm:$0xff]  ;;  %v576_v36 = vld [vmem:[#allocation5 + $0xef8] sm:$0xff]  ;;  %v8267_v38 = vcombine.low %v552_v26, %v560_v27 }
 0x239   :  { %3742 = vmatprep.subr.bf16.mxu0 %v8186_v39  ;;  %3828 = vmatprep.subr.bf16.mxu1 %v8188_v40  ;;  %v575_v34 = vld [vmem:[#allocation5 + $0xef0] sm:$0xff]  ;;  %v8284_v40 = vcombine.high %v568_v35, %v576_v36  ;;  %v584_v43 = vld [vmem:[#allocation5 + $0xf38] sm:$0xff]  ;;  %v8283_v46 = vcombine.low %v568_v35, %v576_v36  ;;  %v8298_v47 = vcombine.high %v583_v41, %v591_v42 }
 0x23a   :  { %v8282_v39 = vcombine.high %v567_v33, %v575_v34  ;;  %v592_v44 = vld [vmem:[#allocation5 + $0xf78] sm:$0xff]  ;;  %v8281_v45 = vcombine.low %v567_v33, %v575_v34  ;;  %v599_v50 = vld [vmem:[#allocation5 + $0xfb0] sm:$0xff] }
 0x23b   :  { %v8300_v48 = vcombine.high %v584_v43, %v592_v44  ;;  %v8313_v60 = vcombine.low %v599_v50, %v607_v51  ;;  %v8946_v8 = vld [vmem:[#allocation7 + $0x28] ss:$16 sps:$4 sm:$0xff]   ;;  %v8951_v9 = vld [vmem:[#allocation7 + $0x44] ss:$16 sps:$4 sm:$0xff]   ;;  %v8966_v18 = vld [vmem:[#allocation7 + $0x8c] ss:$16 sps:$4 sm:$0xff]  }
 0x23c   :  { %3743 = vmatpush1.bf16.msra.mxu0 %v8185_v54  ;;  %3829 = vmatpush1.bf16.msra.mxu1 %v8187_v55  ;;  %v608_v54 = vld [vmem:[#allocation5 + $0xff8] sm:$0xff]  ;;  %v8297_v55 = vcombine.low %v583_v41, %v591_v42  ;;  %v8963_v17 = vld [vmem:[#allocation7 + $0x84] ss:$16 sps:$4 sm:$0xff]   ;;  %v8973_v27 = vld [vmem:[#allocation7 + $0xc0] ss:$16 sps:$4 sm:$0xff]  }
 0x23d   :  { %3744 = vmatprep.subr.bf16.mxu0 %v8202_v56  ;;  %3830 = vmatprep.subr.bf16.mxu1 %v8204_v57  ;;  %v8299_v56 = vcombine.low %v584_v43, %v592_v44  ;;  %v8314_v57 = vcombine.high %v599_v50, %v607_v51  ;;  %v8316_v59 = vcombine.high %v600_v58, %v608_v54  ;;  %v8958_v16 = vld [vmem:[#allocation7 + $0x68] ss:$16 sps:$4 sm:$0xff]   ;;  %v8975_v24 = vld [vmem:[#allocation7 + $0xc4] ss:$16 sps:$4 sm:$0xff]   ;;  %v8978_v26 = vld [vmem:[#allocation7 + $0xcc] ss:$16 sps:$4 sm:$0xff]  }
 0x23e   :  { %v8315_v61 = vcombine.low %v600_v58, %v608_v54  ;;  %v8970_v23 = vld [vmem:[#allocation7 + $0xa8] ss:$16 sps:$4 sm:$0xff]   ;;  %v8987_v34 = vld [vmem:[#allocation7 + $0x104] ss:$16 sps:$4 sm:$0xff]   ;;  %v8990_v35 = vld [vmem:[#allocation7 + $0x10c] ss:$16 sps:$4 sm:$0xff]  }
 0x23f   :  { %v8982_v33 = vld [vmem:[#allocation7 + $0xe8] ss:$16 sps:$4 sm:$0xff]   ;;  %v8985_v36 = vld [vmem:[#allocation7 + $0x100] ss:$16 sps:$4 sm:$0xff]   ;;  %v8999_v42 = vld [vmem:[#allocation7 + $0x144] ss:$16 sps:$4 sm:$0xff]  }
 0x240   :  { %3745 = vmatpush1.bf16.msra.mxu0 %v8201_v0  ;;  %3831 = vmatpush1.bf16.msra.mxu1 %v8203_v1  ;;  %v8942_v0 = vld [vmem:[#allocation7 + $0xc] ss:$16 sps:$4 sm:$0xff]   ;;  %v8937_v1 = vld [vmem:[#allocation7] ss:$16 sps:$4 sm:$0xff]   ;;  %v8994_v41 = vld [vmem:[#allocation7 + $0x128] ss:$16 sps:$4 sm:$0xff]  }
 0x241   :  { %3746 = vmatprep.subr.bf16.mxu0 %v8218_v25  ;;  %3832 = vmatprep.subr.bf16.mxu1 %v8220_v2  ;;  %v8940_v25 = vld [vmem:[#allocation7 + $0x8] ss:$16 sps:$4 sm:$0xff]   ;;  %v8945_v2 = vld [vmem:[#allocation7 + $0x24] ss:$16 sps:$4 sm:$0xff]   ;;  %v9002_v43 = vld [vmem:[#allocation7 + $0x14c] ss:$16 sps:$4 sm:$0xff]  }
 0x242   :  { %v8997_v44 = vld [vmem:[#allocation7 + $0x140] ss:$16 sps:$4 sm:$0xff]   ;;  %v9006_v50 = vld [vmem:[#allocation7 + $0x168] ss:$16 sps:$4 sm:$0xff]   ;;  %v9011_v51 = vld [vmem:[#allocation7 + $0x184] ss:$16 sps:$4 sm:$0xff]  }
 0x243   :  { %v9014_v58 = vld [vmem:[#allocation7 + $0x18c] ss:$16 sps:$4 sm:$0xff]   ;;  %v9009_v54 = vld [vmem:[#allocation7 + $0x180] ss:$16 sps:$4 sm:$0xff]  }
 0x244   :  { %3747 = vmatpush1.bf16.msra.mxu0 %v8217_v10  ;;  %3833 = vmatpush1.bf16.msra.mxu1 %v8219_v11  ;;  %v8954_v10 = vld [vmem:[#allocation7 + $0x4c] ss:$16 sps:$4 sm:$0xff]   ;;  %v8949_v11 = vld [vmem:[#allocation7 + $0x40] ss:$16 sps:$4 sm:$0xff]  }
 0x245   :  { %3748 = vmatprep.subr.bf16.mxu0 %v8234_v12  ;;  %3834 = vmatprep.subr.bf16.mxu1 %v8236_v13  ;;  %v8952_v12 = vld [vmem:[#allocation7 + $0x48] ss:$16 sps:$4 sm:$0xff]   ;;  %v8957_v13 = vld [vmem:[#allocation7 + $0x64] ss:$16 sps:$4 sm:$0xff]  }
 0x248   :  { %3749 = vmatpush1.bf16.msra.mxu0 %v8233_v19  ;;  %3835 = vmatpush1.bf16.msra.mxu1 %v8235_v20  ;;  %v8964_v19 = vld [vmem:[#allocation7 + $0x88] ss:$16 sps:$4 sm:$0xff]   ;;  %v8969_v20 = vld [vmem:[#allocation7 + $0xa4] ss:$16 sps:$4 sm:$0xff]  }
 0x249   :  { %3750 = vmatprep.subr.bf16.mxu0 %v8250_v21  ;;  %3836 = vmatprep.subr.bf16.mxu1 %v8252_v22  ;;  %v8972_v21 = vld [vmem:[#allocation7 + $0xac] ss:$16 sps:$4 sm:$0xff]   ;;  %v8967_v22 = vld [vmem:[#allocation7 + $0xa0] ss:$16 sps:$4 sm:$0xff]  }
 0x24c   :  { %3751 = vmatpush1.bf16.msra.mxu0 %v8249_v29  ;;  %3837 = vmatpush1.bf16.msra.mxu1 %v8251_v30  ;;  %v8976_v29 = vld [vmem:[#allocation7 + $0xc8] ss:$16 sps:$4 sm:$0xff]   ;;  %v8981_v30 = vld [vmem:[#allocation7 + $0xe4] ss:$16 sps:$4 sm:$0xff]  }
 0x24d   :  { %3752 = vmatprep.subr.bf16.mxu0 %v8266_v31  ;;  %3838 = vmatprep.subr.bf16.mxu1 %v8268_v32  ;;  %v8984_v31 = vld [vmem:[#allocation7 + $0xec] ss:$16 sps:$4 sm:$0xff]   ;;  %v8979_v32 = vld [vmem:[#allocation7 + $0xe0] ss:$16 sps:$4 sm:$0xff]  }
 0x250   :  { %3753 = vmatpush1.bf16.msra.mxu0 %v8265_v37  ;;  %3839 = vmatpush1.bf16.msra.mxu1 %v8267_v38  ;;  %v8988_v37 = vld [vmem:[#allocation7 + $0x108] ss:$16 sps:$4 sm:$0xff]   ;;  %v8993_v38 = vld [vmem:[#allocation7 + $0x124] ss:$16 sps:$4 sm:$0xff]  }
 0x251   :  { %3754 = vmatprep.subr.bf16.mxu0 %v8282_v39  ;;  %3840 = vmatprep.subr.bf16.mxu1 %v8284_v40  ;;  %v8996_v39 = vld [vmem:[#allocation7 + $0x12c] ss:$16 sps:$4 sm:$0xff]   ;;  %v8991_v40 = vld [vmem:[#allocation7 + $0x120] ss:$16 sps:$4 sm:$0xff]  }
 0x254   :  { %3755 = vmatpush1.bf16.msra.mxu0 %v8281_v45  ;;  %3841 = vmatpush1.bf16.msra.mxu1 %v8283_v46  ;;  %v9000_v45 = vld [vmem:[#allocation7 + $0x148] ss:$16 sps:$4 sm:$0xff]   ;;  %v9005_v46 = vld [vmem:[#allocation7 + $0x164] ss:$16 sps:$4 sm:$0xff]  }
 0x255   :  { %3756 = vmatprep.subr.bf16.mxu0 %v8298_v47  ;;  %3842 = vmatprep.subr.bf16.mxu1 %v8300_v48  ;;  %v9008_v47 = vld [vmem:[#allocation7 + $0x16c] ss:$16 sps:$4 sm:$0xff]   ;;  %v9003_v48 = vld [vmem:[#allocation7 + $0x160] ss:$16 sps:$4 sm:$0xff]  }
 0x258   :  { %3757 = vmatpush1.bf16.msra.mxu0 %v8297_v55  ;;  %3843 = vmatpush1.bf16.msra.mxu1 %v8299_v56  ;;  %v9012_v55 = vld [vmem:[#allocation7 + $0x188] ss:$16 sps:$4 sm:$0xff]   ;;  %v9017_v56 = vld [vmem:[#allocation7 + $0x1a4] ss:$16 sps:$4 sm:$0xff]  }
 0x259   :  { %3758 = vmatprep.subr.bf16.mxu0 %v8314_v57  ;;  %3844 = vmatprep.subr.bf16.mxu1 %v8316_v59  ;;  %v9020_v57 = vld [vmem:[#allocation7 + $0x1ac] ss:$16 sps:$4 sm:$0xff]   ;;  %v9015_v59 = vld [vmem:[#allocation7 + $0x1a0] ss:$16 sps:$4 sm:$0xff]  }
 0x25c   :  { %3759 = vmatpush1.bf16.msra.mxu0 %v8313_v60  ;;  %3845 = vmatpush1.bf16.msra.mxu1 %v8315_v61  ;;  %v9018_v60 = vld [vmem:[#allocation7 + $0x1a8] ss:$16 sps:$4 sm:$0xff]   ;;  %v9023_v61 = vld [vmem:[#allocation7 + $0x1c4] ss:$16 sps:$4 sm:$0xff]  }
 0x25d   :  { %6977 = vmatprep.subr.bf16.mxu0 %v8939_v62  ;;  %7321 = vmatprep.subr.bf16.mxu1 %v8942_v0  ;;  %v9026_v62 = vld [vmem:[#allocation7 + $0x1cc] ss:$16 sps:$4 sm:$0xff]   ;;  %v9021_v0 = vld [vmem:[#allocation7 + $0x1c0] ss:$16 sps:$4 sm:$0xff]  }
 0x25f   :  { %3761 = vmatmul.mubr.bf16.vlgmr.msra.gmra.mrb[12].mxu0 %v9974_v28  ;;  %3847 = vmatmul.mubr.bf16.vlgmr.msra.gmra.mrb[12].mxu1 %v9974_v28  ;;  %v8960_v28 = vld [vmem:[#allocation7 + $0x6c] ss:$16 sps:$4 sm:$0xff]  }
 0x260   :  { %6978 = vmatpush1.bf16.msra.mxu0 %v8937_v1  ;;  %7009 = vmatprep.mubr.bf16.mxu0 %v9996_v4  ;;  %v9024_v1 = vld [vmem:[#allocation7 + $0x1c8] ss:$16 sps:$4 sm:$0xff]  }
 0x261   :  { %7322 = vmatpush1.bf16.msra.mxu1 %v8940_v25  ;;  %7353 = vmatprep.mubr.bf16.mxu1 %v9996_v4  ;;  %v8961_v4 = vld [vmem:[#allocation7 + $0x80] ss:$16 sps:$4 sm:$0xff]   ;;  %v9029_v25 = vld [vmem:[#allocation7 + $0x1e4] ss:$16 sps:$4 sm:$0xff]  }
 0x262   :  { %6979 = vmatprep.subr.bf16.mxu0 %v8945_v2  ;;  %7323 = vmatprep.subr.bf16.mxu1 %v8948_v5  ;;  %v9032_v2 = vld [vmem:[#allocation7 + $0x1ec] ss:$16 sps:$4 sm:$0xff]   ;;  %v9027_v5 = vld [vmem:[#allocation7 + $0x1e0] ss:$16 sps:$4 sm:$0xff]  }
 0x264   :  { %6980 = vmatpush1.bf16.msra.mxu0 %v8943_v7  ;;  %v9030_v7 = vld [vmem:[#allocation7 + $0x1e8] ss:$16 sps:$4 sm:$0xff]  }
 0x265   :  { %7324 = vmatpush1.bf16.msra.mxu1 %v8946_v8  ;;  %6981 = vmatprep.subr.bf16.mxu0 %v8951_v9  ;;  %v9035_v8 = vld [vmem:[#allocation7 + $0x204] ss:$16 sps:$4 sm:$0xff]   ;;  %v9038_v9 = vld [vmem:[#allocation7 + $0x20c] ss:$16 sps:$4 sm:$0xff]  }
 0x266   :  { %7325 = vmatprep.subr.bf16.mxu1 %v8954_v10  ;;  %v9033_v10 = vld [vmem:[#allocation7 + $0x200] ss:$16 sps:$4 sm:$0xff]  }
 0x268   :  { %6982 = vmatpush1.bf16.msra.mxu0 %v8949_v11  ;;  %v9036_v11 = vld [vmem:[#allocation7 + $0x208] ss:$16 sps:$4 sm:$0xff]  }
 0x269   :  { %7326 = vmatpush1.bf16.msra.mxu1 %v8952_v12  ;;  %6983 = vmatprep.subr.bf16.mxu0 %v8957_v13  ;;  %v9041_v12 = vld [vmem:[#allocation7 + $0x224] ss:$16 sps:$4 sm:$0xff]   ;;  %v9044_v13 = vld [vmem:[#allocation7 + $0x22c] ss:$16 sps:$4 sm:$0xff]  }
 0x26a   :  { %7327 = vmatprep.subr.bf16.mxu1 %v8960_v28  ;;  %v9039_v28 = vld [vmem:[#allocation7 + $0x220] ss:$16 sps:$4 sm:$0xff]  }
 0x26c   :  { %6984 = vmatpush1.bf16.msra.mxu0 %v8955_v14  ;;  %v9042_v14 = vld [vmem:[#allocation7 + $0x228] ss:$16 sps:$4 sm:$0xff]  }
 0x26d   :  { %7328 = vmatpush1.bf16.msra.mxu1 %v8958_v16  ;;  %6985 = vmatprep.subr.bf16.mxu0 %v8963_v17  ;;  %v9047_v16 = vld [vmem:[#allocation7 + $0x244] ss:$16 sps:$4 sm:$0xff]   ;;  %v9050_v17 = vld [vmem:[#allocation7 + $0x24c] ss:$16 sps:$4 sm:$0xff]  }
 0x26e   :  { %7329 = vmatprep.subr.bf16.mxu1 %v8966_v18  ;;  %v9045_v18 = vld [vmem:[#allocation7 + $0x240] ss:$16 sps:$4 sm:$0xff]  }
 0x270   :  { %6986 = vmatpush1.bf16.msra.mxu0 %v8961_v4  ;;  %v9048_v4 = vld [vmem:[#allocation7 + $0x248] ss:$16 sps:$4 sm:$0xff]  }
 0x271   :  { %7330 = vmatpush1.bf16.msra.mxu1 %v8964_v19  ;;  %6987 = vmatprep.subr.bf16.mxu0 %v8969_v20  ;;  %v9053_v19 = vld [vmem:[#allocation7 + $0x264] ss:$16 sps:$4 sm:$0xff]   ;;  %v9051_v20 = vld [vmem:[#allocation7 + $0x260] ss:$16 sps:$4 sm:$0xff]  }
 0x272   :  { %7331 = vmatprep.subr.bf16.mxu1 %v8972_v21  ;;  %v9054_v21 = vld [vmem:[#allocation7 + $0x268] ss:$16 sps:$4 sm:$0xff]  }
 0x274   :  { %6988 = vmatpush1.bf16.msra.mxu0 %v8967_v22  ;;  %v9059_v22 = vld [vmem:[#allocation7 + $0x284] ss:$16 sps:$4 sm:$0xff]  }
 0x275   :  { %7332 = vmatpush1.bf16.msra.mxu1 %v8970_v23  ;;  %6989 = vmatprep.subr.bf16.mxu0 %v8975_v24  ;;  %v9062_v23 = vld [vmem:[#allocation7 + $0x28c] ss:$16 sps:$4 sm:$0xff]   ;;  %v9060_v24 = vld [vmem:[#allocation7 + $0x288] ss:$16 sps:$4 sm:$0xff]  }
 0x276   :  { %7333 = vmatprep.subr.bf16.mxu1 %v8978_v26  ;;  %v9065_v26 = vld [vmem:[#allocation7 + $0x2a4] ss:$16 sps:$4 sm:$0xff]  }
 0x278   :  { %6990 = vmatpush1.bf16.msra.mxu0 %v8973_v27  ;;  %v9068_v27 = vld [vmem:[#allocation7 + $0x2ac] ss:$16 sps:$4 sm:$0xff]  }
 0x279   :  { %7334 = vmatpush1.bf16.msra.mxu1 %v8976_v29  ;;  %6991 = vmatprep.subr.bf16.mxu0 %v8981_v30  ;;  %v9063_v29 = vld [vmem:[#allocation7 + $0x2a0] ss:$16 sps:$4 sm:$0xff]   ;;  %v9066_v30 = vld [vmem:[#allocation7 + $0x2a8] ss:$16 sps:$4 sm:$0xff]  }
 0x27a   :  { %7335 = vmatprep.subr.bf16.mxu1 %v8984_v31  ;;  %v9071_v31 = vld [vmem:[#allocation7 + $0x2c4] ss:$16 sps:$4 sm:$0xff]  }
 0x27c   :  { %6992 = vmatpush1.bf16.msra.mxu0 %v8979_v32 }
 0x27d   :  { %7336 = vmatpush1.bf16.msra.mxu1 %v8982_v33  ;;  %6993 = vmatprep.subr.bf16.mxu0 %v8987_v34  ;;  %v9074_v33 = vld [vmem:[#allocation7 + $0x2cc] ss:$16 sps:$4 sm:$0xff]  }
 0x27e   :  { %7337 = vmatprep.subr.bf16.mxu1 %v8990_v35 }
 0x280   :  { %6994 = vmatpush1.bf16.msra.mxu0 %v8985_v36  ;;  %v9069_v36 = vld [vmem:[#allocation7 + $0x2c0] ss:$16 sps:$4 sm:$0xff]  }
 0x281   :  { %7338 = vmatpush1.bf16.msra.mxu1 %v8988_v37  ;;  %6995 = vmatprep.subr.bf16.mxu0 %v8993_v38 }
 0x282   :  { %7339 = vmatprep.subr.bf16.mxu1 %v8996_v39  ;;  %v9072_v39 = vld [vmem:[#allocation7 + $0x2c8] ss:$16 sps:$4 sm:$0xff]  }
 0x284   :  { %6996 = vmatpush1.bf16.msra.mxu0 %v8991_v40  ;;  %v9077_v40 = vld [vmem:[#allocation7 + $0x2e4] ss:$16 sps:$4 sm:$0xff]  }
 0x285   :  { %7340 = vmatpush1.bf16.msra.mxu1 %v8994_v41  ;;  %6997 = vmatprep.subr.bf16.mxu0 %v8999_v42 }
 0x286   :  { %7341 = vmatprep.subr.bf16.mxu1 %v9002_v43 }
 0x288   :  { %6998 = vmatpush1.bf16.msra.mxu0 %v8997_v44 }
 0x289   :  { %7342 = vmatpush1.bf16.msra.mxu1 %v9000_v45  ;;  %6999 = vmatprep.subr.bf16.mxu0 %v9005_v46  ;;  %v9080_v45 = vld [vmem:[#allocation7 + $0x2ec] ss:$16 sps:$4 sm:$0xff]  }
 0x28a   :  { %7343 = vmatprep.subr.bf16.mxu1 %v9008_v47 }
 0x28c   :  { %7000 = vmatpush1.bf16.msra.mxu0 %v9003_v48 }
 0x28d   :  { %7344 = vmatpush1.bf16.msra.mxu1 %v9006_v50  ;;  %7001 = vmatprep.subr.bf16.mxu0 %v9011_v51 }
 0x28e   :  { %7345 = vmatprep.subr.bf16.mxu1 %v9014_v58 }
 0x290   :  { %7002 = vmatpush1.bf16.msra.mxu0 %v9009_v54 }
 0x291   :  { %7346 = vmatpush1.bf16.msra.mxu1 %v9012_v55  ;;  %7003 = vmatprep.subr.bf16.mxu0 %v9017_v56 }
 0x292   :  { %7347 = vmatprep.subr.bf16.mxu1 %v9020_v57 }
 0x294   :  { %7004 = vmatpush1.bf16.msra.mxu0 %v9015_v59  ;;  %v9075_v59 = vld [vmem:[#allocation7 + $0x2e0] ss:$16 sps:$4 sm:$0xff]  }
 0x295   :  { %7348 = vmatpush1.bf16.msra.mxu1 %v9018_v60  ;;  %7005 = vmatprep.subr.bf16.mxu0 %v9023_v61  ;;  %v9078_v61 = vld [vmem:[#allocation7 + $0x2e8] ss:$16 sps:$4 sm:$0xff]  }
 0x296   :  { %7349 = vmatprep.subr.bf16.mxu1 %v9026_v62  ;;  %v9083_v62 = vld [vmem:[#allocation7 + $0x304] ss:$16 sps:$4 sm:$0xff]  }
 0x298   :  { %7006 = vmatpush1.bf16.msra.mxu0 %v9021_v0  ;;  %v9086_v0 = vld [vmem:[#allocation7 + $0x30c] ss:$16 sps:$4 sm:$0xff]  }
 0x299   :  { %7350 = vmatpush1.bf16.msra.mxu1 %v9024_v1  ;;  %7007 = vmatprep.subr.bf16.mxu0 %v9029_v25  ;;  %v9081_v1 = vld [vmem:[#allocation7 + $0x300] ss:$16 sps:$4 sm:$0xff]   ;;  %v9084_v25 = vld [vmem:[#allocation7 + $0x308] ss:$16 sps:$4 sm:$0xff]  }
 0x29a   :  { %7351 = vmatprep.subr.bf16.mxu1 %v9032_v2  ;;  %v9089_v2 = vld [vmem:[#allocation7 + $0x324] ss:$16 sps:$4 sm:$0xff]  }
 0x29c   :  { %7008 = vmatpush1.bf16.msra.mxu0 %v9027_v5  ;;  %v9092_v5 = vld [vmem:[#allocation7 + $0x32c] ss:$16 sps:$4 sm:$0xff]  }
 0x29d   :  { %7352 = vmatpush1.bf16.msra.mxu1 %v9030_v7  ;;  %7020 = vmatprep.subr.bf16.mxu0 %v9035_v8  ;;  %v9087_v7 = vld [vmem:[#allocation7 + $0x320] ss:$16 sps:$4 sm:$0xff]   ;;  %v9090_v8 = vld [vmem:[#allocation7 + $0x328] ss:$16 sps:$4 sm:$0xff]  }
 0x29e   :  { %7364 = vmatprep.subr.bf16.mxu1 %v9038_v9  ;;  %v9095_v9 = vld [vmem:[#allocation7 + $0x344] ss:$16 sps:$4 sm:$0xff]  }
 0x29f   :  { %7010 = vmatmul.mubr.bf16.vlgmr.msra.gmra.mrb[16].mxu0 %v9992_v63 }
 0x2a0   :  { %7354 = vmatmul.mubr.bf16.vlgmr.msra.gmra.mrb[16].mxu1 %v9992_v63  ;;  %7021 = vmatpush1.bf16.msra.mxu0 %v9033_v10  ;;  %v9056_v63 = vld [vmem:[#allocation7 + $0x26c] ss:$16 sps:$4 sm:$0xff]  }
 0x2a1   :  { %7052 = vmatprep.mubr.bf16.mxu0 %v9998_v6  ;;  %7365 = vmatpush1.bf16.msra.mxu1 %v9036_v11  ;;  %v9098_v10 = vld [vmem:[#allocation7 + $0x34c] ss:$16 sps:$4 sm:$0xff]   ;;  %v9093_v11 = vld [vmem:[#allocation7 + $0x340] ss:$16 sps:$4 sm:$0xff]  }
 0x2a2   :  { %7396 = vmatprep.mubr.bf16.mxu1 %v9998_v6  ;;  %7022 = vmatprep.subr.bf16.mxu0 %v9041_v12  ;;  %v9057_v6 = vld [vmem:[#allocation7 + $0x280] ss:$16 sps:$4 sm:$0xff]   ;;  %v9096_v12 = vld [vmem:[#allocation7 + $0x348] ss:$16 sps:$4 sm:$0xff]  }
 0x2a3   :  { %7366 = vmatprep.subr.bf16.mxu1 %v9044_v13  ;;  %v9101_v13 = vld [vmem:[#allocation7 + $0x364] ss:$16 sps:$4 sm:$0xff]  }
 0x2a4   :  { %7023 = vmatpush1.bf16.msra.mxu0 %v9039_v28  ;;  %v9104_v28 = vld [vmem:[#allocation7 + $0x36c] ss:$16 sps:$4 sm:$0xff]  }
 0x2a5   :  { %7367 = vmatpush1.bf16.msra.mxu1 %v9042_v14  ;;  %7024 = vmatprep.subr.bf16.mxu0 %v9047_v16  ;;  %v9099_v14 = vld [vmem:[#allocation7 + $0x360] ss:$16 sps:$4 sm:$0xff]   ;;  %v9102_v16 = vld [vmem:[#allocation7 + $0x368] ss:$16 sps:$4 sm:$0xff]  }
 0x2a6   :  { %7368 = vmatprep.subr.bf16.mxu1 %v9050_v17  ;;  %v9107_v17 = vld [vmem:[#allocation7 + $0x384] ss:$16 sps:$4 sm:$0xff]  }
 0x2a8   :  { %7025 = vmatpush1.bf16.msra.mxu0 %v9045_v18  ;;  %v9110_v18 = vld [vmem:[#allocation7 + $0x38c] ss:$16 sps:$4 sm:$0xff]  }
 0x2a9   :  { %7369 = vmatpush1.bf16.msra.mxu1 %v9048_v4  ;;  %7026 = vmatprep.subr.bf16.mxu0 %v9053_v19  ;;  %v9105_v4 = vld [vmem:[#allocation7 + $0x380] ss:$16 sps:$4 sm:$0xff]   ;;  %v9108_v19 = vld [vmem:[#allocation7 + $0x388] ss:$16 sps:$4 sm:$0xff]  }
 0x2aa   :  { %7370 = vmatprep.subr.bf16.mxu1 %v9056_v63  ;;  %v9113_v63 = vld [vmem:[#allocation7 + $0x3a4] ss:$16 sps:$4 sm:$0xff]  }
 0x2ac   :  { %7027 = vmatpush1.bf16.msra.mxu0 %v9051_v20  ;;  %v9116_v20 = vld [vmem:[#allocation7 + $0x3ac] ss:$16 sps:$4 sm:$0xff]  }
 0x2ad   :  { %7371 = vmatpush1.bf16.msra.mxu1 %v9054_v21  ;;  %7028 = vmatprep.subr.bf16.mxu0 %v9059_v22  ;;  %v9111_v21 = vld [vmem:[#allocation7 + $0x3a0] ss:$16 sps:$4 sm:$0xff]   ;;  %v9114_v22 = vld [vmem:[#allocation7 + $0x3a8] ss:$16 sps:$4 sm:$0xff]  }
 0x2ae   :  { %7372 = vmatprep.subr.bf16.mxu1 %v9062_v23  ;;  %v9119_v23 = vld [vmem:[#allocation7 + $0x3c4] ss:$16 sps:$4 sm:$0xff]  }
 0x2b0   :  { %7029 = vmatpush1.bf16.msra.mxu0 %v9057_v6  ;;  %v9122_v6 = vld [vmem:[#allocation7 + $0x3cc] ss:$16 sps:$4 sm:$0xff]  }
 0x2b1   :  { %7373 = vmatpush1.bf16.msra.mxu1 %v9060_v24  ;;  %7030 = vmatprep.subr.bf16.mxu0 %v9065_v26  ;;  %v9117_v24 = vld [vmem:[#allocation7 + $0x3c0] ss:$16 sps:$4 sm:$0xff]   ;;  %v9120_v26 = vld [vmem:[#allocation7 + $0x3c8] ss:$16 sps:$4 sm:$0xff]  }
 0x2b2   :  { %v3590_v32 = vpop.f32.mrb[8].mxu0  ;;  %7374 = vmatprep.subr.bf16.mxu1 %v9068_v27  ;;  %v3676_v34 = vpop.f32.mrb[8].mxu1  ;;  %v9125_v27 = vld [vmem:[#allocation7 + $0x3e4] ss:$16 sps:$4 sm:$0xff]  }
 0x2b3   :  { %v3592_v35 = vpop.f32.mrb[9].mxu0  ;;  %v3678_v37 = vpop.f32.mrb[9].mxu1  ;;  %v3865_v41 = vmax.f32 %v3590_v32, 0.0  ;;  %v3867_v46 = vmax.f32 %v3676_v34, 0.0  ;;  %v9131_v32 = vld [vmem:[#allocation7 + $0x404] ss:$16 sps:$4 sm:$0xff]  }
 0x2b4   :  { %v3594_v38 = vpop.f32.mrb[10].mxu0  ;;  %7031 = vmatpush1.bf16.msra.mxu0 %v9063_v29  ;;  %v3680_v43 = vpop.f32.mrb[10].mxu1  ;;  %v3866_v47 = vmax.f32 %v3592_v35, 0.0  ;;  %v3868_v58 = vmax.f32 %v3678_v37, 0.0  ;;  %v9128_v29 = vld [vmem:[#allocation7 + $0x3ec] ss:$16 sps:$4 sm:$0xff]  }
 0x2b5   :  { %v3881_v42 = vmax.f32 %v3594_v38, 0.0  ;;  %7375 = vmatpush1.bf16.msra.mxu1 %v9066_v30  ;;  %v3596_v44 = vpop.f32.mrb[11].mxu0  ;;  %7032 = vmatprep.subr.bf16.mxu0 %v9071_v31  ;;  %v3883_v48 = vmax.f32 %v3680_v43, 0.0  ;;  %v3682_v51 = vpop.f32.mrb[11].mxu1  ;;  %v9123_v30 = vld [vmem:[#allocation7 + $0x3e0] ss:$16 sps:$4 sm:$0xff]  }
 0x2b6   :  { %v3882_v50 = vmax.f32 %v3596_v44, 0.0  ;;  %7376 = vmatprep.subr.bf16.mxu1 %v9074_v33  ;;  %v3884_v55 = vmax.f32 %v3682_v51, 0.0  ;;  %v9126_v31 = vld [vmem:[#allocation7 + $0x3e8] ss:$16 sps:$4 sm:$0xff]   ;;  %v9134_v33 = vld [vmem:[#allocation7 + $0x40c] ss:$16 sps:$4 sm:$0xff]  }
 0x2b7   :  { %v10024_v54 = vpack.c.bf16 %v3881_v42, %v3865_v41  ;;  %v10026_v56 = vpack.c.bf16 %v3883_v48, %v3867_v46  ;;  %v9129_v34 = vld [vmem:[#allocation7 + $0x400] ss:$16 sps:$4 sm:$0xff]   ;;  %v9132_v35 = vld [vmem:[#allocation7 + $0x408] ss:$16 sps:$4 sm:$0xff]   ;;  %v9140_v37 = vld [vmem:[#allocation7 + $0x42c] ss:$16 sps:$4 sm:$0xff]  }
 0x2b8   :  { %v10028_v57 = vpack.c.bf16 %v3882_v50, %v3866_v47  ;;  %7033 = vmatpush1.bf16.msra.mxu0 %v9069_v36  ;;  %v10030_v60 = vpack.c.bf16 %v3884_v55, %v3868_v58  ;;  %v9137_v36 = vld [vmem:[#allocation7 + $0x424] ss:$16 sps:$4 sm:$0xff]   ;;  %v9135_v38 = vld [vmem:[#allocation7 + $0x420] ss:$16 sps:$4 sm:$0xff]   ;;  %v9146_v41 = vld [vmem:[#allocation7 + $0x44c] ss:$16 sps:$4 sm:$0xff]  }
 0x2b9   :  { %7377 = vmatpush1.bf16.msra.mxu1 %v9072_v39  ;;  %7034 = vmatprep.subr.bf16.mxu0 %v9077_v40  ;;  %v9138_v39 = vld [vmem:[#allocation7 + $0x428] ss:$16 sps:$4 sm:$0xff]   ;;  %v9143_v40 = vld [vmem:[#allocation7 + $0x444] ss:$16 sps:$4 sm:$0xff]   ;;  %v9141_v42 = vld [vmem:[#allocation7 + $0x440] ss:$16 sps:$4 sm:$0xff]  }
 0x2ba   :  { %7378 = vmatprep.subr.bf16.mxu1 %v9080_v45  ;;  %v9144_v43 = vld [vmem:[#allocation7 + $0x448] ss:$16 sps:$4 sm:$0xff]   ;;  %v9149_v44 = vld [vmem:[#allocation7 + $0x464] ss:$16 sps:$4 sm:$0xff]   ;;  %v9147_v45 = vld [vmem:[#allocation7 + $0x460] ss:$16 sps:$4 sm:$0xff]  }
 0x2bb   :  { %v9150_v46 = vld [vmem:[#allocation7 + $0x468] ss:$16 sps:$4 sm:$0xff]   ;;  %v9155_v47 = vld [vmem:[#allocation7 + $0x484] ss:$16 sps:$4 sm:$0xff]   ;;  %v9158_v48 = vld [vmem:[#allocation7 + $0x48c] ss:$16 sps:$4 sm:$0xff]  }
 0x2bc   :  { %7035 = vmatpush1.bf16.msra.mxu0 %v9075_v59  ;;  %v9156_v50 = vld [vmem:[#allocation7 + $0x488] ss:$16 sps:$4 sm:$0xff]   ;;  %v9161_v51 = vld [vmem:[#allocation7 + $0x4a4] ss:$16 sps:$4 sm:$0xff]   ;;  %v9164_v58 = vld [vmem:[#allocation7 + $0x4ac] ss:$16 sps:$4 sm:$0xff]  }
 0x2bd   :  { %7379 = vmatpush1.bf16.msra.mxu1 %v9078_v61  ;;  %7036 = vmatprep.subr.bf16.mxu0 %v9083_v62  ;;  %v9159_v55 = vld [vmem:[#allocation7 + $0x4a0] ss:$16 sps:$4 sm:$0xff]   ;;  %v9162_v59 = vld [vmem:[#allocation7 + $0x4a8] ss:$16 sps:$4 sm:$0xff]   ;;  %v9167_v61 = vld [vmem:[#allocation7 + $0x4c4] ss:$16 sps:$4 sm:$0xff]  }
 0x2be   :  { %7380 = vmatprep.subr.bf16.mxu1 %v9086_v0  ;;  %v9170_v62 = vld [vmem:[#allocation7 + $0x4cc] ss:$16 sps:$4 sm:$0xff]   ;;  %v9165_v0 = vld [vmem:[#allocation7 + $0x4c0] ss:$16 sps:$4 sm:$0xff]  }
 0x2c0   :  { %7037 = vmatpush1.bf16.msra.mxu0 %v9081_v1  ;;  %v9168_v1 = vld [vmem:[#allocation7 + $0x4c8] ss:$16 sps:$4 sm:$0xff]  }
 0x2c1   :  { %7381 = vmatpush1.bf16.msra.mxu1 %v9084_v25  ;;  %7038 = vmatprep.subr.bf16.mxu0 %v9089_v2  ;;  %v9173_v25 = vld [vmem:[#allocation7 + $0x4e4] ss:$16 sps:$4 sm:$0xff]   ;;  %v9176_v2 = vld [vmem:[#allocation7 + $0x4ec] ss:$16 sps:$4 sm:$0xff]  }
 0x2c2   :  { %7382 = vmatprep.subr.bf16.mxu1 %v9092_v5  ;;  %v9171_v5 = vld [vmem:[#allocation7 + $0x4e0] ss:$16 sps:$4 sm:$0xff]  }
 0x2c4   :  { %7039 = vmatpush1.bf16.msra.mxu0 %v9087_v7  ;;  %v9174_v7 = vld [vmem:[#allocation7 + $0x4e8] ss:$16 sps:$4 sm:$0xff]  }
 0x2c5   :  { %7383 = vmatpush1.bf16.msra.mxu1 %v9090_v8  ;;  %7040 = vmatprep.subr.bf16.mxu0 %v9095_v9  ;;  %v9179_v8 = vld [vmem:[#allocation7 + $0x504] ss:$16 sps:$4 sm:$0xff]   ;;  %v9182_v9 = vld [vmem:[#allocation7 + $0x50c] ss:$16 sps:$4 sm:$0xff]  }
 0x2c6   :  { %7384 = vmatprep.subr.bf16.mxu1 %v9098_v10  ;;  %v9177_v10 = vld [vmem:[#allocation7 + $0x500] ss:$16 sps:$4 sm:$0xff]  }
 0x2c8   :  { %7041 = vmatpush1.bf16.msra.mxu0 %v9093_v11  ;;  %v9180_v11 = vld [vmem:[#allocation7 + $0x508] ss:$16 sps:$4 sm:$0xff]  }
 0x2c9   :  { %7385 = vmatpush1.bf16.msra.mxu1 %v9096_v12  ;;  %7042 = vmatprep.subr.bf16.mxu0 %v9101_v13  ;;  %v9185_v12 = vld [vmem:[#allocation7 + $0x524] ss:$16 sps:$4 sm:$0xff]   ;;  %v9188_v13 = vld [vmem:[#allocation7 + $0x52c] ss:$16 sps:$4 sm:$0xff]  }
 0x2ca   :  { %7386 = vmatprep.subr.bf16.mxu1 %v9104_v28  ;;  %v9183_v28 = vld [vmem:[#allocation7 + $0x520] ss:$16 sps:$4 sm:$0xff]  }
 0x2cc   :  { %7043 = vmatpush1.bf16.msra.mxu0 %v9099_v14  ;;  %v9186_v14 = vld [vmem:[#allocation7 + $0x528] ss:$16 sps:$4 sm:$0xff]  }
 0x2cd   :  { %7387 = vmatpush1.bf16.msra.mxu1 %v9102_v16  ;;  %7044 = vmatprep.subr.bf16.mxu0 %v9107_v17  ;;  %v9191_v16 = vld [vmem:[#allocation7 + $0x544] ss:$16 sps:$4 sm:$0xff]   ;;  %v9194_v17 = vld [vmem:[#allocation7 + $0x54c] ss:$16 sps:$4 sm:$0xff]  }
 0x2ce   :  { %7388 = vmatprep.subr.bf16.mxu1 %v9110_v18  ;;  %v9189_v18 = vld [vmem:[#allocation7 + $0x540] ss:$16 sps:$4 sm:$0xff]  }
 0x2d0   :  { %7045 = vmatpush1.bf16.msra.mxu0 %v9105_v4  ;;  %v9192_v4 = vld [vmem:[#allocation7 + $0x548] ss:$16 sps:$4 sm:$0xff]  }
 0x2d1   :  { %7389 = vmatpush1.bf16.msra.mxu1 %v9108_v19  ;;  %7046 = vmatprep.subr.bf16.mxu0 %v9113_v63  ;;  %v9197_v19 = vld [vmem:[#allocation7 + $0x564] ss:$16 sps:$4 sm:$0xff]   ;;  %v9200_v63 = vld [vmem:[#allocation7 + $0x56c] ss:$16 sps:$4 sm:$0xff]  }
 0x2d2   :  { %7390 = vmatprep.subr.bf16.mxu1 %v9116_v20  ;;  %v9195_v20 = vld [vmem:[#allocation7 + $0x560] ss:$16 sps:$4 sm:$0xff]  }
 0x2d4   :  { %7047 = vmatpush1.bf16.msra.mxu0 %v9111_v21  ;;  %v9198_v21 = vld [vmem:[#allocation7 + $0x568] ss:$16 sps:$4 sm:$0xff]  }
 0x2d5   :  { %7391 = vmatpush1.bf16.msra.mxu1 %v9114_v22  ;;  %7048 = vmatprep.subr.bf16.mxu0 %v9119_v23  ;;  %v9203_v22 = vld [vmem:[#allocation7 + $0x584] ss:$16 sps:$4 sm:$0xff]   ;;  %v9206_v23 = vld [vmem:[#allocation7 + $0x58c] ss:$16 sps:$4 sm:$0xff]  }
 0x2d6   :  { %7392 = vmatprep.subr.bf16.mxu1 %v9122_v6  ;;  %v9201_v6 = vld [vmem:[#allocation7 + $0x580] ss:$16 sps:$4 sm:$0xff]  }
 0x2d8   :  { %7049 = vmatpush1.bf16.msra.mxu0 %v9117_v24  ;;  %v9204_v24 = vld [vmem:[#allocation7 + $0x588] ss:$16 sps:$4 sm:$0xff]  }
 0x2d9   :  { %7393 = vmatpush1.bf16.msra.mxu1 %v9120_v26  ;;  %7050 = vmatprep.subr.bf16.mxu0 %v9125_v27  ;;  %v9209_v26 = vld [vmem:[#allocation7 + $0x5a4] ss:$16 sps:$4 sm:$0xff]   ;;  %v9212_v27 = vld [vmem:[#allocation7 + $0x5ac] ss:$16 sps:$4 sm:$0xff]  }
 0x2da   :  { %7394 = vmatprep.subr.bf16.mxu1 %v9128_v29  ;;  %v9207_v29 = vld [vmem:[#allocation7 + $0x5a0] ss:$16 sps:$4 sm:$0xff]  }
 0x2dc   :  { %7051 = vmatpush1.bf16.msra.mxu0 %v9123_v30  ;;  %v9210_v30 = vld [vmem:[#allocation7 + $0x5a8] ss:$16 sps:$4 sm:$0xff]  }
 0x2dd   :  { %7395 = vmatpush1.bf16.msra.mxu1 %v9126_v31  ;;  %7063 = vmatprep.subr.bf16.mxu0 %v9131_v32  ;;  %v9215_v31 = vld [vmem:[#allocation7 + $0x5c4] ss:$16 sps:$4 sm:$0xff]   ;;  %v9218_v32 = vld [vmem:[#allocation7 + $0x5cc] ss:$16 sps:$4 sm:$0xff]  }
 0x2de   :  { %7407 = vmatprep.subr.bf16.mxu1 %v9134_v33  ;;  %v9213_v33 = vld [vmem:[#allocation7 + $0x5c0] ss:$16 sps:$4 sm:$0xff]  }
 0x2df   :  { %7053 = vmatmul.mubr.bf16.vlgmr.msra.gmra.mrb[16].mxu0 %v9994_v3 }
 0x2e0   :  { %7397 = vmatmul.mubr.bf16.vlgmr.msra.gmra.mrb[16].mxu1 %v9994_v3  ;;  %7064 = vmatpush1.bf16.msra.mxu0 %v9129_v34  ;;  %v9152_v3 = vld [vmem:[#allocation7 + $0x46c] ss:$16 sps:$4 sm:$0xff]   ;;  %v9216_v34 = vld [vmem:[#allocation7 + $0x5c8] ss:$16 sps:$4 sm:$0xff]  }
 0x2e1   :  { %7095 = vmatprep.mubr.bf16.mxu0 %v10012_v53  ;;  %7408 = vmatpush1.bf16.msra.mxu1 %v9132_v35  ;;  %v9221_v35 = vld [vmem:[#allocation7 + $0x5e4] ss:$16 sps:$4 sm:$0xff]  }
 0x2e2   :  { %7439 = vmatprep.mubr.bf16.mxu1 %v10012_v53  ;;  %7065 = vmatprep.subr.bf16.mxu0 %v9137_v36  ;;  %v9153_v53 = vld [vmem:[#allocation7 + $0x480] ss:$16 sps:$4 sm:$0xff]   ;;  %v9224_v36 = vld [vmem:[#allocation7 + $0x5ec] ss:$16 sps:$4 sm:$0xff]  }
 0x2e3   :  { %7409 = vmatprep.subr.bf16.mxu1 %v9140_v37  ;;  %v9219_v37 = vld [vmem:[#allocation7 + $0x5e0] ss:$16 sps:$4 sm:$0xff]  }
 0x2e4   :  { %7066 = vmatpush1.bf16.msra.mxu0 %v9135_v38  ;;  %v9222_v38 = vld [vmem:[#allocation7 + $0x5e8] ss:$16 sps:$4 sm:$0xff]  }
 0x2e5   :  { %7410 = vmatpush1.bf16.msra.mxu1 %v9138_v39  ;;  %7067 = vmatprep.subr.bf16.mxu0 %v9143_v40  ;;  %v9227_v39 = vld [vmem:[#allocation7 + $0x604] ss:$16 sps:$4 sm:$0xff]   ;;  %v9230_v40 = vld [vmem:[#allocation7 + $0x60c] ss:$16 sps:$4 sm:$0xff]  }
 0x2e6   :  { %7411 = vmatprep.subr.bf16.mxu1 %v9146_v41  ;;  %v9225_v41 = vld [vmem:[#allocation7 + $0x600] ss:$16 sps:$4 sm:$0xff]  }
 0x2e8   :  { %7068 = vmatpush1.bf16.msra.mxu0 %v9141_v42  ;;  %v9228_v42 = vld [vmem:[#allocation7 + $0x608] ss:$16 sps:$4 sm:$0xff]  }
 0x2e9   :  { %7412 = vmatpush1.bf16.msra.mxu1 %v9144_v43  ;;  %7069 = vmatprep.subr.bf16.mxu0 %v9149_v44  ;;  %v9233_v43 = vld [vmem:[#allocation7 + $0x624] ss:$16 sps:$4 sm:$0xff]   ;;  %v9236_v44 = vld [vmem:[#allocation7 + $0x62c] ss:$16 sps:$4 sm:$0xff]  }
 0x2ea   :  { %7413 = vmatprep.subr.bf16.mxu1 %v9152_v3  ;;  %v9231_v3 = vld [vmem:[#allocation7 + $0x620] ss:$16 sps:$4 sm:$0xff]  }
 0x2ec   :  { %7070 = vmatpush1.bf16.msra.mxu0 %v9147_v45  ;;  %v9234_v45 = vld [vmem:[#allocation7 + $0x628] ss:$16 sps:$4 sm:$0xff]  }
 0x2ed   :  { %7414 = vmatpush1.bf16.msra.mxu1 %v9150_v46  ;;  %7071 = vmatprep.subr.bf16.mxu0 %v9155_v47  ;;  %v9239_v46 = vld [vmem:[#allocation7 + $0x644] ss:$16 sps:$4 sm:$0xff]   ;;  %v9242_v47 = vld [vmem:[#allocation7 + $0x64c] ss:$16 sps:$4 sm:$0xff]  }
 0x2ee   :  { %7415 = vmatprep.subr.bf16.mxu1 %v9158_v48  ;;  %v9237_v48 = vld [vmem:[#allocation7 + $0x640] ss:$16 sps:$4 sm:$0xff]  }
 0x2f0   :  { %7072 = vmatpush1.bf16.msra.mxu0 %v9153_v53  ;;  %v9240_v53 = vld [vmem:[#allocation7 + $0x648] ss:$16 sps:$4 sm:$0xff]  }
 0x2f1   :  { %7416 = vmatpush1.bf16.msra.mxu1 %v9156_v50  ;;  %7073 = vmatprep.subr.bf16.mxu0 %v9161_v51  ;;  %v9245_v50 = vld [vmem:[#allocation7 + $0x664] ss:$16 sps:$4 sm:$0xff]   ;;  %v9243_v51 = vld [vmem:[#allocation7 + $0x660] ss:$16 sps:$4 sm:$0xff]  }
 0x2f2   :  { %7417 = vmatprep.subr.bf16.mxu1 %v9164_v58  ;;  %v9246_v58 = vld [vmem:[#allocation7 + $0x668] ss:$16 sps:$4 sm:$0xff]  }
 0x2f4   :  { %7074 = vmatpush1.bf16.msra.mxu0 %v9159_v55  ;;  %v9251_v55 = vld [vmem:[#allocation7 + $0x684] ss:$16 sps:$4 sm:$0xff]  }
 0x2f5   :  { %7418 = vmatpush1.bf16.msra.mxu1 %v9162_v59  ;;  %7075 = vmatprep.subr.bf16.mxu0 %v9167_v61  ;;  %v9254_v59 = vld [vmem:[#allocation7 + $0x68c] ss:$16 sps:$4 sm:$0xff]   ;;  %v9252_v61 = vld [vmem:[#allocation7 + $0x688] ss:$16 sps:$4 sm:$0xff]  }
 0x2f6   :  { %7419 = vmatprep.subr.bf16.mxu1 %v9170_v62  ;;  %v9257_v62 = vld [vmem:[#allocation7 + $0x6a4] ss:$16 sps:$4 sm:$0xff]  }
 0x2f8   :  { %7076 = vmatpush1.bf16.msra.mxu0 %v9165_v0  ;;  %v9260_v0 = vld [vmem:[#allocation7 + $0x6ac] ss:$16 sps:$4 sm:$0xff]  }
 0x2f9   :  { %7420 = vmatpush1.bf16.msra.mxu1 %v9168_v1  ;;  %7077 = vmatprep.subr.bf16.mxu0 %v9173_v25  ;;  %v9255_v1 = vld [vmem:[#allocation7 + $0x6a0] ss:$16 sps:$4 sm:$0xff]   ;;  %v9258_v25 = vld [vmem:[#allocation7 + $0x6a8] ss:$16 sps:$4 sm:$0xff]  }
 0x2fa   :  { %7421 = vmatprep.subr.bf16.mxu1 %v9176_v2  ;;  %v9263_v2 = vld [vmem:[#allocation7 + $0x6c4] ss:$16 sps:$4 sm:$0xff]  }
 0x2fc   :  { %7078 = vmatpush1.bf16.msra.mxu0 %v9171_v5 }
 0x2fd   :  { %7422 = vmatpush1.bf16.msra.mxu1 %v9174_v7  ;;  %7079 = vmatprep.subr.bf16.mxu0 %v9179_v8  ;;  %v9266_v7 = vld [vmem:[#allocation7 + $0x6cc] ss:$16 sps:$4 sm:$0xff]  }
 0x2fe   :  { %7423 = vmatprep.subr.bf16.mxu1 %v9182_v9 }
 0x300   :  { %7080 = vmatpush1.bf16.msra.mxu0 %v9177_v10  ;;  %v9261_v10 = vld [vmem:[#allocation7 + $0x6c0] ss:$16 sps:$4 sm:$0xff]  }
 0x301   :  { %7424 = vmatpush1.bf16.msra.mxu1 %v9180_v11  ;;  %7081 = vmatprep.subr.bf16.mxu0 %v9185_v12 }
 0x302   :  { %7425 = vmatprep.subr.bf16.mxu1 %v9188_v13  ;;  %v9264_v13 = vld [vmem:[#allocation7 + $0x6c8] ss:$16 sps:$4 sm:$0xff]  }
 0x304   :  { %7082 = vmatpush1.bf16.msra.mxu0 %v9183_v28  ;;  %v9269_v28 = vld [vmem:[#allocation7 + $0x6e4] ss:$16 sps:$4 sm:$0xff]  }
 0x305   :  { %7426 = vmatpush1.bf16.msra.mxu1 %v9186_v14  ;;  %7083 = vmatprep.subr.bf16.mxu0 %v9191_v16 }
 0x306   :  { %7427 = vmatprep.subr.bf16.mxu1 %v9194_v17 }
 0x308   :  { %7084 = vmatpush1.bf16.msra.mxu0 %v9189_v18 }
 0x309   :  { %7428 = vmatpush1.bf16.msra.mxu1 %v9192_v4  ;;  %7085 = vmatprep.subr.bf16.mxu0 %v9197_v19  ;;  %v9272_v4 = vld [vmem:[#allocation7 + $0x6ec] ss:$16 sps:$4 sm:$0xff]  }
 0x30a   :  { %7429 = vmatprep.subr.bf16.mxu1 %v9200_v63 }
 0x30c   :  { %7086 = vmatpush1.bf16.msra.mxu0 %v9195_v20 }
 0x30d   :  { %7430 = vmatpush1.bf16.msra.mxu1 %v9198_v21  ;;  %7087 = vmatprep.subr.bf16.mxu0 %v9203_v22 }
 0x30e   :  { %7431 = vmatprep.subr.bf16.mxu1 %v9206_v23 }
 0x310   :  { %7088 = vmatpush1.bf16.msra.mxu0 %v9201_v6 }
 0x311   :  { %7432 = vmatpush1.bf16.msra.mxu1 %v9204_v24  ;;  %7089 = vmatprep.subr.bf16.mxu0 %v9209_v26 }
 0x312   :  { %7433 = vmatprep.subr.bf16.mxu1 %v9212_v27 }
 0x314   :  { %7090 = vmatpush1.bf16.msra.mxu0 %v9207_v29  ;;  %v9267_v29 = vld [vmem:[#allocation7 + $0x6e0] ss:$16 sps:$4 sm:$0xff]  }
 0x315   :  { %7434 = vmatpush1.bf16.msra.mxu1 %v9210_v30  ;;  %7091 = vmatprep.subr.bf16.mxu0 %v9215_v31  ;;  %v9270_v31 = vld [vmem:[#allocation7 + $0x6e8] ss:$16 sps:$4 sm:$0xff]  }
 0x316   :  { %7435 = vmatprep.subr.bf16.mxu1 %v9218_v32  ;;  %v9275_v32 = vld [vmem:[#allocation7 + $0x704] ss:$16 sps:$4 sm:$0xff]  }
 0x318   :  { %7092 = vmatpush1.bf16.msra.mxu0 %v9213_v33  ;;  %v9278_v33 = vld [vmem:[#allocation7 + $0x70c] ss:$16 sps:$4 sm:$0xff]  }
 0x319   :  { %7436 = vmatpush1.bf16.msra.mxu1 %v9216_v34  ;;  %7093 = vmatprep.subr.bf16.mxu0 %v9221_v35  ;;  %v9273_v34 = vld [vmem:[#allocation7 + $0x700] ss:$16 sps:$4 sm:$0xff]   ;;  %v9276_v35 = vld [vmem:[#allocation7 + $0x708] ss:$16 sps:$4 sm:$0xff]  }
 0x31a   :  { %7437 = vmatprep.subr.bf16.mxu1 %v9224_v36  ;;  %v9281_v36 = vld [vmem:[#allocation7 + $0x724] ss:$16 sps:$4 sm:$0xff]  }
 0x31c   :  { %7094 = vmatpush1.bf16.msra.mxu0 %v9219_v37  ;;  %v9284_v37 = vld [vmem:[#allocation7 + $0x72c] ss:$16 sps:$4 sm:$0xff]  }
 0x31d   :  { %7438 = vmatpush1.bf16.msra.mxu1 %v9222_v38  ;;  %7106 = vmatprep.subr.bf16.mxu0 %v9227_v39  ;;  %v9279_v38 = vld [vmem:[#allocation7 + $0x720] ss:$16 sps:$4 sm:$0xff]   ;;  %v9282_v39 = vld [vmem:[#allocation7 + $0x728] ss:$16 sps:$4 sm:$0xff]  }
 0x31e   :  { %7450 = vmatprep.subr.bf16.mxu1 %v9230_v40  ;;  %v9287_v40 = vld [vmem:[#allocation7 + $0x744] ss:$16 sps:$4 sm:$0xff]  }
 0x31f   :  { %7096 = vmatmul.mubr.bf16.vlgmr.msra.gmra.mrb[16].mxu0 %v10008_v49 }
 0x320   :  { %7440 = vmatmul.mubr.bf16.vlgmr.msra.gmra.mrb[16].mxu1 %v10008_v49  ;;  %7107 = vmatpush1.bf16.msra.mxu0 %v9225_v41  ;;  %v9248_v49 = vld [vmem:[#allocation7 + $0x66c] ss:$16 sps:$4 sm:$0xff]  }
 0x321   :  { %7138 = vmatprep.mubr.bf16.mxu0 %v10014_v15  ;;  %7451 = vmatpush1.bf16.msra.mxu1 %v9228_v42  ;;  %v9290_v41 = vld [vmem:[#allocation7 + $0x74c] ss:$16 sps:$4 sm:$0xff]   ;;  %v9285_v42 = vld [vmem:[#allocation7 + $0x740] ss:$16 sps:$4 sm:$0xff]  }
 0x322   :  { %7482 = vmatprep.mubr.bf16.mxu1 %v10014_v15  ;;  %7108 = vmatprep.subr.bf16.mxu0 %v9233_v43  ;;  %v9249_v15 = vld [vmem:[#allocation7 + $0x680] ss:$16 sps:$4 sm:$0xff]   ;;  %v9288_v43 = vld [vmem:[#allocation7 + $0x748] ss:$16 sps:$4 sm:$0xff]  }
 0x323   :  { %7452 = vmatprep.subr.bf16.mxu1 %v9236_v44  ;;  %v9293_v44 = vld [vmem:[#allocation7 + $0x764] ss:$16 sps:$4 sm:$0xff]  }
 0x324   :  { %7109 = vmatpush1.bf16.msra.mxu0 %v9231_v3  ;;  %v9296_v3 = vld [vmem:[#allocation7 + $0x76c] ss:$16 sps:$4 sm:$0xff]  }
 0x325   :  { %7453 = vmatpush1.bf16.msra.mxu1 %v9234_v45  ;;  %7110 = vmatprep.subr.bf16.mxu0 %v9239_v46  ;;  %v9291_v45 = vld [vmem:[#allocation7 + $0x760] ss:$16 sps:$4 sm:$0xff]   ;;  %v9294_v46 = vld [vmem:[#allocation7 + $0x768] ss:$16 sps:$4 sm:$0xff]  }
 0x326   :  { %7454 = vmatprep.subr.bf16.mxu1 %v9242_v47  ;;  %v9299_v47 = vld [vmem:[#allocation7 + $0x784] ss:$16 sps:$4 sm:$0xff]  }
 0x328   :  { %7111 = vmatpush1.bf16.msra.mxu0 %v9237_v48  ;;  %v9302_v48 = vld [vmem:[#allocation7 + $0x78c] ss:$16 sps:$4 sm:$0xff]  }
 0x329   :  { %7455 = vmatpush1.bf16.msra.mxu1 %v9240_v53  ;;  %7112 = vmatprep.subr.bf16.mxu0 %v9245_v50  ;;  %v9297_v53 = vld [vmem:[#allocation7 + $0x780] ss:$16 sps:$4 sm:$0xff]   ;;  %v9300_v50 = vld [vmem:[#allocation7 + $0x788] ss:$16 sps:$4 sm:$0xff]  }
 0x32a   :  { %7456 = vmatprep.subr.bf16.mxu1 %v9248_v49  ;;  %v9305_v49 = vld [vmem:[#allocation7 + $0x7a4] ss:$16 sps:$4 sm:$0xff]  }
 0x32c   :  { %7113 = vmatpush1.bf16.msra.mxu0 %v9243_v51  ;;  %v9308_v51 = vld [vmem:[#allocation7 + $0x7ac] ss:$16 sps:$4 sm:$0xff]  }
 0x32d   :  { %7457 = vmatpush1.bf16.msra.mxu1 %v9246_v58  ;;  %7114 = vmatprep.subr.bf16.mxu0 %v9251_v55  ;;  %v9303_v58 = vld [vmem:[#allocation7 + $0x7a0] ss:$16 sps:$4 sm:$0xff]   ;;  %v9306_v55 = vld [vmem:[#allocation7 + $0x7a8] ss:$16 sps:$4 sm:$0xff]  }
 0x32e   :  { %7458 = vmatprep.subr.bf16.mxu1 %v9254_v59  ;;  %v9311_v59 = vld [vmem:[#allocation7 + $0x7c4] ss:$16 sps:$4 sm:$0xff]  }
 0x330   :  { %7115 = vmatpush1.bf16.msra.mxu0 %v9249_v15  ;;  %v9314_v15 = vld [vmem:[#allocation7 + $0x7cc] ss:$16 sps:$4 sm:$0xff]  }
 0x331   :  { %7459 = vmatpush1.bf16.msra.mxu1 %v9252_v61  ;;  %7116 = vmatprep.subr.bf16.mxu0 %v9257_v62  ;;  %v9309_v61 = vld [vmem:[#allocation7 + $0x7c0] ss:$16 sps:$4 sm:$0xff]   ;;  %v9312_v62 = vld [vmem:[#allocation7 + $0x7c8] ss:$16 sps:$4 sm:$0xff]  }
 0x332   :  { %v3762_v5 = vpop.f32.mrb[12].mxu0  ;;  %7460 = vmatprep.subr.bf16.mxu1 %v9260_v0  ;;  %v3848_v8 = vpop.f32.mrb[12].mxu1  ;;  %v9317_v0 = vld [vmem:[#allocation7 + $0x7e4] ss:$16 sps:$4 sm:$0xff]  }
 0x333   :  { %v3764_v9 = vpop.f32.mrb[13].mxu0  ;;  %v3850_v11 = vpop.f32.mrb[13].mxu1  ;;  %v3869_v14 = vmax.f32 %v3762_v5, 0.0  ;;  %v3871_v19 = vmax.f32 %v3848_v8, 0.0  ;;  %v9323_v5 = vld [vmem:[#allocation7 + $0x804] ss:$16 sps:$4 sm:$0xff]  }
 0x334   :  { %v3766_v12 = vpop.f32.mrb[14].mxu0  ;;  %7117 = vmatpush1.bf16.msra.mxu0 %v9255_v1  ;;  %v3852_v17 = vpop.f32.mrb[14].mxu1  ;;  %v3870_v63 = vmax.f32 %v3764_v9, 0.0  ;;  %v3872_v23 = vmax.f32 %v3850_v11, 0.0  ;;  %v9320_v1 = vld [vmem:[#allocation7 + $0x7ec] ss:$16 sps:$4 sm:$0xff]  }
 0x335   :  { %v3885_v16 = vmax.f32 %v3766_v12, 0.0  ;;  %7461 = vmatpush1.bf16.msra.mxu1 %v9258_v25  ;;  %v3768_v18 = vpop.f32.mrb[15].mxu0  ;;  %7118 = vmatprep.subr.bf16.mxu0 %v9263_v2  ;;  %v3887_v20 = vmax.f32 %v3852_v17, 0.0  ;;  %v3854_v22 = vpop.f32.mrb[15].mxu1  ;;  %v9315_v25 = vld [vmem:[#allocation7 + $0x7e0] ss:$16 sps:$4 sm:$0xff]  }
 0x336   :  { %v3886_v21 = vmax.f32 %v3768_v18, 0.0  ;;  %7462 = vmatprep.subr.bf16.mxu1 %v9266_v7  ;;  %v3888_v24 = vmax.f32 %v3854_v22, 0.0  ;;  %v9318_v2 = vld [vmem:[#allocation7 + $0x7e8] ss:$16 sps:$4 sm:$0xff]   ;;  %v9326_v7 = vld [vmem:[#allocation7 + $0x80c] ss:$16 sps:$4 sm:$0xff]  }
 0x337   :  { %v10040_v6 = vpack.c.bf16 %v3885_v16, %v3869_v14  ;;  %v10042_v26 = vpack.c.bf16 %v3887_v20, %v3871_v19  ;;  %v9321_v8 = vld [vmem:[#allocation7 + $0x800] ss:$16 sps:$4 sm:$0xff]   ;;  %v9324_v9 = vld [vmem:[#allocation7 + $0x808] ss:$16 sps:$4 sm:$0xff]   ;;  %v9332_v11 = vld [vmem:[#allocation7 + $0x82c] ss:$16 sps:$4 sm:$0xff]  }
 0x338   :  { %v10044_v27 = vpack.c.bf16 %v3886_v21, %v3870_v63  ;;  %7119 = vmatpush1.bf16.msra.mxu0 %v9261_v10  ;;  %v10046_v30 = vpack.c.bf16 %v3888_v24, %v3872_v23  ;;  %v9329_v10 = vld [vmem:[#allocation7 + $0x824] ss:$16 sps:$4 sm:$0xff]   ;;  %v9327_v12 = vld [vmem:[#allocation7 + $0x820] ss:$16 sps:$4 sm:$0xff]   ;;  %v9338_v14 = vld [vmem:[#allocation7 + $0x84c] ss:$16 sps:$4 sm:$0xff]  }
 0x339   :  { %7463 = vmatpush1.bf16.msra.mxu1 %v9264_v13  ;;  %7120 = vmatprep.subr.bf16.mxu0 %v9269_v28  ;;  %v9330_v13 = vld [vmem:[#allocation7 + $0x828] ss:$16 sps:$4 sm:$0xff]   ;;  %v9335_v28 = vld [vmem:[#allocation7 + $0x844] ss:$16 sps:$4 sm:$0xff]   ;;  %v9333_v16 = vld [vmem:[#allocation7 + $0x840] ss:$16 sps:$4 sm:$0xff]  }
 0x33a   :  { %7464 = vmatprep.subr.bf16.mxu1 %v9272_v4  ;;  %v9336_v17 = vld [vmem:[#allocation7 + $0x848] ss:$16 sps:$4 sm:$0xff]   ;;  %v9341_v18 = vld [vmem:[#allocation7 + $0x864] ss:$16 sps:$4 sm:$0xff]   ;;  %v9339_v4 = vld [vmem:[#allocation7 + $0x860] ss:$16 sps:$4 sm:$0xff]  }
 0x33b   :  { %v9342_v19 = vld [vmem:[#allocation7 + $0x868] ss:$16 sps:$4 sm:$0xff]   ;;  %v9347_v63 = vld [vmem:[#allocation7 + $0x884] ss:$16 sps:$4 sm:$0xff]   ;;  %v9350_v20 = vld [vmem:[#allocation7 + $0x88c] ss:$16 sps:$4 sm:$0xff]  }
 0x33c   :  { %7121 = vmatpush1.bf16.msra.mxu0 %v9267_v29  ;;  %v9348_v21 = vld [vmem:[#allocation7 + $0x888] ss:$16 sps:$4 sm:$0xff]   ;;  %v9353_v22 = vld [vmem:[#allocation7 + $0x8a4] ss:$16 sps:$4 sm:$0xff]   ;;  %v9356_v23 = vld [vmem:[#allocation7 + $0x8ac] ss:$16 sps:$4 sm:$0xff]  }
 0x33d   :  { %7465 = vmatpush1.bf16.msra.mxu1 %v9270_v31  ;;  %7122 = vmatprep.subr.bf16.mxu0 %v9275_v32  ;;  %v9351_v24 = vld [vmem:[#allocation7 + $0x8a0] ss:$16 sps:$4 sm:$0xff]   ;;  %v9354_v29 = vld [vmem:[#allocation7 + $0x8a8] ss:$16 sps:$4 sm:$0xff]   ;;  %v9359_v31 = vld [vmem:[#allocation7 + $0x8c4] ss:$16 sps:$4 sm:$0xff]  }
 0x33e   :  { %7466 = vmatprep.subr.bf16.mxu1 %v9278_v33  ;;  %v9362_v32 = vld [vmem:[#allocation7 + $0x8cc] ss:$16 sps:$4 sm:$0xff]   ;;  %v9357_v33 = vld [vmem:[#allocation7 + $0x8c0] ss:$16 sps:$4 sm:$0xff]  }
 0x340   :  { %7123 = vmatpush1.bf16.msra.mxu0 %v9273_v34  ;;  %v9360_v34 = vld [vmem:[#allocation7 + $0x8c8] ss:$16 sps:$4 sm:$0xff]  }
 0x341   :  { %7467 = vmatpush1.bf16.msra.mxu1 %v9276_v35  ;;  %7124 = vmatprep.subr.bf16.mxu0 %v9281_v36  ;;  %v9365_v35 = vld [vmem:[#allocation7 + $0x8e4] ss:$16 sps:$4 sm:$0xff]   ;;  %v9368_v36 = vld [vmem:[#allocation7 + $0x8ec] ss:$16 sps:$4 sm:$0xff]  }
 0x342   :  { %7468 = vmatprep.subr.bf16.mxu1 %v9284_v37  ;;  %v9363_v37 = vld [vmem:[#allocation7 + $0x8e0] ss:$16 sps:$4 sm:$0xff]  }
 0x344   :  { %7125 = vmatpush1.bf16.msra.mxu0 %v9279_v38  ;;  %v9366_v38 = vld [vmem:[#allocation7 + $0x8e8] ss:$16 sps:$4 sm:$0xff]  }
 0x345   :  { %7469 = vmatpush1.bf16.msra.mxu1 %v9282_v39  ;;  %7126 = vmatprep.subr.bf16.mxu0 %v9287_v40  ;;  %v9371_v39 = vld [vmem:[#allocation7 + $0x904] ss:$16 sps:$4 sm:$0xff]   ;;  %v9374_v40 = vld [vmem:[#allocation7 + $0x90c] ss:$16 sps:$4 sm:$0xff]  }
 0x346   :  { %7470 = vmatprep.subr.bf16.mxu1 %v9290_v41  ;;  %v9369_v41 = vld [vmem:[#allocation7 + $0x900] ss:$16 sps:$4 sm:$0xff]  }
 0x348   :  { %7127 = vmatpush1.bf16.msra.mxu0 %v9285_v42  ;;  %v9372_v42 = vld [vmem:[#allocation7 + $0x908] ss:$16 sps:$4 sm:$0xff]  }
 0x349   :  { %7471 = vmatpush1.bf16.msra.mxu1 %v9288_v43  ;;  %7128 = vmatprep.subr.bf16.mxu0 %v9293_v44  ;;  %v9377_v43 = vld [vmem:[#allocation7 + $0x924] ss:$16 sps:$4 sm:$0xff]   ;;  %v9380_v44 = vld [vmem:[#allocation7 + $0x92c] ss:$16 sps:$4 sm:$0xff]  }
 0x34a   :  { %7472 = vmatprep.subr.bf16.mxu1 %v9296_v3  ;;  %v9375_v3 = vld [vmem:[#allocation7 + $0x920] ss:$16 sps:$4 sm:$0xff]  }
 0x34c   :  { %7129 = vmatpush1.bf16.msra.mxu0 %v9291_v45  ;;  %v9378_v45 = vld [vmem:[#allocation7 + $0x928] ss:$16 sps:$4 sm:$0xff]  }
 0x34d   :  { %7473 = vmatpush1.bf16.msra.mxu1 %v9294_v46  ;;  %7130 = vmatprep.subr.bf16.mxu0 %v9299_v47  ;;  %v9383_v46 = vld [vmem:[#allocation7 + $0x944] ss:$16 sps:$4 sm:$0xff]   ;;  %v9386_v47 = vld [vmem:[#allocation7 + $0x94c] ss:$16 sps:$4 sm:$0xff]  }
 0x34e   :  { %7474 = vmatprep.subr.bf16.mxu1 %v9302_v48  ;;  %v9381_v48 = vld [vmem:[#allocation7 + $0x940] ss:$16 sps:$4 sm:$0xff]  }
 0x350   :  { %7131 = vmatpush1.bf16.msra.mxu0 %v9297_v53  ;;  %v9384_v53 = vld [vmem:[#allocation7 + $0x948] ss:$16 sps:$4 sm:$0xff]  }
 0x351   :  { %7475 = vmatpush1.bf16.msra.mxu1 %v9300_v50  ;;  %7132 = vmatprep.subr.bf16.mxu0 %v9305_v49  ;;  %v9389_v50 = vld [vmem:[#allocation7 + $0x964] ss:$16 sps:$4 sm:$0xff]   ;;  %v9392_v49 = vld [vmem:[#allocation7 + $0x96c] ss:$16 sps:$4 sm:$0xff]  }
 0x352   :  { %7476 = vmatprep.subr.bf16.mxu1 %v9308_v51  ;;  %v9387_v51 = vld [vmem:[#allocation7 + $0x960] ss:$16 sps:$4 sm:$0xff]  }
 0x354   :  { %7133 = vmatpush1.bf16.msra.mxu0 %v9303_v58  ;;  %v9390_v58 = vld [vmem:[#allocation7 + $0x968] ss:$16 sps:$4 sm:$0xff]  }
 0x355   :  { %7477 = vmatpush1.bf16.msra.mxu1 %v9306_v55  ;;  %7134 = vmatprep.subr.bf16.mxu0 %v9311_v59  ;;  %v9395_v55 = vld [vmem:[#allocation7 + $0x984] ss:$16 sps:$4 sm:$0xff]   ;;  %v9398_v59 = vld [vmem:[#allocation7 + $0x98c] ss:$16 sps:$4 sm:$0xff]  }
 0x356   :  { %7478 = vmatprep.subr.bf16.mxu1 %v9314_v15  ;;  %v9393_v15 = vld [vmem:[#allocation7 + $0x980] ss:$16 sps:$4 sm:$0xff]  }
 0x358   :  { %7135 = vmatpush1.bf16.msra.mxu0 %v9309_v61  ;;  %v9396_v61 = vld [vmem:[#allocation7 + $0x988] ss:$16 sps:$4 sm:$0xff]  }
 0x359   :  { %7479 = vmatpush1.bf16.msra.mxu1 %v9312_v62  ;;  %7136 = vmatprep.subr.bf16.mxu0 %v9317_v0  ;;  %v9401_v62 = vld [vmem:[#allocation7 + $0x9a4] ss:$16 sps:$4 sm:$0xff]   ;;  %v9404_v0 = vld [vmem:[#allocation7 + $0x9ac] ss:$16 sps:$4 sm:$0xff]  }
 0x35a   :  { %7480 = vmatprep.subr.bf16.mxu1 %v9320_v1  ;;  %v9399_v1 = vld [vmem:[#allocation7 + $0x9a0] ss:$16 sps:$4 sm:$0xff]  }
 0x35c   :  { %7137 = vmatpush1.bf16.msra.mxu0 %v9315_v25  ;;  %v9402_v25 = vld [vmem:[#allocation7 + $0x9a8] ss:$16 sps:$4 sm:$0xff]  }
 0x35d   :  { %7481 = vmatpush1.bf16.msra.mxu1 %v9318_v2  ;;  %7149 = vmatprep.subr.bf16.mxu0 %v9323_v5  ;;  %v9407_v2 = vld [vmem:[#allocation7 + $0x9c4] ss:$16 sps:$4 sm:$0xff]   ;;  %v9410_v5 = vld [vmem:[#allocation7 + $0x9cc] ss:$16 sps:$4 sm:$0xff]  }
 0x35e   :  { %7493 = vmatprep.subr.bf16.mxu1 %v9326_v7  ;;  %v9405_v7 = vld [vmem:[#allocation7 + $0x9c0] ss:$16 sps:$4 sm:$0xff]  }
 0x35f   :  { %7139 = vmatmul.mubr.bf16.vlgmr.msra.gmra.mrb[16].mxu0 %v10010_v52 }
 0x360   :  { %7483 = vmatmul.mubr.bf16.vlgmr.msra.gmra.mrb[16].mxu1 %v10010_v52  ;;  %7150 = vmatpush1.bf16.msra.mxu0 %v9321_v8  ;;  %v9344_v52 = vld [vmem:[#allocation7 + $0x86c] ss:$16 sps:$4 sm:$0xff]   ;;  %v9408_v8 = vld [vmem:[#allocation7 + $0x9c8] ss:$16 sps:$4 sm:$0xff]  }
 0x361   :  { %7181 = vmatprep.mubr.bf16.mxu0 %v10028_v57  ;;  %7494 = vmatpush1.bf16.msra.mxu1 %v9324_v9  ;;  %v9413_v9 = vld [vmem:[#allocation7 + $0x9e4] ss:$16 sps:$4 sm:$0xff]  }
 0x362   :  { %7525 = vmatprep.mubr.bf16.mxu1 %v10028_v57  ;;  %7151 = vmatprep.subr.bf16.mxu0 %v9329_v10  ;;  %v9345_v57 = vld [vmem:[#allocation7 + $0x880] ss:$16 sps:$4 sm:$0xff]   ;;  %v9416_v10 = vld [vmem:[#allocation7 + $0x9ec] ss:$16 sps:$4 sm:$0xff]  }
 0x363   :  { %7495 = vmatprep.subr.bf16.mxu1 %v9332_v11  ;;  %v9411_v11 = vld [vmem:[#allocation7 + $0x9e0] ss:$16 sps:$4 sm:$0xff]  }
 0x364   :  { %7152 = vmatpush1.bf16.msra.mxu0 %v9327_v12  ;;  %v9414_v12 = vld [vmem:[#allocation7 + $0x9e8] ss:$16 sps:$4 sm:$0xff]  }
 0x365   :  { %7496 = vmatpush1.bf16.msra.mxu1 %v9330_v13  ;;  %7153 = vmatprep.subr.bf16.mxu0 %v9335_v28  ;;  %v9419_v13 = vld [vmem:[#allocation7 + $0xa04] ss:$16 sps:$4 sm:$0xff]   ;;  %v9422_v28 = vld [vmem:[#allocation7 + $0xa0c] ss:$16 sps:$4 sm:$0xff]  }
 0x366   :  { %7497 = vmatprep.subr.bf16.mxu1 %v9338_v14  ;;  %v9417_v14 = vld [vmem:[#allocation7 + $0xa00] ss:$16 sps:$4 sm:$0xff]  }
 0x368   :  { %7154 = vmatpush1.bf16.msra.mxu0 %v9333_v16  ;;  %v9420_v16 = vld [vmem:[#allocation7 + $0xa08] ss:$16 sps:$4 sm:$0xff]  }
 0x369   :  { %7498 = vmatpush1.bf16.msra.mxu1 %v9336_v17  ;;  %7155 = vmatprep.subr.bf16.mxu0 %v9341_v18  ;;  %v9425_v17 = vld [vmem:[#allocation7 + $0xa24] ss:$16 sps:$4 sm:$0xff]   ;;  %v9428_v18 = vld [vmem:[#allocation7 + $0xa2c] ss:$16 sps:$4 sm:$0xff]  }
 0x36a   :  { %7499 = vmatprep.subr.bf16.mxu1 %v9344_v52  ;;  %v9423_v52 = vld [vmem:[#allocation7 + $0xa20] ss:$16 sps:$4 sm:$0xff]  }
 0x36c   :  { %7156 = vmatpush1.bf16.msra.mxu0 %v9339_v4  ;;  %v9426_v4 = vld [vmem:[#allocation7 + $0xa28] ss:$16 sps:$4 sm:$0xff]  }
 0x36d   :  { %7500 = vmatpush1.bf16.msra.mxu1 %v9342_v19  ;;  %7157 = vmatprep.subr.bf16.mxu0 %v9347_v63  ;;  %v9431_v19 = vld [vmem:[#allocation7 + $0xa44] ss:$16 sps:$4 sm:$0xff]   ;;  %v9434_v63 = vld [vmem:[#allocation7 + $0xa4c] ss:$16 sps:$4 sm:$0xff]  }
 0x36e   :  { %7501 = vmatprep.subr.bf16.mxu1 %v9350_v20  ;;  %v9429_v20 = vld [vmem:[#allocation7 + $0xa40] ss:$16 sps:$4 sm:$0xff]  }
 0x370   :  { %7158 = vmatpush1.bf16.msra.mxu0 %v9345_v57  ;;  %v9432_v57 = vld [vmem:[#allocation7 + $0xa48] ss:$16 sps:$4 sm:$0xff]  }
 0x371   :  { %7502 = vmatpush1.bf16.msra.mxu1 %v9348_v21  ;;  %7159 = vmatprep.subr.bf16.mxu0 %v9353_v22  ;;  %v9437_v21 = vld [vmem:[#allocation7 + $0xa64] ss:$16 sps:$4 sm:$0xff]   ;;  %v9435_v22 = vld [vmem:[#allocation7 + $0xa60] ss:$16 sps:$4 sm:$0xff]  }
 0x372   :  { %7503 = vmatprep.subr.bf16.mxu1 %v9356_v23  ;;  %v9438_v23 = vld [vmem:[#allocation7 + $0xa68] ss:$16 sps:$4 sm:$0xff]  }
 0x374   :  { %7160 = vmatpush1.bf16.msra.mxu0 %v9351_v24  ;;  %v9443_v24 = vld [vmem:[#allocation7 + $0xa84] ss:$16 sps:$4 sm:$0xff]  }
 0x375   :  { %7504 = vmatpush1.bf16.msra.mxu1 %v9354_v29  ;;  %7161 = vmatprep.subr.bf16.mxu0 %v9359_v31  ;;  %v9446_v29 = vld [vmem:[#allocation7 + $0xa8c] ss:$16 sps:$4 sm:$0xff]   ;;  %v9444_v31 = vld [vmem:[#allocation7 + $0xa88] ss:$16 sps:$4 sm:$0xff]  }
 0x376   :  { %7505 = vmatprep.subr.bf16.mxu1 %v9362_v32  ;;  %v9449_v32 = vld [vmem:[#allocation7 + $0xaa4] ss:$16 sps:$4 sm:$0xff]  }
 0x378   :  { %7162 = vmatpush1.bf16.msra.mxu0 %v9357_v33  ;;  %v9452_v33 = vld [vmem:[#allocation7 + $0xaac] ss:$16 sps:$4 sm:$0xff]  }
 0x379   :  { %7506 = vmatpush1.bf16.msra.mxu1 %v9360_v34  ;;  %7163 = vmatprep.subr.bf16.mxu0 %v9365_v35  ;;  %v9447_v34 = vld [vmem:[#allocation7 + $0xaa0] ss:$16 sps:$4 sm:$0xff]   ;;  %v9450_v35 = vld [vmem:[#allocation7 + $0xaa8] ss:$16 sps:$4 sm:$0xff]  }
 0x37a   :  { %7507 = vmatprep.subr.bf16.mxu1 %v9368_v36  ;;  %v9455_v36 = vld [vmem:[#allocation7 + $0xac4] ss:$16 sps:$4 sm:$0xff]  }
 0x37c   :  { %7164 = vmatpush1.bf16.msra.mxu0 %v9363_v37  ;;  %v9458_v37 = vld [vmem:[#allocation7 + $0xacc] ss:$16 sps:$4 sm:$0xff]  }
 0x37d   :  { %7508 = vmatpush1.bf16.msra.mxu1 %v9366_v38  ;;  %7165 = vmatprep.subr.bf16.mxu0 %v9371_v39  ;;  %v9453_v38 = vld [vmem:[#allocation7 + $0xac0] ss:$16 sps:$4 sm:$0xff]   ;;  %v9456_v39 = vld [vmem:[#allocation7 + $0xac8] ss:$16 sps:$4 sm:$0xff]  }
 0x37e   :  { %7509 = vmatprep.subr.bf16.mxu1 %v9374_v40  ;;  %v9461_v40 = vld [vmem:[#allocation7 + $0xae4] ss:$16 sps:$4 sm:$0xff]  }
 0x380   :  { %7166 = vmatpush1.bf16.msra.mxu0 %v9369_v41  ;;  %v9464_v41 = vld [vmem:[#allocation7 + $0xaec] ss:$16 sps:$4 sm:$0xff]  }
 0x381   :  { %7510 = vmatpush1.bf16.msra.mxu1 %v9372_v42  ;;  %7167 = vmatprep.subr.bf16.mxu0 %v9377_v43  ;;  %v9459_v42 = vld [vmem:[#allocation7 + $0xae0] ss:$16 sps:$4 sm:$0xff]   ;;  %v9462_v43 = vld [vmem:[#allocation7 + $0xae8] ss:$16 sps:$4 sm:$0xff]  }
 0x382   :  { %7511 = vmatprep.subr.bf16.mxu1 %v9380_v44  ;;  %v9467_v44 = vld [vmem:[#allocation7 + $0xb04] ss:$16 sps:$4 sm:$0xff]  }
 0x384   :  { %7168 = vmatpush1.bf16.msra.mxu0 %v9375_v3  ;;  %v9470_v3 = vld [vmem:[#allocation7 + $0xb0c] ss:$16 sps:$4 sm:$0xff]  }
 0x385   :  { %7512 = vmatpush1.bf16.msra.mxu1 %v9378_v45  ;;  %7169 = vmatprep.subr.bf16.mxu0 %v9383_v46  ;;  %v9465_v45 = vld [vmem:[#allocation7 + $0xb00] ss:$16 sps:$4 sm:$0xff]   ;;  %v9468_v46 = vld [vmem:[#allocation7 + $0xb08] ss:$16 sps:$4 sm:$0xff]  }
 0x386   :  { %7513 = vmatprep.subr.bf16.mxu1 %v9386_v47  ;;  %v9473_v47 = vld [vmem:[#allocation7 + $0xb24] ss:$16 sps:$4 sm:$0xff]  }
 0x388   :  { %7170 = vmatpush1.bf16.msra.mxu0 %v9381_v48  ;;  %v9476_v48 = vld [vmem:[#allocation7 + $0xb2c] ss:$16 sps:$4 sm:$0xff]  }
 0x389   :  { %7514 = vmatpush1.bf16.msra.mxu1 %v9384_v53  ;;  %7171 = vmatprep.subr.bf16.mxu0 %v9389_v50  ;;  %v9471_v53 = vld [vmem:[#allocation7 + $0xb20] ss:$16 sps:$4 sm:$0xff]   ;;  %v9474_v50 = vld [vmem:[#allocation7 + $0xb28] ss:$16 sps:$4 sm:$0xff]  }
 0x38a   :  { %7515 = vmatprep.subr.bf16.mxu1 %v9392_v49  ;;  %v9479_v49 = vld [vmem:[#allocation7 + $0xb44] ss:$16 sps:$4 sm:$0xff]  }
 0x38c   :  { %7172 = vmatpush1.bf16.msra.mxu0 %v9387_v51  ;;  %v9482_v51 = vld [vmem:[#allocation7 + $0xb4c] ss:$16 sps:$4 sm:$0xff]  }
 0x38d   :  { %7516 = vmatpush1.bf16.msra.mxu1 %v9390_v58  ;;  %7173 = vmatprep.subr.bf16.mxu0 %v9395_v55  ;;  %v9477_v58 = vld [vmem:[#allocation7 + $0xb40] ss:$16 sps:$4 sm:$0xff]   ;;  %v9480_v55 = vld [vmem:[#allocation7 + $0xb48] ss:$16 sps:$4 sm:$0xff]  }
 0x38e   :  { %7517 = vmatprep.subr.bf16.mxu1 %v9398_v59  ;;  %v9485_v59 = vld [vmem:[#allocation7 + $0xb64] ss:$16 sps:$4 sm:$0xff]  }
 0x390   :  { %7174 = vmatpush1.bf16.msra.mxu0 %v9393_v15  ;;  %v9488_v15 = vld [vmem:[#allocation7 + $0xb6c] ss:$16 sps:$4 sm:$0xff]  }
 0x391   :  { %7518 = vmatpush1.bf16.msra.mxu1 %v9396_v61  ;;  %7175 = vmatprep.subr.bf16.mxu0 %v9401_v62  ;;  %v9483_v61 = vld [vmem:[#allocation7 + $0xb60] ss:$16 sps:$4 sm:$0xff]   ;;  %v9486_v62 = vld [vmem:[#allocation7 + $0xb68] ss:$16 sps:$4 sm:$0xff]  }
 0x392   :  { %7519 = vmatprep.subr.bf16.mxu1 %v9404_v0  ;;  %v9491_v0 = vld [vmem:[#allocation7 + $0xb84] ss:$16 sps:$4 sm:$0xff]  }
 0x394   :  { %7176 = vmatpush1.bf16.msra.mxu0 %v9399_v1  ;;  %v9494_v1 = vld [vmem:[#allocation7 + $0xb8c] ss:$16 sps:$4 sm:$0xff]  }
 0x395   :  { %7520 = vmatpush1.bf16.msra.mxu1 %v9402_v25  ;;  %7177 = vmatprep.subr.bf16.mxu0 %v9407_v2  ;;  %v9489_v25 = vld [vmem:[#allocation7 + $0xb80] ss:$16 sps:$4 sm:$0xff]   ;;  %v9492_v2 = vld [vmem:[#allocation7 + $0xb88] ss:$16 sps:$4 sm:$0xff]  }
 0x396   :  { %7521 = vmatprep.subr.bf16.mxu1 %v9410_v5  ;;  %v9497_v5 = vld [vmem:[#allocation7 + $0xba4] ss:$16 sps:$4 sm:$0xff]  }
 0x398   :  { %7178 = vmatpush1.bf16.msra.mxu0 %v9405_v7  ;;  %v9500_v7 = vld [vmem:[#allocation7 + $0xbac] ss:$16 sps:$4 sm:$0xff]  }
 0x399   :  { %7522 = vmatpush1.bf16.msra.mxu1 %v9408_v8  ;;  %7179 = vmatprep.subr.bf16.mxu0 %v9413_v9  ;;  %v9495_v8 = vld [vmem:[#allocation7 + $0xba0] ss:$16 sps:$4 sm:$0xff]   ;;  %v9498_v9 = vld [vmem:[#allocation7 + $0xba8] ss:$16 sps:$4 sm:$0xff]  }
 0x39a   :  { %7523 = vmatprep.subr.bf16.mxu1 %v9416_v10  ;;  %v9503_v10 = vld [vmem:[#allocation7 + $0xbc4] ss:$16 sps:$4 sm:$0xff]  }
 0x39c   :  { %7180 = vmatpush1.bf16.msra.mxu0 %v9411_v11  ;;  %v9506_v11 = vld [vmem:[#allocation7 + $0xbcc] ss:$16 sps:$4 sm:$0xff]  }
 0x39d   :  { %7524 = vmatpush1.bf16.msra.mxu1 %v9414_v12  ;;  %7192 = vmatprep.subr.bf16.mxu0 %v9419_v13  ;;  %v9501_v12 = vld [vmem:[#allocation7 + $0xbc0] ss:$16 sps:$4 sm:$0xff]   ;;  %v9504_v13 = vld [vmem:[#allocation7 + $0xbc8] ss:$16 sps:$4 sm:$0xff]  }
 0x39e   :  { %7536 = vmatprep.subr.bf16.mxu1 %v9422_v28  ;;  %v9509_v28 = vld [vmem:[#allocation7 + $0xbe4] ss:$16 sps:$4 sm:$0xff]  }
 0x39f   :  { %7182 = vmatmul.mubr.bf16.vlgmr.msra.gmra.mrb[16].mxu0 %v10024_v54 }
 0x3a0   :  { %7526 = vmatmul.mubr.bf16.vlgmr.msra.gmra.mrb[16].mxu1 %v10024_v54  ;;  %7193 = vmatpush1.bf16.msra.mxu0 %v9417_v14  ;;  %v9440_v54 = vld [vmem:[#allocation7 + $0xa6c] ss:$16 sps:$4 sm:$0xff]  }
 0x3a1   :  { %7224 = vmatprep.mubr.bf16.mxu0 %v10030_v60  ;;  %7537 = vmatpush1.bf16.msra.mxu1 %v9420_v16  ;;  %v9512_v14 = vld [vmem:[#allocation7 + $0xbec] ss:$16 sps:$4 sm:$0xff]   ;;  %v9507_v16 = vld [vmem:[#allocation7 + $0xbe0] ss:$16 sps:$4 sm:$0xff]  }
 0x3a2   :  { %7568 = vmatprep.mubr.bf16.mxu1 %v10030_v60  ;;  %7194 = vmatprep.subr.bf16.mxu0 %v9425_v17  ;;  %v9441_v60 = vld [vmem:[#allocation7 + $0xa80] ss:$16 sps:$4 sm:$0xff]   ;;  %v9510_v17 = vld [vmem:[#allocation7 + $0xbe8] ss:$16 sps:$4 sm:$0xff]  }
 0x3a3   :  { %7538 = vmatprep.subr.bf16.mxu1 %v9428_v18  ;;  %v9515_v18 = vld [vmem:[#allocation7 + $0xc04] ss:$16 sps:$4 sm:$0xff]  }
 0x3a4   :  { %7195 = vmatpush1.bf16.msra.mxu0 %v9423_v52  ;;  %v9518_v52 = vld [vmem:[#allocation7 + $0xc0c] ss:$16 sps:$4 sm:$0xff]  }
 0x3a5   :  { %7539 = vmatpush1.bf16.msra.mxu1 %v9426_v4  ;;  %7196 = vmatprep.subr.bf16.mxu0 %v9431_v19  ;;  %v9513_v4 = vld [vmem:[#allocation7 + $0xc00] ss:$16 sps:$4 sm:$0xff]   ;;  %v9516_v19 = vld [vmem:[#allocation7 + $0xc08] ss:$16 sps:$4 sm:$0xff]  }
 0x3a6   :  { %7540 = vmatprep.subr.bf16.mxu1 %v9434_v63  ;;  %v9521_v63 = vld [vmem:[#allocation7 + $0xc24] ss:$16 sps:$4 sm:$0xff]  }
 0x3a8   :  { %7197 = vmatpush1.bf16.msra.mxu0 %v9429_v20  ;;  %v9524_v20 = vld [vmem:[#allocation7 + $0xc2c] ss:$16 sps:$4 sm:$0xff]  }
 0x3a9   :  { %7541 = vmatpush1.bf16.msra.mxu1 %v9432_v57  ;;  %7198 = vmatprep.subr.bf16.mxu0 %v9437_v21  ;;  %v9519_v57 = vld [vmem:[#allocation7 + $0xc20] ss:$16 sps:$4 sm:$0xff]   ;;  %v9522_v21 = vld [vmem:[#allocation7 + $0xc28] ss:$16 sps:$4 sm:$0xff]  }
 0x3aa   :  { %7542 = vmatprep.subr.bf16.mxu1 %v9440_v54  ;;  %v9527_v54 = vld [vmem:[#allocation7 + $0xc44] ss:$16 sps:$4 sm:$0xff]  }
 0x3ac   :  { %7199 = vmatpush1.bf16.msra.mxu0 %v9435_v22  ;;  %v9530_v22 = vld [vmem:[#allocation7 + $0xc4c] ss:$16 sps:$4 sm:$0xff]  }
 0x3ad   :  { %7543 = vmatpush1.bf16.msra.mxu1 %v9438_v23  ;;  %7200 = vmatprep.subr.bf16.mxu0 %v9443_v24  ;;  %v9525_v23 = vld [vmem:[#allocation7 + $0xc40] ss:$16 sps:$4 sm:$0xff]   ;;  %v9528_v24 = vld [vmem:[#allocation7 + $0xc48] ss:$16 sps:$4 sm:$0xff]  }
 0x3ae   :  { %7544 = vmatprep.subr.bf16.mxu1 %v9446_v29  ;;  %v9533_v29 = vld [vmem:[#allocation7 + $0xc64] ss:$16 sps:$4 sm:$0xff]  }
 0x3b0   :  { %7201 = vmatpush1.bf16.msra.mxu0 %v9441_v60  ;;  %v9531_v60 = vld [vmem:[#allocation7 + $0xc60] ss:$16 sps:$4 sm:$0xff]  }
 0x3b1   :  { %7545 = vmatpush1.bf16.msra.mxu1 %v9444_v31  ;;  %7202 = vmatprep.subr.bf16.mxu0 %v9449_v32  ;;  %v9534_v31 = vld [vmem:[#allocation7 + $0xc68] ss:$16 sps:$4 sm:$0xff]   ;;  %v9539_v32 = vld [vmem:[#allocation7 + $0xc84] ss:$16 sps:$4 sm:$0xff]  }
 0x3b2   :  { %7546 = vmatprep.subr.bf16.mxu1 %v9452_v33  ;;  %v9542_v33 = vld [vmem:[#allocation7 + $0xc8c] ss:$16 sps:$4 sm:$0xff]  }
 0x3b4   :  { %7203 = vmatpush1.bf16.msra.mxu0 %v9447_v34  ;;  %v9540_v34 = vld [vmem:[#allocation7 + $0xc88] ss:$16 sps:$4 sm:$0xff]  }
 0x3b5   :  { %7547 = vmatpush1.bf16.msra.mxu1 %v9450_v35  ;;  %7204 = vmatprep.subr.bf16.mxu0 %v9455_v36  ;;  %v9545_v35 = vld [vmem:[#allocation7 + $0xca4] ss:$16 sps:$4 sm:$0xff]   ;;  %v9548_v36 = vld [vmem:[#allocation7 + $0xcac] ss:$16 sps:$4 sm:$0xff]  }
 0x3b6   :  { %7548 = vmatprep.subr.bf16.mxu1 %v9458_v37  ;;  %v9543_v37 = vld [vmem:[#allocation7 + $0xca0] ss:$16 sps:$4 sm:$0xff]  }
 0x3b8   :  { %7205 = vmatpush1.bf16.msra.mxu0 %v9453_v38  ;;  %v9546_v38 = vld [vmem:[#allocation7 + $0xca8] ss:$16 sps:$4 sm:$0xff]  }
 0x3b9   :  { %7549 = vmatpush1.bf16.msra.mxu1 %v9456_v39  ;;  %7206 = vmatprep.subr.bf16.mxu0 %v9461_v40  ;;  %v9551_v39 = vld [vmem:[#allocation7 + $0xcc4] ss:$16 sps:$4 sm:$0xff]   ;;  %v9554_v40 = vld [vmem:[#allocation7 + $0xccc] ss:$16 sps:$4 sm:$0xff]  }
 0x3ba   :  { %7550 = vmatprep.subr.bf16.mxu1 %v9464_v41  ;;  %v9549_v41 = vld [vmem:[#allocation7 + $0xcc0] ss:$16 sps:$4 sm:$0xff]  }
 0x3bc   :  { %7207 = vmatpush1.bf16.msra.mxu0 %v9459_v42  ;;  %v9552_v42 = vld [vmem:[#allocation7 + $0xcc8] ss:$16 sps:$4 sm:$0xff]  }
 0x3bd   :  { %7551 = vmatpush1.bf16.msra.mxu1 %v9462_v43  ;;  %7208 = vmatprep.subr.bf16.mxu0 %v9467_v44  ;;  %v9557_v43 = vld [vmem:[#allocation7 + $0xce4] ss:$16 sps:$4 sm:$0xff]   ;;  %v9560_v44 = vld [vmem:[#allocation7 + $0xcec] ss:$16 sps:$4 sm:$0xff]  }
 0x3be   :  { %7552 = vmatprep.subr.bf16.mxu1 %v9470_v3  ;;  %v9555_v3 = vld [vmem:[#allocation7 + $0xce0] ss:$16 sps:$4 sm:$0xff]  }
 0x3c0   :  { %7209 = vmatpush1.bf16.msra.mxu0 %v9465_v45  ;;  %v9558_v45 = vld [vmem:[#allocation7 + $0xce8] ss:$16 sps:$4 sm:$0xff]  }
 0x3c1   :  { %7553 = vmatpush1.bf16.msra.mxu1 %v9468_v46  ;;  %7210 = vmatprep.subr.bf16.mxu0 %v9473_v47  ;;  %v9563_v46 = vld [vmem:[#allocation7 + $0xd04] ss:$16 sps:$4 sm:$0xff]   ;;  %v9566_v47 = vld [vmem:[#allocation7 + $0xd0c] ss:$16 sps:$4 sm:$0xff]  }
 0x3c2   :  { %7554 = vmatprep.subr.bf16.mxu1 %v9476_v48  ;;  %v9561_v48 = vld [vmem:[#allocation7 + $0xd00] ss:$16 sps:$4 sm:$0xff]  }
 0x3c4   :  { %7211 = vmatpush1.bf16.msra.mxu0 %v9471_v53  ;;  %v9564_v53 = vld [vmem:[#allocation7 + $0xd08] ss:$16 sps:$4 sm:$0xff]  }
 0x3c5   :  { %7555 = vmatpush1.bf16.msra.mxu1 %v9474_v50  ;;  %7212 = vmatprep.subr.bf16.mxu0 %v9479_v49  ;;  %v9569_v50 = vld [vmem:[#allocation7 + $0xd24] ss:$16 sps:$4 sm:$0xff]   ;;  %v9572_v49 = vld [vmem:[#allocation7 + $0xd2c] ss:$16 sps:$4 sm:$0xff]  }
 0x3c6   :  { %7556 = vmatprep.subr.bf16.mxu1 %v9482_v51  ;;  %v9567_v51 = vld [vmem:[#allocation7 + $0xd20] ss:$16 sps:$4 sm:$0xff]  }
 0x3c8   :  { %7213 = vmatpush1.bf16.msra.mxu0 %v9477_v58  ;;  %v9570_v58 = vld [vmem:[#allocation7 + $0xd28] ss:$16 sps:$4 sm:$0xff]  }
 0x3c9   :  { %7557 = vmatpush1.bf16.msra.mxu1 %v9480_v55  ;;  %7214 = vmatprep.subr.bf16.mxu0 %v9485_v59  ;;  %v9575_v55 = vld [vmem:[#allocation7 + $0xd44] ss:$16 sps:$4 sm:$0xff]   ;;  %v9578_v59 = vld [vmem:[#allocation7 + $0xd4c] ss:$16 sps:$4 sm:$0xff]  }
 0x3ca   :  { %7558 = vmatprep.subr.bf16.mxu1 %v9488_v15  ;;  %v9573_v15 = vld [vmem:[#allocation7 + $0xd40] ss:$16 sps:$4 sm:$0xff]  }
 0x3cc   :  { %7215 = vmatpush1.bf16.msra.mxu0 %v9483_v61  ;;  %v9576_v61 = vld [vmem:[#allocation7 + $0xd48] ss:$16 sps:$4 sm:$0xff]  }
 0x3cd   :  { %7559 = vmatpush1.bf16.msra.mxu1 %v9486_v62  ;;  %7216 = vmatprep.subr.bf16.mxu0 %v9491_v0  ;;  %v9581_v62 = vld [vmem:[#allocation7 + $0xd64] ss:$16 sps:$4 sm:$0xff]   ;;  %v9584_v0 = vld [vmem:[#allocation7 + $0xd6c] ss:$16 sps:$4 sm:$0xff]  }
 0x3ce   :  { %7560 = vmatprep.subr.bf16.mxu1 %v9494_v1  ;;  %v9579_v1 = vld [vmem:[#allocation7 + $0xd60] ss:$16 sps:$4 sm:$0xff]  }
 0x3d0   :  { %7217 = vmatpush1.bf16.msra.mxu0 %v9489_v25  ;;  %v9582_v25 = vld [vmem:[#allocation7 + $0xd68] ss:$16 sps:$4 sm:$0xff]  }
 0x3d1   :  { %7561 = vmatpush1.bf16.msra.mxu1 %v9492_v2  ;;  %7218 = vmatprep.subr.bf16.mxu0 %v9497_v5  ;;  %v9587_v2 = vld [vmem:[#allocation7 + $0xd84] ss:$16 sps:$4 sm:$0xff]   ;;  %v9590_v5 = vld [vmem:[#allocation7 + $0xd8c] ss:$16 sps:$4 sm:$0xff]  }
 0x3d2   :  { %7562 = vmatprep.subr.bf16.mxu1 %v9500_v7  ;;  %v9585_v7 = vld [vmem:[#allocation7 + $0xd80] ss:$16 sps:$4 sm:$0xff]  }
 0x3d4   :  { %7219 = vmatpush1.bf16.msra.mxu0 %v9495_v8  ;;  %v9588_v8 = vld [vmem:[#allocation7 + $0xd88] ss:$16 sps:$4 sm:$0xff]  }
 0x3d5   :  { %7563 = vmatpush1.bf16.msra.mxu1 %v9498_v9  ;;  %7220 = vmatprep.subr.bf16.mxu0 %v9503_v10  ;;  %v9593_v9 = vld [vmem:[#allocation7 + $0xda4] ss:$16 sps:$4 sm:$0xff]   ;;  %v9596_v10 = vld [vmem:[#allocation7 + $0xdac] ss:$16 sps:$4 sm:$0xff]  }
 0x3d6   :  { %7564 = vmatprep.subr.bf16.mxu1 %v9506_v11  ;;  %v9591_v11 = vld [vmem:[#allocation7 + $0xda0] ss:$16 sps:$4 sm:$0xff]  }
 0x3d8   :  { %7221 = vmatpush1.bf16.msra.mxu0 %v9501_v12  ;;  %v9594_v12 = vld [vmem:[#allocation7 + $0xda8] ss:$16 sps:$4 sm:$0xff]  }
 0x3d9   :  { %7565 = vmatpush1.bf16.msra.mxu1 %v9504_v13  ;;  %7222 = vmatprep.subr.bf16.mxu0 %v9509_v28  ;;  %v9599_v13 = vld [vmem:[#allocation7 + $0xdc4] ss:$16 sps:$4 sm:$0xff]   ;;  %v9602_v28 = vld [vmem:[#allocation7 + $0xdcc] ss:$16 sps:$4 sm:$0xff]  }
 0x3da   :  { %7566 = vmatprep.subr.bf16.mxu1 %v9512_v14  ;;  %v9597_v14 = vld [vmem:[#allocation7 + $0xdc0] ss:$16 sps:$4 sm:$0xff]  }
 0x3dc   :  { %7223 = vmatpush1.bf16.msra.mxu0 %v9507_v16  ;;  %v9600_v16 = vld [vmem:[#allocation7 + $0xdc8] ss:$16 sps:$4 sm:$0xff]  }
 0x3dd   :  { %7567 = vmatpush1.bf16.msra.mxu1 %v9510_v17  ;;  %7235 = vmatprep.subr.bf16.mxu0 %v9515_v18  ;;  %v9605_v17 = vld [vmem:[#allocation7 + $0xde4] ss:$16 sps:$4 sm:$0xff]   ;;  %v9608_v18 = vld [vmem:[#allocation7 + $0xdec] ss:$16 sps:$4 sm:$0xff]  }
 0x3de   :  { %7579 = vmatprep.subr.bf16.mxu1 %v9518_v52  ;;  %v9603_v52 = vld [vmem:[#allocation7 + $0xde0] ss:$16 sps:$4 sm:$0xff]  }
 0x3df   :  { %7225 = vmatmul.mubr.bf16.vlgmr.msra.gmra.mrb[16].mxu0 %v10026_v56 }
 0x3e0   :  { %7569 = vmatmul.mubr.bf16.vlgmr.msra.gmra.mrb[16].mxu1 %v10026_v56  ;;  %7236 = vmatpush1.bf16.msra.mxu0 %v9513_v4  ;;  %v9536_v56 = vld [vmem:[#allocation7 + $0xc6c] ss:$16 sps:$4 sm:$0xff]   ;;  %v9606_v4 = vld [vmem:[#allocation7 + $0xde8] ss:$16 sps:$4 sm:$0xff]  }
 0x3e1   :  { %7267 = vmatprep.mubr.bf16.mxu0 %v10044_v27  ;;  %7580 = vmatpush1.bf16.msra.mxu1 %v9516_v19  ;;  %v9611_v19 = vld [vmem:[#allocation7 + $0xe04] ss:$16 sps:$4 sm:$0xff]  }
 0x3e2   :  { %7611 = vmatprep.mubr.bf16.mxu1 %v10044_v27  ;;  %7237 = vmatprep.subr.bf16.mxu0 %v9521_v63  ;;  %v9537_v27 = vld [vmem:[#allocation7 + $0xc80] ss:$16 sps:$4 sm:$0xff]   ;;  %v9614_v63 = vld [vmem:[#allocation7 + $0xe0c] ss:$16 sps:$4 sm:$0xff]  }
 0x3e3   :  { %7581 = vmatprep.subr.bf16.mxu1 %v9524_v20  ;;  %v9609_v20 = vld [vmem:[#allocation7 + $0xe00] ss:$16 sps:$4 sm:$0xff]  }
 0x3e4   :  { %7238 = vmatpush1.bf16.msra.mxu0 %v9519_v57  ;;  %v9612_v57 = vld [vmem:[#allocation7 + $0xe08] ss:$16 sps:$4 sm:$0xff]  }
 0x3e5   :  { %7582 = vmatpush1.bf16.msra.mxu1 %v9522_v21  ;;  %7239 = vmatprep.subr.bf16.mxu0 %v9527_v54  ;;  %v9617_v21 = vld [vmem:[#allocation7 + $0xe24] ss:$16 sps:$4 sm:$0xff]   ;;  %v9620_v54 = vld [vmem:[#allocation7 + $0xe2c] ss:$16 sps:$4 sm:$0xff]  }
 0x3e6   :  { %7583 = vmatprep.subr.bf16.mxu1 %v9530_v22  ;;  %v9615_v22 = vld [vmem:[#allocation7 + $0xe20] ss:$16 sps:$4 sm:$0xff]  }
 0x3e8   :  { %7240 = vmatpush1.bf16.msra.mxu0 %v9525_v23  ;;  %v9618_v23 = vld [vmem:[#allocation7 + $0xe28] ss:$16 sps:$4 sm:$0xff]  }
 0x3e9   :  { %7584 = vmatpush1.bf16.msra.mxu1 %v9528_v24  ;;  %7241 = vmatprep.subr.bf16.mxu0 %v9533_v29  ;;  %v9623_v24 = vld [vmem:[#allocation7 + $0xe44] ss:$16 sps:$4 sm:$0xff]   ;;  %v9626_v29 = vld [vmem:[#allocation7 + $0xe4c] ss:$16 sps:$4 sm:$0xff]  }
 0x3ea   :  { %7585 = vmatprep.subr.bf16.mxu1 %v9536_v56  ;;  %v9621_v56 = vld [vmem:[#allocation7 + $0xe40] ss:$16 sps:$4 sm:$0xff]  }
 0x3ec   :  { %7242 = vmatpush1.bf16.msra.mxu0 %v9531_v60  ;;  %v9624_v60 = vld [vmem:[#allocation7 + $0xe48] ss:$16 sps:$4 sm:$0xff]  }
 0x3ed   :  { %7586 = vmatpush1.bf16.msra.mxu1 %v9534_v31  ;;  %7243 = vmatprep.subr.bf16.mxu0 %v9539_v32  ;;  %v9629_v31 = vld [vmem:[#allocation7 + $0xe64] ss:$16 sps:$4 sm:$0xff]   ;;  %v9627_v32 = vld [vmem:[#allocation7 + $0xe60] ss:$16 sps:$4 sm:$0xff]  }
 0x3ee   :  { %7587 = vmatprep.subr.bf16.mxu1 %v9542_v33  ;;  %v9630_v33 = vld [vmem:[#allocation7 + $0xe68] ss:$16 sps:$4 sm:$0xff]  }
 0x3f0   :  { %7244 = vmatpush1.bf16.msra.mxu0 %v9537_v27  ;;  %v9635_v27 = vld [vmem:[#allocation7 + $0xe84] ss:$16 sps:$4 sm:$0xff]  }
 0x3f1   :  { %7588 = vmatpush1.bf16.msra.mxu1 %v9540_v34  ;;  %7245 = vmatprep.subr.bf16.mxu0 %v9545_v35  ;;  %v9638_v34 = vld [vmem:[#allocation7 + $0xe8c] ss:$16 sps:$4 sm:$0xff]   ;;  %v9636_v35 = vld [vmem:[#allocation7 + $0xe88] ss:$16 sps:$4 sm:$0xff]  }
 0x3f2   :  { %7589 = vmatprep.subr.bf16.mxu1 %v9548_v36  ;;  %v9641_v36 = vld [vmem:[#allocation7 + $0xea4] ss:$16 sps:$4 sm:$0xff]  }
 0x3f4   :  { %7246 = vmatpush1.bf16.msra.mxu0 %v9543_v37  ;;  %v9644_v37 = vld [vmem:[#allocation7 + $0xeac] ss:$16 sps:$4 sm:$0xff]  }
 0x3f5   :  { %7590 = vmatpush1.bf16.msra.mxu1 %v9546_v38  ;;  %7247 = vmatprep.subr.bf16.mxu0 %v9551_v39  ;;  %v9639_v38 = vld [vmem:[#allocation7 + $0xea0] ss:$16 sps:$4 sm:$0xff]   ;;  %v9642_v39 = vld [vmem:[#allocation7 + $0xea8] ss:$16 sps:$4 sm:$0xff]  }
 0x3f6   :  { %7591 = vmatprep.subr.bf16.mxu1 %v9554_v40  ;;  %v9647_v40 = vld [vmem:[#allocation7 + $0xec4] ss:$16 sps:$4 sm:$0xff]  }
 0x3f8   :  { %7248 = vmatpush1.bf16.msra.mxu0 %v9549_v41  ;;  %v9650_v41 = vld [vmem:[#allocation7 + $0xecc] ss:$16 sps:$4 sm:$0xff]  }
 0x3f9   :  { %7592 = vmatpush1.bf16.msra.mxu1 %v9552_v42  ;;  %7249 = vmatprep.subr.bf16.mxu0 %v9557_v43  ;;  %v9645_v42 = vld [vmem:[#allocation7 + $0xec0] ss:$16 sps:$4 sm:$0xff]   ;;  %v9648_v43 = vld [vmem:[#allocation7 + $0xec8] ss:$16 sps:$4 sm:$0xff]  }
 0x3fa   :  { %7593 = vmatprep.subr.bf16.mxu1 %v9560_v44  ;;  %v9653_v44 = vld [vmem:[#allocation7 + $0xee4] ss:$16 sps:$4 sm:$0xff]  }
 0x3fc   :  { %7250 = vmatpush1.bf16.msra.mxu0 %v9555_v3  ;;  %v9656_v3 = vld [vmem:[#allocation7 + $0xeec] ss:$16 sps:$4 sm:$0xff]  }
 0x3fd   :  { %7594 = vmatpush1.bf16.msra.mxu1 %v9558_v45  ;;  %7251 = vmatprep.subr.bf16.mxu0 %v9563_v46  ;;  %v9651_v45 = vld [vmem:[#allocation7 + $0xee0] ss:$16 sps:$4 sm:$0xff]   ;;  %v9654_v46 = vld [vmem:[#allocation7 + $0xee8] ss:$16 sps:$4 sm:$0xff]  }
 0x3fe   :  { %7595 = vmatprep.subr.bf16.mxu1 %v9566_v47  ;;  %v9659_v47 = vld [vmem:[#allocation7 + $0xf04] ss:$16 sps:$4 sm:$0xff]  }
 0x400   :  { %7252 = vmatpush1.bf16.msra.mxu0 %v9561_v48  ;;  %v9662_v48 = vld [vmem:[#allocation7 + $0xf0c] ss:$16 sps:$4 sm:$0xff]  }
 0x401   :  { %7596 = vmatpush1.bf16.msra.mxu1 %v9564_v53  ;;  %7253 = vmatprep.subr.bf16.mxu0 %v9569_v50  ;;  %v9657_v53 = vld [vmem:[#allocation7 + $0xf00] ss:$16 sps:$4 sm:$0xff]   ;;  %v9660_v50 = vld [vmem:[#allocation7 + $0xf08] ss:$16 sps:$4 sm:$0xff]  }
 0x402   :  { %7597 = vmatprep.subr.bf16.mxu1 %v9572_v49  ;;  %v9665_v49 = vld [vmem:[#allocation7 + $0xf24] ss:$16 sps:$4 sm:$0xff]  }
 0x404   :  { %7254 = vmatpush1.bf16.msra.mxu0 %v9567_v51  ;;  %v9668_v51 = vld [vmem:[#allocation7 + $0xf2c] ss:$16 sps:$4 sm:$0xff]  }
 0x405   :  { %7598 = vmatpush1.bf16.msra.mxu1 %v9570_v58  ;;  %7255 = vmatprep.subr.bf16.mxu0 %v9575_v55  ;;  %v9663_v58 = vld [vmem:[#allocation7 + $0xf20] ss:$16 sps:$4 sm:$0xff]   ;;  %v9666_v55 = vld [vmem:[#allocation7 + $0xf28] ss:$16 sps:$4 sm:$0xff]  }
 0x406   :  { %7599 = vmatprep.subr.bf16.mxu1 %v9578_v59  ;;  %v9671_v59 = vld [vmem:[#allocation7 + $0xf44] ss:$16 sps:$4 sm:$0xff]  }
 0x408   :  { %7256 = vmatpush1.bf16.msra.mxu0 %v9573_v15  ;;  %v9674_v15 = vld [vmem:[#allocation7 + $0xf4c] ss:$16 sps:$4 sm:$0xff]  }
 0x409   :  { %7600 = vmatpush1.bf16.msra.mxu1 %v9576_v61  ;;  %7257 = vmatprep.subr.bf16.mxu0 %v9581_v62  ;;  %v9669_v61 = vld [vmem:[#allocation7 + $0xf40] ss:$16 sps:$4 sm:$0xff]   ;;  %v9672_v62 = vld [vmem:[#allocation7 + $0xf48] ss:$16 sps:$4 sm:$0xff]  }
 0x40a   :  { %7601 = vmatprep.subr.bf16.mxu1 %v9584_v0  ;;  %v9677_v0 = vld [vmem:[#allocation7 + $0xf64] ss:$16 sps:$4 sm:$0xff]  }
 0x40c   :  { %7258 = vmatpush1.bf16.msra.mxu0 %v9579_v1  ;;  %v9680_v1 = vld [vmem:[#allocation7 + $0xf6c] ss:$16 sps:$4 sm:$0xff]  }
 0x40d   :  { %7602 = vmatpush1.bf16.msra.mxu1 %v9582_v25  ;;  %7259 = vmatprep.subr.bf16.mxu0 %v9587_v2  ;;  %v9675_v25 = vld [vmem:[#allocation7 + $0xf60] ss:$16 sps:$4 sm:$0xff]   ;;  %v9678_v2 = vld [vmem:[#allocation7 + $0xf68] ss:$16 sps:$4 sm:$0xff]  }
 0x40e   :  { %7603 = vmatprep.subr.bf16.mxu1 %v9590_v5  ;;  %v9683_v5 = vld [vmem:[#allocation7 + $0xf84] ss:$16 sps:$4 sm:$0xff]  }
 0x410   :  { %7260 = vmatpush1.bf16.msra.mxu0 %v9585_v7  ;;  %v9686_v7 = vld [vmem:[#allocation7 + $0xf8c] ss:$16 sps:$4 sm:$0xff]  }
 0x411   :  { %7604 = vmatpush1.bf16.msra.mxu1 %v9588_v8  ;;  %7261 = vmatprep.subr.bf16.mxu0 %v9593_v9  ;;  %v9681_v8 = vld [vmem:[#allocation7 + $0xf80] ss:$16 sps:$4 sm:$0xff]   ;;  %v9684_v9 = vld [vmem:[#allocation7 + $0xf88] ss:$16 sps:$4 sm:$0xff]  }
 0x412   :  { %7605 = vmatprep.subr.bf16.mxu1 %v9596_v10  ;;  %v9689_v10 = vld [vmem:[#allocation7 + $0xfa4] ss:$16 sps:$4 sm:$0xff]  }
 0x414   :  { %7262 = vmatpush1.bf16.msra.mxu0 %v9591_v11  ;;  %v9692_v11 = vld [vmem:[#allocation7 + $0xfac] ss:$16 sps:$4 sm:$0xff]  }
 0x415   :  { %7606 = vmatpush1.bf16.msra.mxu1 %v9594_v12  ;;  %7263 = vmatprep.subr.bf16.mxu0 %v9599_v13  ;;  %v9687_v12 = vld [vmem:[#allocation7 + $0xfa0] ss:$16 sps:$4 sm:$0xff]   ;;  %v9690_v13 = vld [vmem:[#allocation7 + $0xfa8] ss:$16 sps:$4 sm:$0xff]  }
 0x416   :  { %7607 = vmatprep.subr.bf16.mxu1 %v9602_v28  ;;  %v9695_v28 = vld [vmem:[#allocation7 + $0xfc4] ss:$16 sps:$4 sm:$0xff]  }
 0x418   :  { %7264 = vmatpush1.bf16.msra.mxu0 %v9597_v14  ;;  %v9698_v14 = vld [vmem:[#allocation7 + $0xfcc] ss:$16 sps:$4 sm:$0xff]  }
 0x419   :  { %7608 = vmatpush1.bf16.msra.mxu1 %v9600_v16  ;;  %7265 = vmatprep.subr.bf16.mxu0 %v9605_v17  ;;  %v9693_v16 = vld [vmem:[#allocation7 + $0xfc0] ss:$16 sps:$4 sm:$0xff]   ;;  %v9696_v17 = vld [vmem:[#allocation7 + $0xfc8] ss:$16 sps:$4 sm:$0xff]  }
 0x41a   :  { %7609 = vmatprep.subr.bf16.mxu1 %v9608_v18  ;;  %v9701_v18 = vld [vmem:[#allocation7 + $0xfe4] ss:$16 sps:$4 sm:$0xff]  }
 0x41c   :  { %7266 = vmatpush1.bf16.msra.mxu0 %v9603_v52  ;;  %v9704_v52 = vld [vmem:[#allocation7 + $0xfec] ss:$16 sps:$4 sm:$0xff]  }
 0x41d   :  { %7610 = vmatpush1.bf16.msra.mxu1 %v9606_v4  ;;  %7278 = vmatprep.subr.bf16.mxu0 %v9611_v19  ;;  %v9699_v4 = vld [vmem:[#allocation7 + $0xfe0] ss:$16 sps:$4 sm:$0xff]   ;;  %v9702_v19 = vld [vmem:[#allocation7 + $0xfe8] ss:$16 sps:$4 sm:$0xff]  }
 0x41e   :  { %7622 = vmatprep.subr.bf16.mxu1 %v9614_v63 }
 0x41f   :  { %7268 = vmatmul.mubr.bf16.vlgmr.msra.gmra.mrb[16].mxu0 %v10040_v6 }
 0x420   :  { %7612 = vmatmul.mubr.bf16.vlgmr.msra.gmra.mrb[16].mxu1 %v10040_v6  ;;  %7279 = vmatpush1.bf16.msra.mxu0 %v9609_v20  ;;  %v9632_v6 = vld [vmem:[#allocation7 + $0xe6c] ss:$16 sps:$4 sm:$0xff]   ;;  %v9709_v20 = vld [vmem:[#allocation2] sm:$0xff] }
 0x421   :  { %7310 = vmatprep.mubr.bf16.mxu0 %v10046_v30  ;;  %7623 = vmatpush1.bf16.msra.mxu1 %v9612_v57 }
 0x422   :  { %7654 = vmatprep.mubr.bf16.mxu1 %v10046_v30  ;;  %7280 = vmatprep.subr.bf16.mxu0 %v9617_v21  ;;  %v9633_v30 = vld [vmem:[#allocation7 + $0xe80] ss:$16 sps:$4 sm:$0xff]  }
 0x423   :  { %7624 = vmatprep.subr.bf16.mxu1 %v9620_v54 }
 0x424   :  { %7281 = vmatpush1.bf16.msra.mxu0 %v9615_v22  ;;  %v9710_v22 = vld [vmem:[#allocation2 + $0x8] sm:$0xff] }
 0x425   :  { %7625 = vmatpush1.bf16.msra.mxu1 %v9618_v23  ;;  %7282 = vmatprep.subr.bf16.mxu0 %v9623_v24 }
 0x426   :  { %7626 = vmatprep.subr.bf16.mxu1 %v9626_v29 }
 0x428   :  { %7283 = vmatpush1.bf16.msra.mxu0 %v9621_v56  ;;  %v9711_v56 = vld [vmem:[#allocation2 + $0x20] sm:$0xff] }
 0x429   :  { %7627 = vmatpush1.bf16.msra.mxu1 %v9624_v60  ;;  %7284 = vmatprep.subr.bf16.mxu0 %v9629_v31 }
 0x42a   :  { %7628 = vmatprep.subr.bf16.mxu1 %v9632_v6 }
 0x42c   :  { %7285 = vmatpush1.bf16.msra.mxu0 %v9627_v32  ;;  %v9712_v32 = vld [vmem:[#allocation2 + $0x10] sm:$0xff] }
 0x42d   :  { %7629 = vmatpush1.bf16.msra.mxu1 %v9630_v33  ;;  %7286 = vmatprep.subr.bf16.mxu0 %v9635_v27 }
 0x42e   :  { %7630 = vmatprep.subr.bf16.mxu1 %v9638_v34  ;;  %v9713_v34 = vld [vmem:[#allocation2 + $0x28] sm:$0xff] }
 0x430   :  { %7287 = vmatpush1.bf16.msra.mxu0 %v9633_v30 }
 0x431   :  { %7631 = vmatpush1.bf16.msra.mxu1 %v9636_v35  ;;  %7288 = vmatprep.subr.bf16.mxu0 %v9641_v36 }
 0x432   :  { %7632 = vmatprep.subr.bf16.mxu1 %v9644_v37  ;;  %v9715_v37 = vld [vmem:[#allocation2 + $0x30] sm:$0xff] }
 0x434   :  { %7289 = vmatpush1.bf16.msra.mxu0 %v9639_v38 }
 0x435   :  { %7633 = vmatpush1.bf16.msra.mxu1 %v9642_v39  ;;  %7290 = vmatprep.subr.bf16.mxu0 %v9647_v40 }
 0x436   :  { %7634 = vmatprep.subr.bf16.mxu1 %v9650_v41 }
 0x438   :  { %7291 = vmatpush1.bf16.msra.mxu0 %v9645_v42 }
 0x439   :  { %7635 = vmatpush1.bf16.msra.mxu1 %v9648_v43  ;;  %7292 = vmatprep.subr.bf16.mxu0 %v9653_v44  ;;  %v9716_v43 = vld [vmem:[#allocation2 + $0x38] sm:$0xff] }
 0x43a   :  { %7636 = vmatprep.subr.bf16.mxu1 %v9656_v3 }
 0x43c   :  { %7293 = vmatpush1.bf16.msra.mxu0 %v9651_v45 }
 0x43d   :  { %7637 = vmatpush1.bf16.msra.mxu1 %v9654_v46  ;;  %7294 = vmatprep.subr.bf16.mxu0 %v9659_v47 }
 0x43e   :  { %7638 = vmatprep.subr.bf16.mxu1 %v9662_v48 }
 0x440   :  { %7295 = vmatpush1.bf16.msra.mxu0 %v9657_v53 }
 0x441   :  { %7639 = vmatpush1.bf16.msra.mxu1 %v9660_v50  ;;  %7296 = vmatprep.subr.bf16.mxu0 %v9665_v49 }
 0x442   :  { %7640 = vmatprep.subr.bf16.mxu1 %v9668_v51 }
 0x444   :  { %7297 = vmatpush1.bf16.msra.mxu0 %v9663_v58 }
 0x445   :  { %7641 = vmatpush1.bf16.msra.mxu1 %v9666_v55  ;;  %7298 = vmatprep.subr.bf16.mxu0 %v9671_v59 }
 0x446   :  { %7642 = vmatprep.subr.bf16.mxu1 %v9674_v15 }
 0x448   :  { %7299 = vmatpush1.bf16.msra.mxu0 %v9669_v61 }
 0x449   :  { %7643 = vmatpush1.bf16.msra.mxu1 %v9672_v62  ;;  %7300 = vmatprep.subr.bf16.mxu0 %v9677_v0 }
 0x44a   :  { %7644 = vmatprep.subr.bf16.mxu1 %v9680_v1 }
 0x44c   :  { %7301 = vmatpush1.bf16.msra.mxu0 %v9675_v25 }
 0x44d   :  { %7645 = vmatpush1.bf16.msra.mxu1 %v9678_v2  ;;  %7302 = vmatprep.subr.bf16.mxu0 %v9683_v5 }
 0x44e   :  { %7646 = vmatprep.subr.bf16.mxu1 %v9686_v7 }
 0x450   :  { %7303 = vmatpush1.bf16.msra.mxu0 %v9681_v8 }
 0x451   :  { %7647 = vmatpush1.bf16.msra.mxu1 %v9684_v9  ;;  %7304 = vmatprep.subr.bf16.mxu0 %v9689_v10 }
 0x452   :  { %7648 = vmatprep.subr.bf16.mxu1 %v9692_v11 }
 0x454   :  { %7305 = vmatpush1.bf16.msra.mxu0 %v9687_v12 }
 0x455   :  { %7649 = vmatpush1.bf16.msra.mxu1 %v9690_v13  ;;  %7306 = vmatprep.subr.bf16.mxu0 %v9695_v28 }
 0x456   :  { %7650 = vmatprep.subr.bf16.mxu1 %v9698_v14 }
 0x458   :  { %7307 = vmatpush1.bf16.msra.mxu0 %v9693_v16  ;;  %v7720_v16 = vlaneseq }
 0x459   :  { %7651 = vmatpush1.bf16.msra.mxu1 %v9696_v17  ;;  %7308 = vmatprep.subr.bf16.mxu0 %v9701_v18 }
 0x45a   :  { %7652 = vmatprep.subr.bf16.mxu1 %v9704_v52 }
 0x45c   :  { %7309 = vmatpush1.bf16.msra.mxu0 %v9699_v4  ;;  %v7721_v4 = vshrl.u32 %v7720_v16, 7 }
 0x45d   :  { %7653 = vmatpush1.bf16.msra.mxu1 %v9702_v19 }
 0x45f   :  { %7311 = vmatmul.mubr.bf16.vlgmr.msra.gmra.mrb[16].mxu0 %v10042_v26 }
 0x460   :  { %7655 = vmatmul.mubr.bf16.vlgmr.msra.gmra.mrb[16].mxu1 %v10042_v26  ;;  %v9714_v26 = vld [vmem:[#allocation2 + $0x18] sm:$0xff] }
 0x532   :  { %v7312_v63 = vpop.f32.mrb[16].mxu0 }
 0x533   :  { %v8829_v57 = vadd.f32 %v9709_v20, %v7312_v63  ;;  %v7656_v21 = vpop.f32.mrb[16].mxu1  ;;  %v7314_v54 = vpop.f32.mrb[17].mxu0  ;;  %v7722_v63 = vsub.s32 0, %v7721_v4  ;;  %v7726_v20 = vsub.s32 1, %v7721_v4 }
 0x534   :  { %v8830_v23 = vadd.f32 %v9710_v22, %v7314_v54  ;;  %v7658_v24 = vpop.f32.mrb[17].mxu1  ;;  %v7316_v29 = vpop.f32.mrb[18].mxu0  ;;  %v8833_v33 = vadd.f32 %v9712_v32, %v7656_v21  ;;  %v7734_v21 = vsub.s32 3, %v7721_v4  ;;  %v7718_v54 = vld [vmem:[#allocation8] sm:$0xf] }
 0x535   :  { %v8831_v60 = vadd.f32 %v9711_v56, %v7316_v29  ;;  %v7660_v31 = vpop.f32.mrb[18].mxu1  ;;  %v7318_v6 = vpop.f32.mrb[19].mxu0  ;;  %v8834_v36 = vadd.f32 %v9714_v26, %v7658_v24  ;;  %v7723_v22 = vrot.slane %v7718_v54, %v7722_v63  ;;  %v7748_v56 = vld [vmem:[#allocation10] sm:$0xf] }
 0x536   :  { %v7665_v27 = vadd.f32 %v8830_v23, %v8829_v57  ;;  %v8832_v30 = vadd.f32 %v9713_v34, %v7318_v6  ;;  %v7662_v35 = vpop.f32.mrb[19].mxu1  ;;  %v8835_v38 = vadd.f32 %v9715_v37, %v7660_v31  ;;  %v7735_v29 = vrot.slane %v7718_v54, %v7734_v21 }
 0x537   :  { %v8836_v44 = vadd.f32 %v9716_v43, %v7662_v35  ;;  %v7757_v34 = vrot.slane %v7748_v56, %v7726_v20  ;;  %v7765_v35 = vrot.slane %v7748_v56, %v7734_v21 }
 0x538   :  { %v7670_v39 = vadd.f32 %v8832_v30, %v8831_v60  ;;  %v7666_v40 = vadd.f32 %v8833_v33, %v7665_v27  ;;  %v7753_v27 = vrot.slane %v7748_v56, %v7722_v63 }
 0x53a   :  { %v7667_v41 = vadd.f32 %v8834_v36, %v7666_v40  ;;  %v7671_v42 = vadd.f32 %v8835_v38, %v7670_v39 }
 0x53c   :  { %7668 = vadd.xlane.f32.xlu0 %v7667_v41  ;;  %v7672_v3 = vadd.f32 %v8836_v44, %v7671_v42 }
 0x540   :  { %7673 = vadd.xlane.f32.xlu0 %v7672_v3 }
 0x5c9   :  { %v7669_v45 = vpop.xlane.xlu0 %7668 }
 0x5ca   :  { %v7676_v46 = vmul.f32 0.001953125, %v7669_v45 }
 0x5cc   :  { %v7678_v47 = vsub.f32 %v8829_v57, %v7676_v46  ;;  %v7679_v48 = vsub.f32 %v8830_v23, %v7676_v46  ;;  %v7680_v53 = vsub.f32 %v8833_v33, %v7676_v46  ;;  %v7681_v49 = vsub.f32 %v8834_v36, %v7676_v46 }
 0x5cd   :  { %v7674_v50 = vpop.xlane.xlu0 %7673  ;;  %v7730_v57 = vsub.s32 2, %v7721_v4  ;;  %v7727_v23 = vrot.slane %v7718_v54, %v7726_v20 }
 0x5ce   :  { %v7677_v51 = vmul.f32 0.001953125, %v7674_v50  ;;  %v7686_v58 = vmul.f32 %v7678_v47, %v7678_v47  ;;  %v7687_v55 = vmul.f32 %v7679_v48, %v7679_v48  ;;  %v7688_v59 = vmul.f32 %v7680_v53, %v7680_v53 }
 0x5cf   :  { %v7689_v1 = vmul.f32 %v7681_v49, %v7681_v49  ;;  %v7731_v24 = vrot.slane %v7718_v54, %v7730_v57 }
 0x5d0   :  { %v7682_v15 = vsub.f32 %v8831_v60, %v7677_v51  ;;  %v7683_v61 = vsub.f32 %v8832_v30, %v7677_v51  ;;  %v7694_v62 = vadd.f32 %v7687_v55, %v7686_v58  ;;  %v7684_v0 = vsub.f32 %v8835_v38, %v7677_v51 }
 0x5d1   :  { %v7685_v2 = vsub.f32 %v8836_v44, %v7677_v51  ;;  %v7761_v30 = vrot.slane %v7748_v56, %v7730_v57 }
 0x5d2   :  { %v7695_v25 = vadd.f32 %v7694_v62, %v7688_v59  ;;  %v7690_v5 = vmul.f32 %v7682_v15, %v7682_v15  ;;  %v7691_v7 = vmul.f32 %v7683_v61, %v7683_v61  ;;  %v7692_v9 = vmul.f32 %v7684_v0, %v7684_v0 }
 0x5d3   :  { %v7693_v11 = vmul.f32 %v7685_v2, %v7685_v2 }
 0x5d4   :  { %v7696_v8 = vadd.f32 %v7695_v25, %v7689_v1  ;;  %v7699_v10 = vadd.f32 %v7691_v7, %v7690_v5 }
 0x5d6   :  { %7697 = vadd.xlane.f32.xlu1 %v7696_v8  ;;  %v7700_v12 = vadd.f32 %v7699_v10, %v7692_v9 }
 0x5d8   :  { %v7701_v13 = vadd.f32 %v7700_v12, %v7693_v11 }
 0x5da   :  { %7702 = vadd.xlane.f32.xlu1 %v7701_v13 }
 0x663   :  { %v7698_v28 = vpop.xlane.xlu1 %7697 }
 0x664   :  { %v7704_v14 = vmul.f32 0.001953125, %v7698_v28 }
 0x666   :  { %v7706_v17 = vadd.f32 1e-05, %v7704_v14 }
 0x667   :  { %v7703_v18 = vpop.xlane.xlu1 %7702 }
 0x668   :  { %9705 = vrsqrt.f32 %v7706_v17  ;;  %v7705_v52 = vmul.f32 0.001953125, %v7703_v18 }
 0x66a   :  { %v7707_v19 = vadd.f32 1e-05, %v7705_v52 }
 0x66c   :  { %9707 = vrsqrt.f32 %v7707_v19 }
 0x672   :  { %v9706_v60 = vpop.eup %9705 }
 0x673   :  { %v7710_v31 = vmul.f32 %v9706_v60, %v7678_v47  ;;  %v7711_v6 = vmul.f32 %v9706_v60, %v7679_v48  ;;  %v7712_v32 = vmul.f32 %v9706_v60, %v7680_v53  ;;  %v7713_v33 = vmul.f32 %v9706_v60, %v7681_v49 }
 0x675   :  { %v7740_v26 = vmul.f32 %v7723_v22, %v7710_v31  ;;  %v7741_v36 = vmul.f32 %v7727_v23, %v7711_v6  ;;  %v7742_v37 = vmul.f32 %v7731_v24, %v7712_v32  ;;  %v7743_v38 = vmul.f32 %v7735_v29, %v7713_v33 }
 0x676   :  { %v9708_v39 = vpop.eup %9707 }
 0x677   :  { %v7714_v40 = vmul.f32 %v9708_v39, %v7682_v15  ;;  %v7715_v41 = vmul.f32 %v9708_v39, %v7683_v61  ;;  %v7716_v42 = vmul.f32 %v9708_v39, %v7684_v0  ;;  %v7717_v43 = vmul.f32 %v9708_v39, %v7685_v2 }
 0x678   :  { %v7770_v44 = vadd.f32 %v7753_v27, %v7740_v26  ;;  %v7771_v3 = vadd.f32 %v7757_v34, %v7741_v36  ;;  %v7772_v45 = vadd.f32 %v7761_v30, %v7742_v37  ;;  %v7773_v46 = vadd.f32 %v7765_v35, %v7743_v38 }
 0x679   :  { %v7744_v47 = vmul.f32 %v7723_v22, %v7714_v40  ;;  %v7745_v48 = vmul.f32 %v7727_v23, %v7715_v41  ;;  %v7746_v53 = vmul.f32 %v7731_v24, %v7716_v42  ;;  %v7747_v50 = vmul.f32 %v7735_v29, %v7717_v43 }
 0x67a   :  { %7778 = vst [vmem:[#allocation11] sm:$0xff] %v7770_v44  ;;  %7779 = vst [vmem:[#allocation11 + $0x8] sm:$0xff] %v7771_v3 }
 0x67b   :  { %7780 = vst [vmem:[#allocation11 + $0x10] sm:$0xff] %v7772_v45  ;;  %7781 = vst [vmem:[#allocation11 + $0x18] sm:$0xff] %v7773_v46  ;;  %v7774_v49 = vadd.f32 %v7753_v27, %v7744_v47  ;;  %v7775_v51 = vadd.f32 %v7757_v34, %v7745_v48  ;;  %v7776_v58 = vadd.f32 %v7761_v30, %v7746_v53 }
 0x67c   :  { %v7777_v55 = vadd.f32 %v7765_v35, %v7747_v50 }
 0x67d   :  { %7782 = vst [vmem:[#allocation11 + $0x20] sm:$0xff] %v7774_v49  ;;  %7783 = vst [vmem:[#allocation11 + $0x28] sm:$0xff] %v7775_v51 }
 0x67e   :  { %7784 = vst [vmem:[#allocation11 + $0x30] sm:$0xff] %v7776_v58  ;;  %7785 = vst [vmem:[#allocation11 + $0x38] sm:$0xff] %v7777_v55 }
 0x67f   :  { %9838 = shalt.err (!%p9835_p2)
}
 0x680   :  { %s9839_s9 = scalar_lea.hbm %s10086_s5, 1024 }
 0x681   :  { %p9840_p3 = scmp.ne.s32.totalorder %s10086_s5, %s9839_s9  ;;  %p9843_p4 = scmp.lt.u32.totalorder %s9839_s9, %s10086_s5 }
 0x683   :  { %p9845_p5 = pnand %p9843_p4, %p9840_p3 }
 0x685   :  { %9848 = shalt.err (!%p9845_p5)
}
 0x686   :  { %7797 = dma.vmem_to_hbm [thread:$0]  %s7792_s30, 1024, %s10086_s5, [#allocation4], %s9862_s3, %s9862_s3, %s9863_s28  }
 0x687   :  { %9855 = dma.done.wait [#allocation4], 1024  }
 0x688   :  { %9856 = vsyncadd [#allocation4], 4294966272 }
 0x689   :  { %7801 = vsyncpa [#allocation3], 1 }
 0x68a   :  { %7802 = vsyncpa [#allocation6], 1 }
 0x68b   :  { %7803 = vsyncpa [#allocation9], 1 }
 0x68c   :  { %7804 = vsyncpa [#allocation4], 1 }

</bundles_post_ra>
